<compile_context>
chip_gen: v7x
topology: tpu7x:2x2x1
jax: 0.10.0
libtpu: 0.0.40
codegen_flags: <defaults>
</compile_context>

<pallas_src>
import functools
import math

import jax
import jax.numpy as jnp
from jax.experimental import pallas as pl
from jax.experimental.pallas import tpu as pltpu

NOUT = 40      # shallownet channel count (hard-coded in the PyTorch module)
K1 = 25        # temporal kernel width of the first conv
POOL_K = 75    # AvgPool2d kernel (time)
POOL_S = 15    # AvgPool2d stride (time)
BN_EPS = 1e-5


def _roundup(x, m):
    return ((x + m - 1) // m) * m


def _patch_embed_kernel(x_ref, we_ref, pc_ref, wp_ref, o_ref, *,
                        B, T, W1, Wp, BTP, OPAD):
    """Fused shallownet + projection for the whole (small) batch.

    x_ref : (CP, TPAD)      input laid out as [c, b*T + t]; channels zero-padded to
                            CP = roundup(C, 8), time zero-padded to TPAD >= BTP + K1 - 1
    we_ref: (NOUT, K1*CP)   fused conv weight, column index = k*CP + c (zeros for c >= C)
    pc_ref: (RS, 8)         packed params: col0=b_eff, col1=gamma, col2=beta (rows :NOUT),
                            col3=projection bias (rows :E)
    wp_ref: (E, NOUT)       1x1 projection weight
    o_ref : (E, OPAD)       output, column index = b*Wp + p (columns >= B*Wp are padding)
    """
    xr = x_ref[...]                                      # (CP, TPAD) f32
    E = o_ref.shape[0]

    # --- im2col: K1 whole-array lane slices stacked along sublanes ------------------
    # cols[k*CP + c, b*T + t] = x[b, c, t + k]   (valid while t + k stays in batch b)
    cols = jnp.concatenate([xr[:, k:k + BTP] for k in range(K1)], axis=0)  # (K1*CP, BTP)

    # --- packed small params ----------------------------------------------------------
    pc = pc_ref[...]
    b_eff = pc[:NOUT, 0:1]
    gamma = pc[:NOUT, 1:2]
    beta = pc[:NOUT, 2:3]
    proj_b = pc[:E, 3:4]

    # --- fused conv1+conv2: one MXU matmul ---------------------------------------------
    h = jnp.dot(we_ref[...], cols, preferred_element_type=jnp.float32) + b_eff  # (NOUT, BTP)

    # --- BatchNorm2d (training-mode biased batch stats), single masked pass ------------
    # Valid columns are col = b*T + t with t < W1; the temporal tails (which read across
    # the batch boundary) and the lane padding are finite garbage and must be excluded.
    col = jax.lax.broadcasted_iota(jnp.int32, (NOUT, BTP), 1)
    valid = None
    for b in range(B):
        vb = (col >= b * T) & (col < b * T + W1)
        valid = vb if valid is None else (valid | vb)

    hm = jnp.where(valid, h, 0.0)                               # mask BEFORE reductions
    inv_n = 1.0 / float(B * W1)
    mean = jnp.sum(hm, axis=1, keepdims=True) * inv_n           # (NOUT, 1)
    ex2 = jnp.sum(hm * hm, axis=1, keepdims=True) * inv_n       # (NOUT, 1)
    var = ex2 - mean * mean
    hn = (h - mean) * jax.lax.rsqrt(var + BN_EPS) * gamma + beta

    # --- ELU(alpha=1) -------------------------------------------------------------------
    he = jnp.where(hn > 0, hn, jnp.exp(jnp.minimum(hn, 0.0)) - 1.0)

    # --- AvgPool2d((1,75),(1,15)) as ONE matmul with a block-diagonal constant ----------
    # pool_mat[b*T + t, b*Wp + p] = 1/POOL_K  iff  0 <= t - p*POOL_S < POOL_K.
    # Pool windows never touch t >= W1, so invalid tail / padded rows and the padded
    # output columns are all-zero -> no per-batch slicing or tail drop needed.
    r = jax.lax.broadcasted_iota(jnp.int32, (BTP, OPAD), 0)
    c = jax.lax.broadcasted_iota(jnp.int32, (BTP, OPAD), 1)
    sel = None
    for b in range(B):
        off = (r - b * T) - (c - b * Wp) * POOL_S
        blk = (c >= b * Wp) & (c < (b + 1) * Wp) & (off >= 0) & (off < POOL_K)
        sel = blk if sel is None else (sel | blk)
    pool_mat = jnp.where(sel, 1.0 / POOL_K, 0.0)                # (BTP, OPAD) f32

    pooled = jnp.dot(he, pool_mat, preferred_element_type=jnp.float32)   # (NOUT, OPAD)

    # TODO(synk): Dropout(0.5) treated as identity (inference semantics).

    # --- 1x1-conv projection: one matmul, one lane-dense store ---------------------------
    o_ref[...] = jnp.dot(wp_ref[...], pooled,
                         preferred_element_type=jnp.float32) + proj_b


def patch_embedding_forward(x, params):
    """x: (B, 1, C, T) float32 (NCHW, like PyTorch). Returns (B, Wp, E)."""
    B, _, C, T = x.shape
    W1 = T - K1 + 1
    Wp = (W1 - POOL_K) // POOL_S + 1
    E = params["wp"].shape[0]
    CP = params["w_eff"].shape[1] // K1
    RS = params["sidecar"].shape[0]
    BT = B * T
    BTP = _roundup(BT, 128)                 # lane-dense matmul N dimension
    OPAD = _roundup(B * Wp, 128)            # lane-dense output width
    tpad = _roundup(BTP + K1 - 1, 128)      # room for the K1 lane-shifted slices

    # Layout plumbing only: (B,1,C,T) -> (CP, tpad), zero-padded on channels & time.
    xr = jnp.transpose(x[:, 0], (1, 0, 2)).reshape(C, BT)
    xr = jnp.pad(xr, ((0, CP - C), (0, tpad - BT)))

    out = pl.pallas_call(
        functools.partial(_patch_embed_kernel, B=B, T=T, W1=W1, Wp=Wp,
                          BTP=BTP, OPAD=OPAD),
        out_shape=jax.ShapeDtypeStruct((E, OPAD), jnp.float32),
        grid=(1,),
        in_specs=[
            pl.BlockSpec((CP, tpad), lambda i: (0, 0)),
            pl.BlockSpec((NOUT, K1 * CP), lambda i: (0, 0)),
            pl.BlockSpec((RS, 8), lambda i: (0, 0)),
            pl.BlockSpec((E, NOUT), lambda i: (0, 0)),
        ],
        out_specs=pl.BlockSpec((E, OPAD), lambda i: (0, 0)),
        compiler_params=pltpu.CompilerParams(dimension_semantics=("arbitrary",)),
    )(xr, params["w_eff"], params["sidecar"], params["wp"])

    # Drop lane padding, then rearrange 'e (b p) -> b p e' (layout plumbing only).
    out = out[:, :B * Wp]
    return jnp.transpose(out).reshape(B, Wp, E)


def reference_forward(x, raw):
    """Pure-JAX reference of the PyTorch forward (train-mode BN, dropout as identity)."""
    dn = ("NCHW", "OIHW", "NCHW")
    y = jax.lax.conv_general_dilated(x, raw["conv1_w"], (1, 1), "VALID",
                                     dimension_numbers=dn)
    y = y + raw["conv1_b"][None, :, None, None]
    y = jax.lax.conv_general_dilated(y, raw["conv2_w"], (1, 1), "VALID",
                                     dimension_numbers=dn)
    y = y + raw["conv2_b"][None, :, None, None]
    mean = jnp.mean(y, axis=(0, 2, 3), keepdims=True)
    var = jnp.mean((y - mean) ** 2, axis=(0, 2, 3), keepdims=True)
    y = (y - mean) * jax.lax.rsqrt(var + BN_EPS)
    y = y * raw["gamma"][None, :, None, None] + raw["beta"][None, :, None, None]
    y = jnp.where(y > 0, y, jnp.exp(y) - 1.0)
    B, _, H, W = y.shape
    Wp = (W - POOL_K) // POOL_S + 1
    pooled = jnp.stack([jnp.mean(y[..., p * POOL_S:p * POOL_S + POOL_K], axis=-1)
                        for p in range(Wp)], axis=-1)            # (B, NOUT, 1, Wp)
    z = jnp.einsum("bchw,ec->behw", pooled, raw["proj_w"][:, :, 0, 0])
    z = z + raw["proj_b"][None, :, None, None]
    return z.transpose(0, 2, 3, 1).reshape(B, -1, z.shape[1])    # 'b e (h) (w) -> b (h w) e'


def make_params(key, channel, emb_size):
    def uni(k, shape, fan_in):
        b = 1.0 / math.sqrt(fan_in)
        return jax.random.uniform(k, shape, jnp.float32, -b, b)

    ks = jax.random.split(key, 8)
    raw = {
        "conv1_w": uni(ks[0], (NOUT, 1, 1, K1), 1 * K1),
        "conv1_b": uni(ks[1], (NOUT,), 1 * K1),
        "conv2_w": uni(ks[2], (NOUT, NOUT, channel, 1), NOUT * channel),
        "conv2_b": uni(ks[3], (NOUT,), NOUT * channel),
        "gamma": 1.0 + 0.05 * jax.random.normal(ks[4], (NOUT,), jnp.float32),
        "beta": 0.05 * jax.random.normal(ks[5], (NOUT,), jnp.float32),
        "proj_w": uni(ks[6], (emb_size, NOUT, 1, 1), NOUT),
        "proj_b": uni(ks[7], (emb_size,), NOUT),
    }
    # Fold conv1 into conv2 (exact algebra): the two stacked convs are one effective
    # conv with weight w_eff[o, k*CP + c] = sum_i conv2_w[o,i,c] * conv1_w[i,k] and
    # bias b_eff[o] = conv2_b[o] + sum_{i,c} conv2_w[o,i,c] * conv1_b[i].
    # Channels are zero-padded to CP = roundup(C, 8) so the in-kernel im2col pieces
    # are sublane-aligned for any EEG channel count.
    CP = _roundup(channel, 8)
    w1 = raw["conv1_w"][:, 0, 0, :]                  # (NOUT, K1)
    w2 = raw["conv2_w"][:, :, :, 0]                  # (NOUT, NOUT, C)  [o, i, c]
    w_eff = jnp.einsum("oic,ik->okc", w2, w1)        # (NOUT, K1, C)
    w_eff = jnp.pad(w_eff, ((0, 0), (0, 0), (0, CP - channel))).reshape(NOUT, K1 * CP)
    b_eff = raw["conv2_b"] + jnp.einsum("oic,i->o", w2, raw["conv1_b"])

    # Pack the tiny per-channel vectors into ONE sidecar array (fewer input DMAs).
    RS = _roundup(max(NOUT, emb_size), 8)
    side = jnp.zeros((RS, 8), jnp.float32)
    side = side.at[:NOUT, 0].set(b_eff)
    side = side.at[:NOUT, 1].set(raw["gamma"])
    side = side.at[:NOUT, 2].set(raw["beta"])
    side = side.at[:emb_size, 3].set(raw["proj_b"])

    packed = {
        "w_eff": w_eff,                              # (NOUT, K1*CP), col = k*CP + c
        "sidecar": side,                             # (RS, 8)
        "wp": raw["proj_w"][:, :, 0, 0],             # (E, NOUT)
    }
    return raw, packed


if __name__ == "__main__":
    # Small shapes consistent with the module: PatchEmbedding(emb_size=16, channel=10).
    # C deliberately not a multiple of 8 to exercise the channel-padding path.
    B, C, T, E = 2, 10, 129, 16
    key = jax.random.PRNGKey(0)
    k_x, k_p = jax.random.split(key)
    x = jax.random.normal(k_x, (B, 1, C, T), jnp.float32)   # NCHW like PyTorch

    raw, packed = make_params(k_p, C, E)

    out = patch_embedding_forward(x, packed)
    out = jax.block_until_ready(out)

    ref = jax.block_until_ready(reference_forward(x, raw))
    assert out.shape == ref.shape, (out.shape, ref.shape)
    max_err = float(jnp.max(jnp.abs(out - ref)))
    assert max_err < 5e-3, f"max abs error too large: {max_err}"

    print("KERNEL_OK")
</pallas_src>

<mosaic_0001>
module attributes {stable_mosaic.version = 11 : i64} {
  func.func @_patch_embed_kernel(%arg0: i32, %arg1: memref<16x512xf32, #tpu.memory_space<vmem>>, %arg2: memref<40x400xf32, #tpu.memory_space<vmem>>, %arg3: memref<40x8xf32, #tpu.memory_space<vmem>>, %arg4: memref<16x40xf32, #tpu.memory_space<vmem>>, %arg5: memref<16x128xf32, #tpu.memory_space<vmem>>) attributes {dimension_semantics = [#tpu.dimension_semantics<arbitrary>], iteration_bounds = array<i64: 1>, scalar_prefetch = 0 : i64, scratch_operands = 0 : i64, tpu.core_type = #tpu.core_type<tc>, window_params = [{pipeline_mode = #tpu.pipeline_mode<synchronous>, transform_indices = @transform_0, window_bounds = array<i64: 16, 512>}, {pipeline_mode = #tpu.pipeline_mode<synchronous>, transform_indices = @transform_1, window_bounds = array<i64: 40, 400>}, {pipeline_mode = #tpu.pipeline_mode<synchronous>, transform_indices = @transform_2, window_bounds = array<i64: 40, 8>}, {pipeline_mode = #tpu.pipeline_mode<synchronous>, transform_indices = @transform_3, window_bounds = array<i64: 16, 40>}, {pipeline_mode = #tpu.pipeline_mode<synchronous>, transform_indices = @transform_4, window_bounds = array<i64: 16, 128>}]} {
    %c0 = arith.constant 0 : index
    %c0_0 = arith.constant 0 : index
    %0 = vector.load %arg1[%c0, %c0_0] : memref<16x512xf32, #tpu.memory_space<vmem>>, vector<16x512xf32>
    %1 = vector.extract_strided_slice %0 {offsets = [0, 0], sizes = [16, 384], strides = [1, 1]} : vector<16x512xf32> to vector<16x384xf32>
    %2 = vector.extract_strided_slice %0 {offsets = [0, 1], sizes = [16, 384], strides = [1, 1]} : vector<16x512xf32> to vector<16x384xf32>
    %3 = vector.extract_strided_slice %0 {offsets = [0, 2], sizes = [16, 384], strides = [1, 1]} : vector<16x512xf32> to vector<16x384xf32>
    %4 = vector.extract_strided_slice %0 {offsets = [0, 3], sizes = [16, 384], strides = [1, 1]} : vector<16x512xf32> to vector<16x384xf32>
    %5 = vector.extract_strided_slice %0 {offsets = [0, 4], sizes = [16, 384], strides = [1, 1]} : vector<16x512xf32> to vector<16x384xf32>
    %6 = vector.extract_strided_slice %0 {offsets = [0, 5], sizes = [16, 384], strides = [1, 1]} : vector<16x512xf32> to vector<16x384xf32>
    %7 = vector.extract_strided_slice %0 {offsets = [0, 6], sizes = [16, 384], strides = [1, 1]} : vector<16x512xf32> to vector<16x384xf32>
    %8 = vector.extract_strided_slice %0 {offsets = [0, 7], sizes = [16, 384], strides = [1, 1]} : vector<16x512xf32> to vector<16x384xf32>
    %9 = vector.extract_strided_slice %0 {offsets = [0, 8], sizes = [16, 384], strides = [1, 1]} : vector<16x512xf32> to vector<16x384xf32>
    %10 = vector.extract_strided_slice %0 {offsets = [0, 9], sizes = [16, 384], strides = [1, 1]} : vector<16x512xf32> to vector<16x384xf32>
    %11 = vector.extract_strided_slice %0 {offsets = [0, 10], sizes = [16, 384], strides = [1, 1]} : vector<16x512xf32> to vector<16x384xf32>
    %12 = vector.extract_strided_slice %0 {offsets = [0, 11], sizes = [16, 384], strides = [1, 1]} : vector<16x512xf32> to vector<16x384xf32>
    %13 = vector.extract_strided_slice %0 {offsets = [0, 12], sizes = [16, 384], strides = [1, 1]} : vector<16x512xf32> to vector<16x384xf32>
    %14 = vector.extract_strided_slice %0 {offsets = [0, 13], sizes = [16, 384], strides = [1, 1]} : vector<16x512xf32> to vector<16x384xf32>
    %15 = vector.extract_strided_slice %0 {offsets = [0, 14], sizes = [16, 384], strides = [1, 1]} : vector<16x512xf32> to vector<16x384xf32>
    %16 = vector.extract_strided_slice %0 {offsets = [0, 15], sizes = [16, 384], strides = [1, 1]} : vector<16x512xf32> to vector<16x384xf32>
    %17 = vector.extract_strided_slice %0 {offsets = [0, 16], sizes = [16, 384], strides = [1, 1]} : vector<16x512xf32> to vector<16x384xf32>
    %18 = vector.extract_strided_slice %0 {offsets = [0, 17], sizes = [16, 384], strides = [1, 1]} : vector<16x512xf32> to vector<16x384xf32>
    %19 = vector.extract_strided_slice %0 {offsets = [0, 18], sizes = [16, 384], strides = [1, 1]} : vector<16x512xf32> to vector<16x384xf32>
    %20 = vector.extract_strided_slice %0 {offsets = [0, 19], sizes = [16, 384], strides = [1, 1]} : vector<16x512xf32> to vector<16x384xf32>
    %21 = vector.extract_strided_slice %0 {offsets = [0, 20], sizes = [16, 384], strides = [1, 1]} : vector<16x512xf32> to vector<16x384xf32>
    %22 = vector.extract_strided_slice %0 {offsets = [0, 21], sizes = [16, 384], strides = [1, 1]} : vector<16x512xf32> to vector<16x384xf32>
    %23 = vector.extract_strided_slice %0 {offsets = [0, 22], sizes = [16, 384], strides = [1, 1]} : vector<16x512xf32> to vector<16x384xf32>
    %24 = vector.extract_strided_slice %0 {offsets = [0, 23], sizes = [16, 384], strides = [1, 1]} : vector<16x512xf32> to vector<16x384xf32>
    %25 = vector.extract_strided_slice %0 {offsets = [0, 24], sizes = [16, 384], strides = [1, 1]} : vector<16x512xf32> to vector<16x384xf32>
    %26 = tpu.concatenate %1, %2, %3, %4, %5, %6, %7, %8, %9, %10, %11, %12, %13, %14, %15, %16 in 0 : vector<16x384xf32>, vector<16x384xf32>, vector<16x384xf32>, vector<16x384xf32>, vector<16x384xf32>, vector<16x384xf32>, vector<16x384xf32>, vector<16x384xf32>, vector<16x384xf32>, vector<16x384xf32>, vector<16x384xf32>, vector<16x384xf32>, vector<16x384xf32>, vector<16x384xf32>, vector<16x384xf32>, vector<16x384xf32> -> vector<256x384xf32>
    %27 = tpu.concatenate %17, %18, %19, %20, %21, %22, %23, %24, %25 in 0 : vector<16x384xf32>, vector<16x384xf32>, vector<16x384xf32>, vector<16x384xf32>, vector<16x384xf32>, vector<16x384xf32>, vector<16x384xf32>, vector<16x384xf32>, vector<16x384xf32> -> vector<144x384xf32>
    %28 = tpu.concatenate %26, %27 in 0 : vector<256x384xf32>, vector<144x384xf32> -> vector<400x384xf32>
    %c0_1 = arith.constant 0 : index
    %c0_2 = arith.constant 0 : index
    %29 = vector.load %arg3[%c0_1, %c0_2] : memref<40x8xf32, #tpu.memory_space<vmem>>, vector<40x8xf32>
    %30 = vector.extract_strided_slice %29 {offsets = [0, 0], sizes = [40, 1], strides = [1, 1]} : vector<40x8xf32> to vector<40x1xf32>
    %31 = vector.extract_strided_slice %29 {offsets = [0, 1], sizes = [40, 1], strides = [1, 1]} : vector<40x8xf32> to vector<40x1xf32>
    %32 = vector.extract_strided_slice %29 {offsets = [0, 2], sizes = [40, 1], strides = [1, 1]} : vector<40x8xf32> to vector<40x1xf32>
    %33 = vector.extract_strided_slice %29 {offsets = [0, 3], sizes = [16, 1], strides = [1, 1]} : vector<40x8xf32> to vector<16x1xf32>
    %c0_3 = arith.constant 0 : index
    %c0_4 = arith.constant 0 : index
    %34 = vector.load %arg2[%c0_3, %c0_4] : memref<40x400xf32, #tpu.memory_space<vmem>>, vector<40x400xf32>
    %cst = arith.constant dense<0.000000e+00> : vector<40x384xf32>
    %35 = tpu.matmul %34, %28, %cst {dimension_numbers = #tpu.dot_dimension_numbers<[1], [0], [0], [1], [0, 0, 1, 1], [], []>} : vector<40x400xf32>, vector<400x384xf32>, vector<40x384xf32> -> vector<40x384xf32>
    %36 = vector.broadcast %30 : vector<40x1xf32> to vector<40x384xf32>
    %37 = arith.addf %35, %36 : vector<40x384xf32>
    %38 = tpu.iota {dimensions = array<i32: 1>} : vector<40x384xi32>
    %c0_i32 = arith.constant 0 : i32
    %39 = vector.broadcast %c0_i32 : i32 to vector<40x384xi32>
    %40 = arith.cmpi sge, %38, %39 : vector<40x384xi32>
    %c105_i32 = arith.constant 105 : i32
    %41 = vector.broadcast %c105_i32 : i32 to vector<40x384xi32>
    %42 = arith.cmpi slt, %38, %41 : vector<40x384xi32>
    %43 = arith.andi %40, %42 : vector<40x384xi1>
    %c129_i32 = arith.constant 129 : i32
    %44 = vector.broadcast %c129_i32 : i32 to vector<40x384xi32>
    %45 = arith.cmpi sge, %38, %44 : vector<40x384xi32>
    %c234_i32 = arith.constant 234 : i32
    %46 = vector.broadcast %c234_i32 : i32 to vector<40x384xi32>
    %47 = arith.cmpi slt, %38, %46 : vector<40x384xi32>
    %48 = arith.andi %45, %47 : vector<40x384xi1>
    %49 = arith.ori %43, %48 : vector<40x384xi1>
    %cst_5 = arith.constant 0.000000e+00 : f32
    %50 = vector.broadcast %cst_5 : f32 to vector<40x384xf32>
    %51 = arith.select %49, %37, %50 : vector<40x384xi1>, vector<40x384xf32>
    %cst_6 = arith.constant dense<0.000000e+00> : vector<40xf32>
    %52 = vector.multi_reduction <add>, %51, %cst_6 [1] : vector<40x384xf32> to vector<40xf32>
    %53 = vector.shape_cast %52 : vector<40xf32> to vector<40x1xf32>
    %cst_7 = arith.constant 0.00476190494 : f32
    %54 = vector.broadcast %cst_7 : f32 to vector<40x1xf32>
    %55 = arith.mulf %53, %54 : vector<40x1xf32>
    %56 = arith.mulf %51, %51 : vector<40x384xf32>
    %cst_8 = arith.constant dense<0.000000e+00> : vector<40xf32>
    %57 = vector.multi_reduction <add>, %56, %cst_8 [1] : vector<40x384xf32> to vector<40xf32>
    %58 = vector.shape_cast %57 : vector<40xf32> to vector<40x1xf32>
    %cst_9 = arith.constant 0.00476190494 : f32
    %59 = vector.broadcast %cst_9 : f32 to vector<40x1xf32>
    %60 = arith.mulf %58, %59 : vector<40x1xf32>
    %61 = arith.mulf %55, %55 : vector<40x1xf32>
    %62 = arith.subf %60, %61 : vector<40x1xf32>
    %63 = vector.broadcast %55 : vector<40x1xf32> to vector<40x384xf32>
    %64 = arith.subf %37, %63 : vector<40x384xf32>
    %cst_10 = arith.constant 9.99999974E-6 : f32
    %65 = vector.broadcast %cst_10 : f32 to vector<40x1xf32>
    %66 = arith.addf %62, %65 : vector<40x1xf32>
    %67 = math.rsqrt %66 : vector<40x1xf32>
    %68 = vector.broadcast %67 : vector<40x1xf32> to vector<40x384xf32>
    %69 = arith.mulf %64, %68 : vector<40x384xf32>
    %70 = vector.broadcast %31 : vector<40x1xf32> to vector<40x384xf32>
    %71 = arith.mulf %69, %70 : vector<40x384xf32>
    %72 = vector.broadcast %32 : vector<40x1xf32> to vector<40x384xf32>
    %73 = arith.addf %71, %72 : vector<40x384xf32>
    %cst_11 = arith.constant 0.000000e+00 : f32
    %74 = vector.broadcast %cst_11 : f32 to vector<40x384xf32>
    %75 = arith.cmpf ogt, %73, %74 : vector<40x384xf32>
    %cst_12 = arith.constant 0.000000e+00 : f32
    %76 = vector.broadcast %cst_12 : f32 to vector<40x384xf32>
    %77 = arith.minimumf %73, %76 : vector<40x384xf32>
    %78 = math.exp %77 : vector<40x384xf32>
    %cst_13 = arith.constant 1.000000e+00 : f32
    %79 = vector.broadcast %cst_13 : f32 to vector<40x384xf32>
    %80 = arith.subf %78, %79 : vector<40x384xf32>
    %81 = arith.select %75, %73, %80 : vector<40x384xi1>, vector<40x384xf32>
    %82 = tpu.iota {dimensions = array<i32: 0>} : vector<384x128xi32>
    %83 = tpu.iota {dimensions = array<i32: 1>} : vector<384x128xi32>
    %c0_i32_14 = arith.constant 0 : i32
    %84 = vector.broadcast %c0_i32_14 : i32 to vector<384x128xi32>
    %85 = arith.subi %82, %84 : vector<384x128xi32>
    %c0_i32_15 = arith.constant 0 : i32
    %86 = vector.broadcast %c0_i32_15 : i32 to vector<384x128xi32>
    %87 = arith.subi %83, %86 : vector<384x128xi32>
    %c15_i32 = arith.constant 15 : i32
    %88 = vector.broadcast %c15_i32 : i32 to vector<384x128xi32>
    %89 = arith.muli %87, %88 : vector<384x128xi32>
    %90 = arith.subi %85, %89 : vector<384x128xi32>
    %c0_i32_16 = arith.constant 0 : i32
    %91 = vector.broadcast %c0_i32_16 : i32 to vector<384x128xi32>
    %92 = arith.cmpi sge, %83, %91 : vector<384x128xi32>
    %c3_i32 = arith.constant 3 : i32
    %93 = vector.broadcast %c3_i32 : i32 to vector<384x128xi32>
    %94 = arith.cmpi slt, %83, %93 : vector<384x128xi32>
    %95 = arith.andi %92, %94 : vector<384x128xi1>
    %c0_i32_17 = arith.constant 0 : i32
    %96 = vector.broadcast %c0_i32_17 : i32 to vector<384x128xi32>
    %97 = arith.cmpi sge, %90, %96 : vector<384x128xi32>
    %98 = arith.andi %95, %97 : vector<384x128xi1>
    %c75_i32 = arith.constant 75 : i32
    %99 = vector.broadcast %c75_i32 : i32 to vector<384x128xi32>
    %100 = arith.cmpi slt, %90, %99 : vector<384x128xi32>
    %101 = arith.andi %98, %100 : vector<384x128xi1>
    %c129_i32_18 = arith.constant 129 : i32
    %102 = vector.broadcast %c129_i32_18 : i32 to vector<384x128xi32>
    %103 = arith.subi %82, %102 : vector<384x128xi32>
    %c3_i32_19 = arith.constant 3 : i32
    %104 = vector.broadcast %c3_i32_19 : i32 to vector<384x128xi32>
    %105 = arith.subi %83, %104 : vector<384x128xi32>
    %c15_i32_20 = arith.constant 15 : i32
    %106 = vector.broadcast %c15_i32_20 : i32 to vector<384x128xi32>
    %107 = arith.muli %105, %106 : vector<384x128xi32>
    %108 = arith.subi %103, %107 : vector<384x128xi32>
    %c3_i32_21 = arith.constant 3 : i32
    %109 = vector.broadcast %c3_i32_21 : i32 to vector<384x128xi32>
    %110 = arith.cmpi sge, %83, %109 : vector<384x128xi32>
    %c6_i32 = arith.constant 6 : i32
    %111 = vector.broadcast %c6_i32 : i32 to vector<384x128xi32>
    %112 = arith.cmpi slt, %83, %111 : vector<384x128xi32>
    %113 = arith.andi %110, %112 : vector<384x128xi1>
    %c0_i32_22 = arith.constant 0 : i32
    %114 = vector.broadcast %c0_i32_22 : i32 to vector<384x128xi32>
    %115 = arith.cmpi sge, %108, %114 : vector<384x128xi32>
    %116 = arith.andi %113, %115 : vector<384x128xi1>
    %c75_i32_23 = arith.constant 75 : i32
    %117 = vector.broadcast %c75_i32_23 : i32 to vector<384x128xi32>
    %118 = arith.cmpi slt, %108, %117 : vector<384x128xi32>
    %119 = arith.andi %116, %118 : vector<384x128xi1>
    %120 = arith.ori %101, %119 : vector<384x128xi1>
    %cst_24 = arith.constant 0.0133333337 : f32
    %cst_25 = arith.constant 0.000000e+00 : f32
    %121 = vector.broadcast %cst_24 : f32 to vector<384x128xf32>
    %122 = vector.broadcast %cst_25 : f32 to vector<384x128xf32>
    %123 = arith.select %120, %121, %122 : vector<384x128xi1>, vector<384x128xf32>
    %cst_26 = arith.constant dense<0.000000e+00> : vector<40x128xf32>
    %124 = tpu.matmul %81, %123, %cst_26 {dimension_numbers = #tpu.dot_dimension_numbers<[1], [0], [0], [1], [0, 0, 1, 1], [], []>} : vector<40x384xf32>, vector<384x128xf32>, vector<40x128xf32> -> vector<40x128xf32>
    %c0_27 = arith.constant 0 : index
    %c0_28 = arith.constant 0 : index
    %125 = vector.load %arg4[%c0_27, %c0_28] : memref<16x40xf32, #tpu.memory_space<vmem>>, vector<16x40xf32>
    %cst_29 = arith.constant dense<0.000000e+00> : vector<16x128xf32>
    %126 = tpu.matmul %125, %124, %cst_29 {dimension_numbers = #tpu.dot_dimension_numbers<[1], [0], [0], [1], [0, 0, 1, 1], [], []>} : vector<16x40xf32>, vector<40x128xf32>, vector<16x128xf32> -> vector<16x128xf32>
    %127 = vector.broadcast %33 : vector<16x1xf32> to vector<16x128xf32>
    %128 = arith.addf %126, %127 : vector<16x128xf32>
    %c0_30 = arith.constant 0 : index
    %c0_31 = arith.constant 0 : index
    %129 = vector.load %arg5[%c0_30, %c0_31] : memref<16x128xf32, #tpu.memory_space<vmem>>, vector<16x128xf32>
    tpu.vector_store %arg5[%c0_30, %c0_31], %128 {strides = array<i32>} : memref<16x128xf32, #tpu.memory_space<vmem>>, vector<16x128xf32>,
    return
  }
  func.func @transform_0(%arg0: i32) -> (i32, i32) {
    %c0_i32 = arith.constant 0 : i32
    %c0_i32_0 = arith.constant 0 : i32
    %c0_i32_1 = arith.constant 0 : i32
    return %c0_i32, %c0_i32_0 : i32, i32
  }
  func.func @transform_1(%arg0: i32) -> (i32, i32) {
    %c0_i32 = arith.constant 0 : i32
    %c0_i32_0 = arith.constant 0 : i32
    %c0_i32_1 = arith.constant 0 : i32
    return %c0_i32, %c0_i32_0 : i32, i32
  }
  func.func @transform_2(%arg0: i32) -> (i32, i32) {
    %c0_i32 = arith.constant 0 : i32
    %c0_i32_0 = arith.constant 0 : i32
    %c0_i32_1 = arith.constant 0 : i32
    return %c0_i32, %c0_i32_0 : i32, i32
  }
  func.func @transform_3(%arg0: i32) -> (i32, i32) {
    %c0_i32 = arith.constant 0 : i32
    %c0_i32_0 = arith.constant 0 : i32
    %c0_i32_1 = arith.constant 0 : i32
    return %c0_i32, %c0_i32_0 : i32, i32
  }
  func.func @transform_4(%arg0: i32) -> (i32, i32) {
    %c0_i32 = arith.constant 0 : i32
    %c0_i32_0 = arith.constant 0 : i32
    %c0_i32_1 = arith.constant 0 : i32
    return %c0_i32, %c0_i32_0 : i32, i32
  }
}

</mosaic_0001>

<bundles_post_ra>
// kernel: tpu_custom_call.1
= control target key start
LH: loop header
LB: loop body
LE: loop exit
PB: predicated region body
PF: predicated region fallthrough
CT: control target
= control target key end

     0   :  { %9 = vsyncpa [#allocation3], 0  ;;  %s5743_s0 = inlined_call_operand.hbm [shape: f32[16,512], index: 0, kind: input, shape index: {}]   ;;  %s5744_s1 = inlined_call_operand.hbm [shape: f32[40,400], index: 1, kind: input, shape index: {}]   ;;  %s5745_s2 = inlined_call_operand.vmem [shape: f32[40,8], index: 2, kind: input, shape index: {}]   ;;  %s5746_s3 = inlined_call_operand.vmem [shape: f32[16,40], index: 3, kind: input, shape index: {}]   ;;  %s5747_s4 = inlined_call_operand.hbm [shape: f32[16,128], index: 4, kind: output, shape index: {}]  }
   0x1   :  { %10 = vsyncpa [#allocation6], 0 }
   0x2   :  { %11 = vsyncpa [#allocation4], 0  ;;  %s3613_s15 = smov [#allocation2]   ;;  %s3541_s19 = scalar_lea.hbm %s5743_s0, 1024 }
   0x3   :  { %s17_s16 = sshll.u32 %s3613_s15, 4  ;;  %p3542_p0 = scmp.ne.s32.totalorder %s5743_s0, %s3541_s19  ;;  %s18_s16 = int_to_ptr.vmem [resolvable:$true] %s17_s16 }
   0x4   :  { %p3545_p1 = scmp.lt.u32.totalorder %s3541_s19, %s5743_s0 }
   0x6   :  { %p3547_p2 = pnand %p3545_p1, %p3542_p0 }
   0x8   :  { %3550 = shalt.err (!%p3547_p2)
}
   0x9   :  { %s3551_s24 = scalar_lea.vmem %s18_s16, 1024  ;;  %p3556_p4 = scmp.lt.s32.totalorder %s18_s16, %s18_s16 }
   0xa   :  { %p3552_p3 = scmp.ne.s32.totalorder %s18_s16, %s3551_s24  ;;  %p3557_p5 = scmp.lt.s32.totalorder %s3551_s24, %s3551_s24 }
   0xc   :  { %p3558_p6 = por %p3557_p5, %p3556_p4 }
   0xe   :  { %p3559_p7 = pnand %p3558_p6, %p3552_p3 }
  0x10   :  { %3562 = shalt.err (!%p3559_p7)
}
  0x11   :  { %s3614_s25 = smov 512   ;;  %s3615_s26 = smov 32  }
  0x12   :  { %23 = dma.hbm_to_vmem [thread:$0]  %s5743_s0, 1024, %s18_s16, [#allocation3], %s3614_s25, %s3614_s25, %s3615_s26  }
  0x13   :  { %s3616_s29 = smov [#allocation5]   ;;  %s3563_s7 = scalar_lea.hbm %s5744_s1, 2560 }
  0x14   :  { %s29_s30 = sshll.u32 %s3616_s29, 4  ;;  %p3564_p8 = scmp.ne.s32.totalorder %s5744_s1, %s3563_s7  ;;  %s30_s30 = int_to_ptr.vmem [resolvable:$true] %s29_s30 }
  0x15   :  { %p3567_p9 = scmp.lt.u32.totalorder %s3563_s7, %s5744_s1 }
  0x17   :  { %p3569_p10 = pnand %p3567_p9, %p3564_p8 }
  0x19   :  { %3572 = shalt.err (!%p3569_p10)
}
  0x1a   :  { %s3573_s12 = scalar_lea.vmem %s30_s30, 2560  ;;  %p3578_p12 = scmp.lt.s32.totalorder %s30_s30, %s30_s30 }
  0x1b   :  { %p3574_p11 = scmp.ne.s32.totalorder %s30_s30, %s3573_s12  ;;  %p3579_p13 = scmp.lt.s32.totalorder %s3573_s12, %s3573_s12 }
  0x1d   :  { %p3580_p0 = por %p3579_p13, %p3578_p12 }
  0x1f   :  { %p3581_p1 = pnand %p3580_p0, %p3574_p11 }
  0x21   :  { %3584 = shalt.err (!%p3581_p1)
}
  0x22   :  { %35 = dma.hbm_to_vmem [thread:$0]  %s5744_s1, 2560, %s30_s30, [#allocation6], %s3614_s25, %s3614_s25, %s3615_s26  }
  0x23   :  { %3607 = dma.done.wait [#allocation3], 1024  }
  0x24   :  { %3608 = vsyncadd [#allocation3], 4294966272 }
  0x25   :  { %3609 = dma.done.wait [#allocation6], 2560  }
  0x26   :  { %3610 = vsyncadd [#allocation6], 4294964736  ;;  %v47_v0 = vld [vmem:[#allocation2 + $0x8] sm:$0xff]  ;;  %v3692_v1 = vld [vmem:[#allocation2 + $0x10] sm:$0xff]  ;;  %s3617_s14 = smov 127   ;;  %s3618_s1 = smov 126  }
  0x27   :  { %v46_v2 = vld [vmem:[#allocation2] sm:$0xff]  ;;  %v3695_v3 = vpack.i.bf16 %v3692_v1, %v47_v0  ;;  %v51_v5 = vld [vmem:[#allocation2 + $0x28] sm:$0xff]  ;;  %v3697_v6 = vld [vmem:[#allocation2 + $0x30] sm:$0xff]  ;;  %s3619_s15 = smov 125   ;;  %s3620_s16 = smov 124   ;;  %vm78_vm0 = vcmask 1039360  }
  0x28   :  { %v50_v4 = vld [vmem:[#allocation2 + $0x20] sm:$0xff]  ;;  %v3703_v8 = vpack.i.bf16 %v3697_v6, %v51_v5  ;;  %v49_v9 = vld [vmem:[#allocation2 + $0x18] sm:$0xff]  ;;  %v2732_v12 = vpack.c.bf16 %v51_v5, %v47_v0  ;;  %s3621_s17 = smov 123   ;;  %s3622_s18 = smov 122   ;;  %v756_v19 = vld [vmem:[#allocation5 + $0x8] sm:$0xff]  ;;  %vm107_vm1 = vcmask 1031168  }
  0x29   :  { %v3699_v7 = vpack.i.bf16 %v50_v4, %v46_v2  ;;  %3006 = vrot.lane.b32.xlu0 %v3695_v3, %s3617_s14  ;;  %v53_v10 = vld [vmem:[#allocation2 + $0x38] sm:$0xff]  ;;  %v2734_v13 = vpack.c.bf16 %v50_v4, %v46_v2  ;;  %s3623_s19 = smov 121   ;;  %s3624_s20 = smov 120   ;;  %880 = vmatprep.mubr.f32.mxu0 %v756_v19  ;;  %vm136_vm2 = vcmask 1022976   ;;  %vm165_vm3 = vcmask 1014784  }
  0x2a   :  { %v3708_v11 = vpack.i.bf16 %v53_v10, %v49_v9  ;;  %2733 = vmatprep.subr.bf16.mxu0 %v2732_v12  ;;  %s3625_s21 = smov 119   ;;  %s3626_s22 = smov 118   ;;  %1070 = vmatprep.mubr.f32.mxu1 %v756_v19  ;;  %vm194_vm4 = vcmask 1006592   ;;  %vm223_vm5 = vcmask 998400   ;;  %vm252_vm6 = vcmask 990208  }
  0x2b   :  { %3016 = vrot.lane.b32.xlu1 %v3699_v7, %s3617_s14  ;;  %2735 = vmatpush1.bf16.msra.mxu0 %v2734_v13  ;;  %s3627_s23 = smov 117   ;;  %s3628_s24 = smov 116   ;;  %vm281_vm7 = vcmask 982016   ;;  %vm310_vm8 = vcmask 973824   ;;  %vm339_vm9 = vcmask 965632   ;;  %vm368_vm10 = vcmask 957440  }
  0x2c   :  { %s3629_s25 = smov 115   ;;  %s3630_s26 = smov 114   ;;  %vm397_vm11 = vcmask 949248   ;;  %vm426_vm12 = vcmask 941056   ;;  %vm455_vm13 = vcmask 932864   ;;  %vm484_vm14 = vcmask 924672  }
  0x2d   :  { %3011 = vrot.lane.b32.xlu0 %v3703_v8, %s3617_s14  ;;  %s3631_s27 = smov 113   ;;  %s3632_s28 = smov 112   ;;  %vm641_vm15 = vcmask 916480  }
  0x2f   :  { %3021 = vrot.lane.b32.xlu1 %v3695_v3, %s3618_s1 }
  0x31   :  { %3026 = vrot.lane.b32.xlu0 %v3703_v8, %s3618_s1 }
  0x33   :  { %3031 = vrot.lane.b32.xlu1 %v3708_v11, %s3617_s14 }
  0x35   :  { %3036 = vrot.lane.b32.xlu0 %v3699_v7, %s3618_s1 }
  0x37   :  { %3041 = vrot.lane.b32.xlu1 %v3695_v3, %s3619_s15 }
  0x39   :  { %3046 = vrot.lane.b32.xlu0 %v3703_v8, %s3619_s15 }
  0x3b   :  { %3051 = vrot.lane.b32.xlu1 %v3708_v11, %s3618_s1 }
  0x3d   :  { %3056 = vrot.lane.b32.xlu0 %v3699_v7, %s3619_s15 }
  0x3f   :  { %3061 = vrot.lane.b32.xlu1 %v3695_v3, %s3620_s16 }
  0x41   :  { %3066 = vrot.lane.b32.xlu0 %v3703_v8, %s3620_s16 }
  0x43   :  { %3071 = vrot.lane.b32.xlu1 %v3708_v11, %s3619_s15 }
  0x45   :  { %3076 = vrot.lane.b32.xlu0 %v3699_v7, %s3620_s16 }
  0x47   :  { %3081 = vrot.lane.b32.xlu1 %v3695_v3, %s3621_s17 }
  0x49   :  { %3086 = vrot.lane.b32.xlu0 %v3703_v8, %s3621_s17 }
  0x4b   :  { %3091 = vrot.lane.b32.xlu1 %v3708_v11, %s3620_s16 }
  0x4d   :  { %3096 = vrot.lane.b32.xlu0 %v3699_v7, %s3621_s17 }
  0x4f   :  { %3101 = vrot.lane.b32.xlu1 %v3695_v3, %s3622_s18 }
  0x51   :  { %3106 = vrot.lane.b32.xlu0 %v3703_v8, %s3622_s18 }
  0x53   :  { %3111 = vrot.lane.b32.xlu1 %v3708_v11, %s3621_s17 }
  0x55   :  { %3116 = vrot.lane.b32.xlu0 %v3699_v7, %s3622_s18 }
  0x57   :  { %3121 = vrot.lane.b32.xlu1 %v3695_v3, %s3623_s19 }
  0x59   :  { %3126 = vrot.lane.b32.xlu0 %v3703_v8, %s3623_s19 }
  0x5b   :  { %3131 = vrot.lane.b32.xlu1 %v3708_v11, %s3622_s18 }
  0x5d   :  { %3136 = vrot.lane.b32.xlu0 %v3699_v7, %s3623_s19 }
  0x5f   :  { %3141 = vrot.lane.b32.xlu1 %v3695_v3, %s3624_s20 }
  0x61   :  { %3146 = vrot.lane.b32.xlu0 %v3703_v8, %s3624_s20 }
  0x63   :  { %3151 = vrot.lane.b32.xlu1 %v3708_v11, %s3623_s19 }
  0x65   :  { %3156 = vrot.lane.b32.xlu0 %v3699_v7, %s3624_s20 }
  0x67   :  { %3161 = vrot.lane.b32.xlu1 %v3695_v3, %s3625_s21 }
  0x69   :  { %3166 = vrot.lane.b32.xlu0 %v3703_v8, %s3625_s21 }
  0x6b   :  { %3171 = vrot.lane.b32.xlu1 %v3708_v11, %s3624_s20  ;;  %s3640_s20 = smov [#allocation7]  }
  0x6d   :  { %3176 = vrot.lane.b32.xlu0 %v3699_v7, %s3625_s21 }
  0x6f   :  { %3181 = vrot.lane.b32.xlu1 %v3695_v3, %s3626_s22 }
  0x71   :  { %3186 = vrot.lane.b32.xlu0 %v3703_v8, %s3626_s22 }
  0x73   :  { %3191 = vrot.lane.b32.xlu1 %v3699_v7, %s3626_s22 }
  0x75   :  { %3196 = vrot.lane.b32.xlu0 %v3695_v3, %s3627_s23 }
  0x77   :  { %3201 = vrot.lane.b32.xlu1 %v3703_v8, %s3627_s23 }
  0x79   :  { %3206 = vrot.lane.b32.xlu0 %v3699_v7, %s3627_s23 }
  0x7b   :  { %3211 = vrot.lane.b32.xlu1 %v3695_v3, %s3628_s24 }
  0x7d   :  { %3216 = vrot.lane.b32.xlu0 %v3703_v8, %s3628_s24 }
  0x7f   :  { %3221 = vrot.lane.b32.xlu1 %v3699_v7, %s3628_s24 }
  0x81   :  { %3226 = vrot.lane.b32.xlu0 %v3695_v3, %s3629_s25 }
  0x83   :  { %3231 = vrot.lane.b32.xlu1 %v3703_v8, %s3629_s25 }
  0x85   :  { %3236 = vrot.lane.b32.xlu0 %v3699_v7, %s3629_s25 }
  0x87   :  { %3241 = vrot.lane.b32.xlu1 %v3695_v3, %s3630_s26 }
  0x89   :  { %3246 = vrot.lane.b32.xlu0 %v3703_v8, %s3630_s26 }
  0x8b   :  { %3251 = vrot.lane.b32.xlu1 %v3699_v7, %s3630_s26 }
  0x8d   :  { %3256 = vrot.lane.b32.xlu0 %v3695_v3, %s3631_s27 }
  0x8f   :  { %3261 = vrot.lane.b32.xlu1 %v3703_v8, %s3631_s27 }
  0x91   :  { %3266 = vrot.lane.b32.xlu0 %v3699_v7, %s3631_s27 }
  0x93   :  { %3271 = vrot.lane.b32.xlu1 %v3695_v3, %s3632_s28 }
  0x95   :  { %3276 = vrot.lane.b32.xlu0 %v3703_v8, %s3632_s28 }
  0x97   :  { %3281 = vrot.lane.b32.xlu1 %v3699_v7, %s3632_s28 }
  0x9b   :  { %v3007_v14 = vpop.permute.xlu0 %3006 }
  0x9c   :  { %v3009_v15 = vunpack.i.h.bf16 %v3007_v14  ;;  %v3008_v17 = vunpack.i.l.bf16 %v3007_v14 }
  0x9d   :  { %v3017_v16 = vpop.permute.xlu1 %3016 }
  0x9e   :  { %v3018_v18 = vunpack.i.l.bf16 %v3017_v16  ;;  %v3019_v21 = vunpack.i.h.bf16 %v3017_v16  ;;  %v80_v25 = vsel %vm78_vm0, %v3008_v17, %v3009_v15 }
  0x9f   :  { %v3012_v20 = vpop.permute.xlu0 %3011 }
  0xa0   :  { %v3014_v22 = vunpack.i.h.bf16 %v3012_v20  ;;  %v3013_v23 = vunpack.i.l.bf16 %v3012_v20  ;;  %v79_v26 = vsel %vm78_vm0, %v3018_v18, %v3008_v17 }
  0xa1   :  { %v3022_v24 = vpop.permute.xlu1 %3021 }
  0xa2   :  { %v3024_v27 = vunpack.i.h.bf16 %v3022_v24  ;;  %v3023_v28 = vunpack.i.l.bf16 %v3022_v24  ;;  %v83_v29 = vsel %vm78_vm0, %v3013_v23, %v3014_v22  ;;  %v82_v30 = vsel %vm78_vm0, %v3019_v21, %v3013_v23 }
  0xa3   :  { %v3027_v31 = vpop.permute.xlu0 %3026  ;;  %v2736_v32 = vpack.c.bf16 %v83_v29, %v80_v25  ;;  %v2738_v33 = vpack.c.bf16 %v82_v30, %v79_v26  ;;  %v3295_v60 = vpack.i.bf16 %v82_v30, %v79_v26 }
  0xa4   :  { %v3029_v34 = vunpack.i.h.bf16 %v3027_v31  ;;  %v3028_v35 = vunpack.i.l.bf16 %v3027_v31  ;;  %v109_v39 = vsel %vm107_vm1, %v3023_v28, %v3024_v27 }
  0xa5   :  { %v3790_v36 = vpop.permute.xlu1 %3031  ;;  %2737 = vmatprep.subr.bf16.mxu0 %v2736_v32 }
  0xa6   :  { %v3034_v37 = vunpack.i.h.bf16 %v3790_v36  ;;  %v3033_v38 = vunpack.i.l.bf16 %v3790_v36  ;;  %2739 = vmatpush1.bf16.msra.mxu0 %v2738_v33  ;;  %v112_v40 = vsel %vm107_vm1, %v3028_v35, %v3029_v34 }
  0xa7   :  { %v3037_v41 = vpop.permute.xlu0 %3036  ;;  %v2740_v44 = vpack.c.bf16 %v112_v40, %v109_v39 }
  0xa8   :  { %v3797_v42 = vsel %vm78_vm0, %v3014_v22, %v3034_v37  ;;  %v3800_v43 = vsel %vm78_vm0, %v3009_v15, %v3033_v38  ;;  %v3039_v45 = vunpack.i.h.bf16 %v3037_v41  ;;  %v3038_v46 = vunpack.i.l.bf16 %v3037_v41 }
  0xa9   :  { %v3042_v47 = vpop.permute.xlu1 %3041  ;;  %v3290_v48 = vpack.i.bf16 %v3797_v42, %v83_v29  ;;  %v3285_v49 = vpack.i.bf16 %v3800_v43, %v80_v25  ;;  %2741 = vmatprep.subr.bf16.mxu0 %v2740_v44  ;;  %vm800_vm0 = vcmask 130048  }
  0xaa   :  { %v3044_v51 = vunpack.i.h.bf16 %v3042_v47  ;;  %v3043_v52 = vunpack.i.l.bf16 %v3042_v47  ;;  %v108_v53 = vsel %vm107_vm1, %v3038_v46, %v3023_v28  ;;  %v111_v54 = vsel %vm107_vm1, %v3039_v45, %v3028_v35 }
  0xab   :  { %3291 = vrot.lane.b32.xlu1 %v3290_v48, %s3632_s28  ;;  %3286 = vrot.lane.b32.xlu0 %v3285_v49, %s3632_s28  ;;  %v3047_v55 = vpop.permute.xlu0 %3046  ;;  %v2742_v56 = vpack.c.bf16 %v111_v54, %v108_v53  ;;  %v3310_v23 = vpack.i.bf16 %v111_v54, %v108_v53 }
  0xac   :  { %v3049_v57 = vunpack.i.h.bf16 %v3047_v55  ;;  %v3048_v58 = vunpack.i.l.bf16 %v3047_v55  ;;  %v138_v63 = vsel %vm136_vm2, %v3043_v52, %v3044_v51 }
  0xad   :  { %v3810_v59 = vpop.permute.xlu1 %3051  ;;  %2743 = vmatpush1.bf16.msra.mxu0 %v2742_v56 }
  0xae   :  { %v3054_v61 = vunpack.i.h.bf16 %v3810_v59  ;;  %v3053_v62 = vunpack.i.l.bf16 %v3810_v59  ;;  %v141_v0 = vsel %vm136_vm2, %v3048_v58, %v3049_v57 }
  0xaf   :  { %3296 = vrot.lane.b32.xlu0 %v3295_v60, %s3632_s28  ;;  %v3057_v2 = vpop.permute.xlu0 %3056  ;;  %v2744_v5 = vpack.c.bf16 %v141_v0, %v138_v63 }
  0xb0   :  { %v3818_v3 = vsel %vm107_vm1, %v3024_v27, %v3053_v62  ;;  %v3821_v4 = vsel %vm107_vm1, %v3029_v34, %v3054_v61  ;;  %v3059_v7 = vunpack.i.h.bf16 %v3057_v2  ;;  %v3058_v8 = vunpack.i.l.bf16 %v3057_v2 }
  0xb1   :  { %v3062_v9 = vpop.permute.xlu1 %3061  ;;  %v3300_v10 = vpack.i.bf16 %v3818_v3, %v109_v39  ;;  %v3305_v12 = vpack.i.bf16 %v3821_v4, %v112_v40  ;;  %2745 = vmatprep.subr.bf16.mxu0 %v2744_v5 }
  0xb2   :  { %v3064_v14 = vunpack.i.h.bf16 %v3062_v9  ;;  %v3063_v15 = vunpack.i.l.bf16 %v3062_v9  ;;  %v137_v16 = vsel %vm136_vm2, %v3058_v8, %v3043_v52  ;;  %v140_v17 = vsel %vm136_vm2, %v3059_v7, %v3048_v58 }
  0xb3   :  { %3301 = vrot.lane.b32.xlu1 %v3300_v10, %s3632_s28  ;;  %3306 = vrot.lane.b32.xlu0 %v3305_v12, %s3632_s28  ;;  %v3067_v18 = vpop.permute.xlu0 %3066  ;;  %v2746_v19 = vpack.c.bf16 %v140_v17, %v137_v16 }
  0xb4   :  { %v3069_v20 = vunpack.i.h.bf16 %v3067_v18  ;;  %v3068_v21 = vunpack.i.l.bf16 %v3067_v18  ;;  %v167_v26 = vsel %vm165_vm3, %v3063_v15, %v3064_v14 }
  0xb5   :  { %v3831_v22 = vpop.permute.xlu1 %3071  ;;  %2747 = vmatpush1.bf16.msra.mxu0 %v2746_v19 }
  0xb6   :  { %v3074_v24 = vunpack.i.h.bf16 %v3831_v22  ;;  %v3073_v25 = vunpack.i.l.bf16 %v3831_v22  ;;  %v170_v27 = vsel %vm165_vm3, %v3068_v21, %v3069_v20 }
  0xb7   :  { %3311 = vrot.lane.b32.xlu1 %v3310_v23, %s3632_s28  ;;  %v3077_v28 = vpop.permute.xlu0 %3076  ;;  %v2748_v31 = vpack.c.bf16 %v170_v27, %v167_v26 }
  0xb8   :  { %v3839_v29 = vsel %vm136_vm2, %v3049_v57, %v3074_v24  ;;  %v3842_v30 = vsel %vm136_vm2, %v3044_v51, %v3073_v25  ;;  %v3079_v32 = vunpack.i.h.bf16 %v3077_v28  ;;  %v3078_v33 = vunpack.i.l.bf16 %v3077_v28 }
  0xb9   :  { %v3082_v34 = vpop.permute.xlu1 %3081  ;;  %v3320_v35 = vpack.i.bf16 %v3839_v29, %v141_v0  ;;  %v3315_v37 = vpack.i.bf16 %v3842_v30, %v138_v63  ;;  %2749 = vmatprep.subr.bf16.mxu0 %v2748_v31  ;;  %v3325_v51 = vpack.i.bf16 %v140_v17, %v137_v16 }
  0xba   :  { %v3084_v39 = vunpack.i.h.bf16 %v3082_v34  ;;  %v3083_v40 = vunpack.i.l.bf16 %v3082_v34  ;;  %v166_v41 = vsel %vm165_vm3, %v3078_v33, %v3063_v15  ;;  %v169_v44 = vsel %vm165_vm3, %v3079_v32, %v3068_v21 }
  0xbb   :  { %3321 = vrot.lane.b32.xlu1 %v3320_v35, %s3632_s28  ;;  %3316 = vrot.lane.b32.xlu0 %v3315_v37, %s3632_s28  ;;  %v3087_v45 = vpop.permute.xlu0 %3086  ;;  %v2750_v46 = vpack.c.bf16 %v169_v44, %v166_v41  ;;  %v3340_v18 = vpack.i.bf16 %v169_v44, %v166_v41 }
  0xbc   :  { %v3089_v47 = vunpack.i.h.bf16 %v3087_v45  ;;  %v3088_v48 = vunpack.i.l.bf16 %v3087_v45  ;;  %v196_v54 = vsel %vm194_vm4, %v3083_v40, %v3084_v39 }
  0xbd   :  { %v3852_v49 = vpop.permute.xlu1 %3091  ;;  %2751 = vmatpush1.bf16.msra.mxu0 %v2750_v46 }
  0xbe   :  { %v3094_v52 = vunpack.i.h.bf16 %v3852_v49  ;;  %v3093_v53 = vunpack.i.l.bf16 %v3852_v49  ;;  %v199_v55 = vsel %vm194_vm4, %v3088_v48, %v3089_v47 }
  0xbf   :  { %3326 = vrot.lane.b32.xlu0 %v3325_v51, %s3632_s28  ;;  %v3097_v56 = vpop.permute.xlu0 %3096  ;;  %v2752_v60 = vpack.c.bf16 %v199_v55, %v196_v54 }
  0xc0   :  { %v3860_v57 = vsel %vm165_vm3, %v3064_v14, %v3093_v53  ;;  %v3863_v58 = vsel %vm165_vm3, %v3069_v20, %v3094_v52  ;;  %v3099_v61 = vunpack.i.h.bf16 %v3097_v56  ;;  %v3098_v62 = vunpack.i.l.bf16 %v3097_v56 }
  0xc1   :  { %v3102_v63 = vpop.permute.xlu1 %3101  ;;  %v3330_v0 = vpack.i.bf16 %v3860_v57, %v167_v26  ;;  %v3335_v2 = vpack.i.bf16 %v3863_v58, %v170_v27  ;;  %2753 = vmatprep.subr.bf16.mxu0 %v2752_v60 }
  0xc2   :  { %v3104_v7 = vunpack.i.h.bf16 %v3102_v63  ;;  %v3103_v8 = vunpack.i.l.bf16 %v3102_v63  ;;  %v195_v9 = vsel %vm194_vm4, %v3098_v62, %v3083_v40  ;;  %v198_v10 = vsel %vm194_vm4, %v3099_v61, %v3088_v48 }
  0xc3   :  { %3331 = vrot.lane.b32.xlu1 %v3330_v0, %s3632_s28  ;;  %3336 = vrot.lane.b32.xlu0 %v3335_v2, %s3632_s28  ;;  %v3107_v12 = vpop.permute.xlu0 %3106  ;;  %v2754_v14 = vpack.c.bf16 %v198_v10, %v195_v9  ;;  %v3355_v51 = vpack.i.bf16 %v198_v10, %v195_v9 }
  0xc4   :  { %v3109_v15 = vunpack.i.h.bf16 %v3107_v12  ;;  %v3108_v16 = vunpack.i.l.bf16 %v3107_v12  ;;  %v225_v21 = vsel %vm223_vm5, %v3103_v8, %v3104_v7 }
  0xc5   :  { %v3873_v17 = vpop.permute.xlu1 %3111  ;;  %2755 = vmatpush1.bf16.msra.mxu0 %v2754_v14 }
  0xc6   :  { %v3114_v19 = vunpack.i.h.bf16 %v3873_v17  ;;  %v3113_v20 = vunpack.i.l.bf16 %v3873_v17  ;;  %v228_v23 = vsel %vm223_vm5, %v3108_v16, %v3109_v15 }
  0xc7   :  { %3341 = vrot.lane.b32.xlu1 %v3340_v18, %s3632_s28  ;;  %v3117_v24 = vpop.permute.xlu0 %3116  ;;  %v2756_v27 = vpack.c.bf16 %v228_v23, %v225_v21 }
  0xc8   :  { %v3881_v25 = vsel %vm194_vm4, %v3089_v47, %v3114_v19  ;;  %v3884_v26 = vsel %vm194_vm4, %v3084_v39, %v3113_v20  ;;  %v3119_v28 = vunpack.i.h.bf16 %v3117_v24  ;;  %v3118_v31 = vunpack.i.l.bf16 %v3117_v24 }
  0xc9   :  { %v3122_v32 = vpop.permute.xlu1 %3121  ;;  %v3350_v33 = vpack.i.bf16 %v3881_v25, %v199_v55  ;;  %v3345_v34 = vpack.i.bf16 %v3884_v26, %v196_v54  ;;  %2757 = vmatprep.subr.bf16.mxu0 %v2756_v27 }
  0xca   :  { %v3124_v37 = vunpack.i.h.bf16 %v3122_v32  ;;  %v3123_v40 = vunpack.i.l.bf16 %v3122_v32  ;;  %v224_v39 = vsel %vm223_vm5, %v3118_v31, %v3103_v8  ;;  %v227_v41 = vsel %vm223_vm5, %v3119_v28, %v3108_v16 }
  0xcb   :  { %3351 = vrot.lane.b32.xlu1 %v3350_v33, %s3632_s28  ;;  %3346 = vrot.lane.b32.xlu0 %v3345_v34, %s3632_s28  ;;  %v3127_v44 = vpop.permute.xlu0 %3126  ;;  %v2758_v45 = vpack.c.bf16 %v227_v41, %v224_v39 }
  0xcc   :  { %v3129_v46 = vunpack.i.h.bf16 %v3127_v44  ;;  %v3128_v47 = vunpack.i.l.bf16 %v3127_v44  ;;  %v254_v54 = vsel %vm252_vm6, %v3123_v40, %v3124_v37 }
  0xcd   :  { %v3894_v48 = vpop.permute.xlu1 %3131  ;;  %2759 = vmatpush1.bf16.msra.mxu0 %v2758_v45 }
  0xce   :  { %v3134_v52 = vunpack.i.h.bf16 %v3894_v48  ;;  %v3133_v53 = vunpack.i.l.bf16 %v3894_v48  ;;  %v257_v55 = vsel %vm252_vm6, %v3128_v47, %v3129_v46 }
  0xcf   :  { %3356 = vrot.lane.b32.xlu0 %v3355_v51, %s3632_s28  ;;  %v3137_v56 = vpop.permute.xlu0 %3136  ;;  %v2760_v62 = vpack.c.bf16 %v257_v55, %v254_v54 }
  0xd0   :  { %v3902_v60 = vsel %vm223_vm5, %v3104_v7, %v3133_v53  ;;  %v3905_v61 = vsel %vm223_vm5, %v3109_v15, %v3134_v52  ;;  %v3139_v63 = vunpack.i.h.bf16 %v3137_v56  ;;  %v3138_v0 = vunpack.i.l.bf16 %v3137_v56 }
  0xd1   :  { %v3142_v2 = vpop.permute.xlu1 %3141  ;;  %v3360_v8 = vpack.i.bf16 %v3902_v60, %v225_v21  ;;  %v3365_v9 = vpack.i.bf16 %v3905_v61, %v228_v23  ;;  %2761 = vmatprep.subr.bf16.mxu0 %v2760_v62  ;;  %v3370_v23 = vpack.i.bf16 %v227_v41, %v224_v39 }
  0xd2   :  { %v3144_v12 = vunpack.i.h.bf16 %v3142_v2  ;;  %v3143_v14 = vunpack.i.l.bf16 %v3142_v2  ;;  %v253_v7 = vsel %vm252_vm6, %v3138_v0, %v3123_v40  ;;  %v256_v15 = vsel %vm252_vm6, %v3139_v63, %v3128_v47 }
  0xd3   :  { %3361 = vrot.lane.b32.xlu1 %v3360_v8, %s3632_s28  ;;  %3366 = vrot.lane.b32.xlu0 %v3365_v9, %s3632_s28  ;;  %v3147_v16 = vpop.permute.xlu0 %3146  ;;  %v2762_v18 = vpack.c.bf16 %v256_v15, %v253_v7  ;;  %v3385_v0 = vpack.i.bf16 %v256_v15, %v253_v7 }
  0xd4   :  { %v3149_v19 = vunpack.i.h.bf16 %v3147_v16  ;;  %v3148_v20 = vunpack.i.l.bf16 %v3147_v16  ;;  %v283_v28 = vsel %vm281_vm7, %v3143_v14, %v3144_v12 }
  0xd5   :  { %v3915_v21 = vpop.permute.xlu1 %3151  ;;  %2763 = vmatpush1.bf16.msra.mxu0 %v2762_v18 }
  0xd6   :  { %v3154_v24 = vunpack.i.h.bf16 %v3915_v21  ;;  %v3153_v27 = vunpack.i.l.bf16 %v3915_v21  ;;  %v286_v31 = vsel %vm281_vm7, %v3148_v20, %v3149_v19 }
  0xd7   :  { %3371 = vrot.lane.b32.xlu1 %v3370_v23, %s3632_s28  ;;  %v3157_v32 = vpop.permute.xlu0 %3156  ;;  %v2764_v40 = vpack.c.bf16 %v286_v31, %v283_v28 }
  0xd8   :  { %v3923_v33 = vsel %vm252_vm6, %v3129_v46, %v3154_v24  ;;  %v3926_v34 = vsel %vm252_vm6, %v3124_v37, %v3153_v27  ;;  %v3159_v39 = vunpack.i.h.bf16 %v3157_v32  ;;  %v3158_v41 = vunpack.i.l.bf16 %v3157_v32 }
  0xd9   :  { %v3928_v44 = vpop.permute.xlu1 %3161  ;;  %v3380_v45 = vpack.i.bf16 %v3923_v33, %v257_v55  ;;  %v3375_v47 = vpack.i.bf16 %v3926_v34, %v254_v54  ;;  %2765 = vmatprep.subr.bf16.mxu0 %v2764_v40 }
  0xda   :  { %v5769_v52 = vunpack.i.h.bf16 %v3928_v44  ;;  %v3163_v46 = vunpack.i.l.bf16 %v3928_v44  ;;  %v282_v37 = vsel %vm281_vm7, %v3158_v41, %v3143_v14  ;;  %v285_v53 = vsel %vm281_vm7, %v3159_v39, %v3148_v20 }
  0xdb   :  { %3381 = vrot.lane.b32.xlu1 %v3380_v45, %s3632_s28  ;;  %3376 = vrot.lane.b32.xlu0 %v3375_v47, %s3632_s28  ;;  %v3940_v56 = vpop.permute.xlu0 %3166  ;;  %v2766_v55 = vpack.c.bf16 %v285_v53, %v282_v37  ;;  %v2834_v20 = vpack.c.bf16 %v3697_v6, %v3692_v1 }
  0xdc   :  { %v5768_v54 = vunpack.i.h.bf16 %v3940_v56  ;;  %v3168_v62 = vunpack.i.l.bf16 %v3940_v56  ;;  %v312_v9 = vsel %vm310_vm8, %v3163_v46, %v5769_v52 }
  0xdd   :  { %v3944_v63 = vpop.permute.xlu1 %3171  ;;  %2767 = vmatpush1.bf16.msra.mxu0 %v2766_v55 }
  0xde   :  { %v3174_v2 = vunpack.i.h.bf16 %v3944_v63  ;;  %v3173_v8 = vunpack.i.l.bf16 %v3944_v63  ;;  %v315_v14 = vsel %vm310_vm8, %v3168_v62, %v5768_v54 }
  0xdf   :  { %3386 = vrot.lane.b32.xlu0 %v3385_v0, %s3632_s28  ;;  %v3177_v16 = vpop.permute.xlu0 %3176  ;;  %v2768_v15 = vpack.c.bf16 %v315_v14, %v312_v9  ;;  %v3400_v0 = vpack.i.bf16 %v285_v53, %v282_v37 }
  0xe0   :  { %v287_v18 = vsel %vm281_vm7, %v3149_v19, %v3174_v2  ;;  %v284_v7 = vsel %vm281_vm7, %v3144_v12, %v3173_v8  ;;  %v3179_v23 = vunpack.i.h.bf16 %v3177_v16  ;;  %v3178_v24 = vunpack.i.l.bf16 %v3177_v16 }
  0xe1   :  { %v3395_v27 = vpack.i.bf16 %v287_v18, %v286_v31  ;;  %v2832_v32 = vpack.c.bf16 %v287_v18, %v284_v7  ;;  %v3959_v40 = vpop.permute.xlu1 %3181  ;;  %v3390_v39 = vpack.i.bf16 %v284_v7, %v283_v28  ;;  %2769 = vmatprep.subr.bf16.mxu0 %v2768_v15 }
  0xe2   :  { %v5767_v41 = vunpack.i.h.bf16 %v3959_v40  ;;  %v3183_v45 = vunpack.i.l.bf16 %v3959_v40  ;;  %v311_v12 = vsel %vm310_vm8, %v3178_v24, %v3163_v46  ;;  %v314_v1 = vsel %vm310_vm8, %v3179_v23, %v3168_v62 }
  0xe3   :  { %2833 = vmatprep.subr.bf16.mxu1 %v2832_v32  ;;  %3396 = vrot.lane.b32.xlu0 %v3395_v27, %s3632_s28  ;;  %v2770_v6 = vpack.c.bf16 %v314_v1, %v311_v12  ;;  %v3967_v19 = vpop.permute.xlu0 %3186 }
  0xe4   :  { %3391 = vrot.lane.b32.xlu1 %v3390_v39, %s3632_s28  ;;  %2835 = vmatpush3.bf16.msra.mxu1 %v2834_v20  ;;  %v5763_v28 = vunpack.i.h.bf16 %v3967_v19  ;;  %v3188_v31 = vunpack.i.l.bf16 %v3967_v19  ;;  %v341_v55 = vsel %vm339_vm9, %v3183_v45, %v5767_v41 }
  0xe5   :  { %v3192_v47 = vpop.permute.xlu1 %3191  ;;  %2771 = vmatpush1.bf16.msra.mxu0 %v2770_v6 }
  0xe6   :  { %v3194_v46 = vunpack.i.h.bf16 %v3192_v47  ;;  %v3193_v2 = vunpack.i.l.bf16 %v3192_v47  ;;  %v344_v62 = vsel %vm339_vm9, %v3188_v31, %v5763_v28 }
  0xe7   :  { %3406 = vrot.lane.b32.xlu0 %v3708_v11, %s3625_s21  ;;  %v3980_v8 = vpop.permute.xlu0 %3196  ;;  %v2772_v9 = vpack.c.bf16 %v344_v62, %v341_v55  ;;  %s2461_s21 = sshll.u32 %s3640_s20, 4  ;;  %s2462_s21 = int_to_ptr.vmem [resolvable:$true] %s2461_s21 }
  0xe8   :  { %3401 = vrot.lane.b32.xlu1 %v3400_v0, %s3632_s28  ;;  %v340_v14 = vsel %vm339_vm9, %v3193_v2, %v3183_v45  ;;  %v343_v16 = vsel %vm339_vm9, %v3194_v46, %v3188_v31  ;;  %v5761_v37 = vunpack.i.h.bf16 %v3980_v8  ;;  %v3198_v53 = vunpack.i.l.bf16 %v3980_v8  ;;  %p3590_p3 = scmp.lt.s32.totalorder %s2462_s21, %s2462_s21 }
  0xe9   :  { %v3986_v18 = vpop.permute.xlu1 %3201  ;;  %v2774_v7 = vpack.c.bf16 %v343_v16, %v340_v14  ;;  %2773 = vmatprep.subr.bf16.mxu0 %v2772_v9 }
  0xea   :  { %v5759_v15 = vunpack.i.h.bf16 %v3986_v18  ;;  %v3203_v20 = vunpack.i.l.bf16 %v3986_v18  ;;  %v370_v23 = vsel %vm368_vm10, %v3198_v53, %v5761_v37 }
  0xeb   :  { %3416 = vrot.lane.b32.xlu0 %v3708_v11, %s3627_s23  ;;  %2775 = vmatpush1.bf16.msra.mxu0 %v2774_v7  ;;  %v3207_v24 = vpop.permute.xlu0 %3206 }
  0xec   :  { %3411 = vrot.lane.b32.xlu1 %v3708_v11, %s3626_s22  ;;  %v373_v27 = vsel %vm368_vm10, %v3203_v20, %v5759_v15  ;;  %v3209_v32 = vunpack.i.h.bf16 %v3207_v24  ;;  %v3208_v39 = vunpack.i.l.bf16 %v3207_v24  ;;  %s3585_s22 = scalar_lea.vmem %s2462_s21, 256 }
  0xed   :  { %v4000_v45 = vpop.permute.xlu1 %3211  ;;  %v2776_v12 = vpack.c.bf16 %v373_v27, %v370_v23  ;;  %p3586_p2 = scmp.ne.s32.totalorder %s2462_s21, %s3585_s22  ;;  %p3591_p4 = scmp.lt.s32.totalorder %s3585_s22, %s3585_s22 }
  0xee   :  { %v5757_v1 = vunpack.i.h.bf16 %v4000_v45  ;;  %v3213_v6 = vunpack.i.l.bf16 %v4000_v45  ;;  %v369_v31 = vsel %vm368_vm10, %v3208_v39, %v3198_v53  ;;  %v372_v47 = vsel %vm368_vm10, %v3209_v32, %v3203_v20 }
  0xef   :  { %3426 = vrot.lane.b32.xlu0 %v3708_v11, %s3629_s25  ;;  %2777 = vmatprep.subr.bf16.mxu0 %v2776_v12  ;;  %v4010_v55 = vpop.permute.xlu0 %3216  ;;  %v2778_v0 = vpack.c.bf16 %v372_v47, %v369_v31  ;;  %p3592_p5 = por %p3591_p4, %p3590_p3 }
  0xf0   :  { %3421 = vrot.lane.b32.xlu1 %v3708_v11, %s3628_s24  ;;  %v5756_v46 = vunpack.i.h.bf16 %v4010_v55  ;;  %v3218_v2 = vunpack.i.l.bf16 %v4010_v55  ;;  %v399_v9 = vsel %vm397_vm11, %v3213_v6, %v5757_v1 }
  0xf1   :  { %v3222_v62 = vpop.permute.xlu1 %3221  ;;  %2779 = vmatpush1.bf16.msra.mxu0 %v2778_v0  ;;  %p3593_p6 = pnand %p3592_p5, %p3586_p2 }
  0xf2   :  { %v3224_v14 = vunpack.i.h.bf16 %v3222_v62  ;;  %v3223_v16 = vunpack.i.l.bf16 %v3222_v62  ;;  %v402_v53 = vsel %vm397_vm11, %v3218_v2, %v5756_v46 }
  0xf3   :  { %3436 = vrot.lane.b32.xlu0 %v3708_v11, %s3631_s27  ;;  %v4024_v7 = vpop.permute.xlu0 %3226  ;;  %v2780_v20 = vpack.c.bf16 %v402_v53, %v399_v9 }
  0xf4   :  { %3431 = vrot.lane.b32.xlu1 %v3708_v11, %s3630_s26  ;;  %v398_v23 = vsel %vm397_vm11, %v3223_v16, %v3213_v6  ;;  %v401_v24 = vsel %vm397_vm11, %v3224_v14, %v3218_v2  ;;  %v5755_v27 = vunpack.i.h.bf16 %v4024_v7  ;;  %v3228_v32 = vunpack.i.l.bf16 %v4024_v7 }
  0xf5   :  { %v4030_v39 = vpop.permute.xlu1 %3231  ;;  %v2782_v12 = vpack.c.bf16 %v401_v24, %v398_v23  ;;  %2781 = vmatprep.subr.bf16.mxu0 %v2780_v20 }
  0xf6   :  { %v5754_v31 = vunpack.i.h.bf16 %v4030_v39  ;;  %v3233_v47 = vunpack.i.l.bf16 %v4030_v39  ;;  %v428_v6 = vsel %vm426_vm12, %v3228_v32, %v5755_v27 }
  0xf7   :  { %3446 = vrot.lane.b32.xlu0 %v3790_v36, %s3632_s28  ;;  %2783 = vmatpush1.bf16.msra.mxu0 %v2782_v12  ;;  %v3237_v0 = vpop.permute.xlu0 %3236 }
  0xf8   :  { %3441 = vrot.lane.b32.xlu1 %v3708_v11, %s3632_s28  ;;  %v431_v2 = vsel %vm426_vm12, %v3233_v47, %v5754_v31  ;;  %v3239_v62 = vunpack.i.h.bf16 %v3237_v0  ;;  %v3238_v9 = vunpack.i.l.bf16 %v3237_v0 }
  0xf9   :  { %v4044_v14 = vpop.permute.xlu1 %3241  ;;  %v2784_v16 = vpack.c.bf16 %v431_v2, %v428_v6 }
  0xfa   :  { %v5753_v36 = vunpack.i.h.bf16 %v4044_v14  ;;  %v3243_v53 = vunpack.i.l.bf16 %v4044_v14  ;;  %v427_v11 = vsel %vm426_vm12, %v3238_v9, %v3228_v32  ;;  %v430_v20 = vsel %vm426_vm12, %v3239_v62, %v3233_v47 }
  0xfb   :  { %3456 = vrot.lane.b32.xlu0 %v3831_v22, %s3632_s28  ;;  %2785 = vmatprep.subr.bf16.mxu0 %v2784_v16  ;;  %v4054_v23 = vpop.permute.xlu0 %3246  ;;  %v2786_v24 = vpack.c.bf16 %v430_v20, %v427_v11 }
  0xfc   :  { %3451 = vrot.lane.b32.xlu1 %v3810_v59, %s3632_s28  ;;  %v5752_v12 = vunpack.i.h.bf16 %v4054_v23  ;;  %v3248_v6 = vunpack.i.l.bf16 %v4054_v23  ;;  %v457_v22 = vsel %vm455_vm13, %v3243_v53, %v5753_v36 }
  0xfd   :  { %v3252_v0 = vpop.permute.xlu1 %3251  ;;  %2787 = vmatpush1.bf16.msra.mxu0 %v2786_v24 }
  0xfe   :  { %v3254_v2 = vunpack.i.h.bf16 %v3252_v0  ;;  %v3253_v16 = vunpack.i.l.bf16 %v3252_v0  ;;  %v460_v59 = vsel %vm455_vm13, %v3248_v6, %v5752_v12 }
  0xff   :  { %3466 = vrot.lane.b32.xlu0 %v3873_v17, %s3632_s28  ;;  %v4068_v32 = vpop.permute.xlu0 %3256  ;;  %v2788_v47 = vpack.c.bf16 %v460_v59, %v457_v22 }
 0x100   :  { %3461 = vrot.lane.b32.xlu1 %v3852_v49, %s3632_s28  ;;  %v456_v62 = vsel %vm455_vm13, %v3253_v16, %v3243_v53  ;;  %v459_v9 = vsel %vm455_vm13, %v3254_v2, %v3248_v6  ;;  %v5751_v11 = vunpack.i.h.bf16 %v4068_v32  ;;  %v3258_v20 = vunpack.i.l.bf16 %v4068_v32 }
 0x101   :  { %v4074_v17 = vpop.permute.xlu1 %3261  ;;  %v2790_v24 = vpack.c.bf16 %v459_v9, %v456_v62  ;;  %2789 = vmatprep.subr.bf16.mxu0 %v2788_v47 }
 0x102   :  { %v5750_v0 = vunpack.i.h.bf16 %v4074_v17  ;;  %v3263_v51 = vunpack.i.l.bf16 %v4074_v17  ;;  %v486_v49 = vsel %vm484_vm14, %v3258_v20, %v5751_v11 }
 0x103   :  { %3476 = vrot.lane.b32.xlu0 %v3915_v21, %s3632_s28  ;;  %2791 = vmatpush1.bf16.msra.mxu0 %v2790_v24  ;;  %v3267_v53 = vpop.permute.xlu0 %3266 }
 0x104   :  { %3471 = vrot.lane.b32.xlu1 %v3894_v48, %s3632_s28  ;;  %v489_v6 = vsel %vm484_vm14, %v3263_v51, %v5750_v0  ;;  %v3269_v22 = vunpack.i.h.bf16 %v3267_v53  ;;  %v3268_v2 = vunpack.i.l.bf16 %v3267_v53 }
 0x105   :  { %v4088_v16 = vpop.permute.xlu1 %3271  ;;  %v2792_v59 = vpack.c.bf16 %v489_v6, %v486_v49 }
 0x106   :  { %v5748_v21 = vunpack.i.h.bf16 %v4088_v16  ;;  %v3273_v47 = vunpack.i.l.bf16 %v4088_v16  ;;  %v485_v62 = vsel %vm484_vm14, %v3268_v2, %v3258_v20  ;;  %v488_v48 = vsel %vm484_vm14, %v3269_v22, %v3263_v51  ;;  %v4103_v20 = vld [vmem:[#allocation5] sm:$0xff] }
 0x107   :  { %2793 = vmatprep.subr.bf16.mxu0 %v2792_v59  ;;  %v4096_v9 = vpop.permute.xlu0 %3276  ;;  %v2794_v24 = vpack.c.bf16 %v488_v48, %v485_v62 }
 0x108   :  { %3481 = vrot.lane.b32.xlu1 %v3944_v63, %s3632_s28  ;;  %v5749_v53 = vunpack.i.h.bf16 %v4096_v9  ;;  %v3278_v49 = vunpack.i.l.bf16 %v4096_v9  ;;  %v643_v10 = vsel %vm641_vm15, %v3273_v47, %v5748_v21  ;;  %v4108_v63 = vld [vmem:[#allocation5 + $0x28] sm:$0xff]  ;;  %v4120_v21 = vld [vmem:[#allocation5 + $0x40] sm:$0xff] }
 0x109   :  { %v3282_v6 = vpop.permute.xlu1 %3281  ;;  %2795 = vmatpush1.bf16.msra.mxu0 %v2794_v24  ;;  %5804 = vst [vmem:[#allocation11_spill] sm:$0xff] %v4108_v63  ;;  %v4114_v24 = vld [vmem:[#allocation5 + $0x20] sm:$0xff]  ;;  %5807 = vst [vmem:[#allocation14_spill] sm:$0xff] %v4120_v21 }
 0x10a   :  { %v3284_v59 = vunpack.i.h.bf16 %v3282_v6  ;;  %v3283_v35 = vunpack.i.l.bf16 %v3282_v6  ;;  %v646_v51 = vsel %vm641_vm15, %v3278_v49, %v5749_v53  ;;  %5805 = vst [vmem:[#allocation12_spill] sm:$0xff] %v4114_v24  ;;  %v4116_v6 = vld [vmem:[#allocation5 + $0x48] sm:$0xff] }
 0x10b   :  { %v2796_v62 = vpack.c.bf16 %v646_v51, %v643_v10  ;;  %5806 = vst [vmem:[#allocation13_spill] sm:$0xff] %v4116_v6  ;;  %v4128_v10 = vld [vmem:[#allocation5 + $0x88] sm:$0xff] }
 0x10c   :  { %v645_v22 = vsel %vm641_vm15, %v3284_v59, %v3278_v49  ;;  %v642_v2 = vsel %vm641_vm15, %v3283_v35, %v3273_v47  ;;  %881 = vmatmul.mubr.f32.vlgmr.msra.gmra.mrb[0].mxu0 %v4103_v20  ;;  %v4122_v49 = vld [vmem:[#allocation5 + $0x68] sm:$0xff]  ;;  %v4126_v35 = vld [vmem:[#allocation5 + $0x60] sm:$0xff]  ;;  %5810 = vst [vmem:[#allocation17_spill] sm:$0xff] %v4128_v10  ;;  %v4134_v59 = vld [vmem:[#allocation5 + $0x18] sm:$0xff] }
 0x10d   :  { %v2798_v48 = vpack.c.bf16 %v645_v22, %v642_v2  ;;  %2797 = vmatprep.subr.bf16.mxu0 %v2796_v62  ;;  %886 = vmatprep.mubr.f32.mxu0 %v4108_v63  ;;  %5808 = vst [vmem:[#allocation15_spill] sm:$0xff] %v4122_v49  ;;  %5809 = vst [vmem:[#allocation16_spill] sm:$0xff] %v4126_v35  ;;  %v4132_v47 = vld [vmem:[#allocation5 + $0x80] sm:$0xff] }
 0x10e   :  { %5811 = vst [vmem:[#allocation18_spill] sm:$0xff] %v4132_v47  ;;  %5812 = vst [vmem:[#allocation19_spill] sm:$0xff] %v4134_v59 }
 0x10f   :  { %2799 = vmatpush1.bf16.msra.mxu0 %v2798_v48 }
 0x110   :  { %887 = vmatmul.mubr.f32.gmra.mrb[2].mxu0 %v4114_v24  ;;  %v5822_v24 = vunpack.i.h.bf16 %v3940_v56  ;;  %v4308_v56 = vld [vmem:[#allocation5 + $0x10] sm:$0xff] }
 0x111   :  { %892 = vmatprep.mubr.f32.mxu0 %v4116_v6  ;;  %v5821_v6 = vunpack.i.h.bf16 %v3928_v44  ;;  %v5823_v44 = vpack.c.bf16 %v3797_v42, %v3800_v43  ;;  %v5827_v42 = vunpack.i.h.bf16 %v3986_v18 }
 0x114   :  { %893 = vmatmul.mubr.f32.gmra.mrb[4].mxu0 %v4120_v21 }
 0x115   :  { %898 = vmatprep.mubr.f32.mxu0 %v4122_v49 }
 0x118   :  { %899 = vmatmul.mubr.f32.gmra.mrb[6].mxu0 %v4126_v35 }
 0x119   :  { %904 = vmatprep.mubr.f32.mxu0 %v4128_v10 }
 0x11c   :  { %905 = vmatmul.mubr.f32.gmra.mrb[8].mxu0 %v4132_v47 }
 0x11d   :  { %v4136_v51 = vpop.permute.xlu1 %3291  ;;  %v4138_v22 = vpop.permute.xlu0 %3286  ;;  %2474 = vmatprep.mubr.msk.f32.mxu0 %vm800_vm0, %v4134_v59 }
 0x11e   :  { %v5760_v2 = vunpack.i.h.bf16 %v4136_v51  ;;  %v3293_v62 = vunpack.i.l.bf16 %v4136_v51  ;;  %v5758_v48 = vunpack.i.h.bf16 %v4138_v22  ;;  %v3288_v53 = vunpack.i.l.bf16 %v4138_v22 }
 0x120   :  { %v649_v0 = vsel %vm641_vm15, %v3288_v53, %v5758_v48  ;;  %v652_v11 = vsel %vm641_vm15, %v3293_v62, %v5760_v2 }
 0x121   :  { %v3297_v12 = vpop.permute.xlu0 %3296  ;;  %v2800_v36 = vpack.c.bf16 %v652_v11, %v649_v0 }
 0x122   :  { %v3299_v5 = vunpack.i.h.bf16 %v3297_v12  ;;  %v3298_v31 = vunpack.i.l.bf16 %v3297_v12 }
 0x123   :  { %2801 = vmatprep.subr.bf16.mxu0 %v2800_v36 }
 0x124   :  { %v651_v27 = vsel %vm641_vm15, %v3299_v5, %v3293_v62  ;;  %v648_v38 = vsel %vm641_vm15, %v3298_v31, %v3288_v53 }
 0x125   :  { %v2802_v46 = vpack.c.bf16 %v651_v27, %v648_v38  ;;  %v4155_v1 = vpop.permute.xlu1 %3301  ;;  %v4157_v13 = vpop.permute.xlu0 %3306 }
 0x126   :  { %5813 = vst [vmem:[#allocation20_spill] sm:$0xff] %v4155_v1  ;;  %5814 = vst [vmem:[#allocation21_spill] sm:$0xff] %v4157_v13  ;;  %v5762_v48 = vunpack.i.h.bf16 %v4155_v1  ;;  %v3303_v15 = vunpack.i.l.bf16 %v4155_v1  ;;  %v5764_v2 = vunpack.i.h.bf16 %v4157_v13  ;;  %v3308_v11 = vunpack.i.l.bf16 %v4157_v13 }
 0x127   :  { %2803 = vmatpush1.bf16.msra.mxu0 %v2802_v46 }
 0x128   :  { %v655_v5 = vsel %vm641_vm15, %v3303_v15, %v5762_v48  ;;  %v658_v38 = vsel %vm641_vm15, %v3308_v11, %v5764_v2 }
 0x129   :  { %v3312_v27 = vpop.permute.xlu1 %3311  ;;  %v2804_v31 = vpack.c.bf16 %v658_v38, %v655_v5  ;;  %v4188_v38 = vld [vmem:[%s5745_s2 + $0x8] sm:$0xff] }
 0x12a   :  { %v3314_v36 = vunpack.i.h.bf16 %v3312_v27  ;;  %v3313_v12 = vunpack.i.l.bf16 %v3312_v27  ;;  %5815 = vst [vmem:[#allocation22_spill] sm:$0xff] %v4188_v38  ;;  %v4193_v27 = vld [vmem:[%s5745_s2] sm:$0xff] }
 0x12b   :  { %2805 = vmatprep.subr.bf16.mxu0 %v2804_v31  ;;  %5816 = vst [vmem:[#allocation23_spill] sm:$0xff] %v4193_v27 }
 0x12c   :  { %v654_v0 = vsel %vm641_vm15, %v3313_v12, %v3303_v15  ;;  %v657_v53 = vsel %vm641_vm15, %v3314_v36, %v3308_v11  ;;  %v3633_v12 = vmov 0  }
 0x12d   :  { %v2806_v62 = vpack.c.bf16 %v657_v53, %v654_v0  ;;  %v4171_v37 = vpop.permute.xlu1 %3321  ;;  %v4173_v46 = vpop.permute.xlu0 %3316  ;;  %3486 = vset.pattern.permute.xlu1 %v3633_v12  ;;  %3485 = vset.pattern.permute.xlu0 %v3633_v12 }
 0x12e   :  { %v5766_v48 = vunpack.i.h.bf16 %v4171_v37  ;;  %v3323_v28 = vunpack.i.l.bf16 %v4171_v37  ;;  %v5765_v2 = vunpack.i.h.bf16 %v4173_v46  ;;  %v3318_v5 = vunpack.i.l.bf16 %v4173_v46  ;;  %782 = vperm.xlu1 %3486, %v4188_v38   ;;  %777 = vperm.xlu0 %3485, %v4193_v27  }
 0x12f   :  { %2807 = vmatpush1.bf16.msra.mxu0 %v2806_v62  ;;  %v4200_v62 = vld [vmem:[%s5745_s2 + $0x10] sm:$0xff] }
 0x130   :  { %v661_v15 = vsel %vm641_vm15, %v3318_v5, %v5765_v2  ;;  %v664_v11 = vsel %vm641_vm15, %v3323_v28, %v5766_v48  ;;  %5817 = vst [vmem:[#allocation24_spill] sm:$0xff] %v4200_v62  ;;  %v4205_v2 = vld [vmem:[%s5745_s2 + $0x18] sm:$0xff] }
 0x131   :  { %v3327_v31 = vpop.permute.xlu0 %3326  ;;  %v2808_v36 = vpack.c.bf16 %v664_v11, %v661_v15  ;;  %5818 = vst [vmem:[#allocation25_spill] sm:$0xff] %v4205_v2 }
 0x132   :  { %v3329_v0 = vunpack.i.h.bf16 %v3327_v31  ;;  %v3328_v53 = vunpack.i.l.bf16 %v3327_v31  ;;  %787 = vperm.xlu1 %3486, %v4200_v62   ;;  %792 = vperm.xlu0 %3485, %v4205_v2  }
 0x133   :  { %2809 = vmatprep.subr.bf16.mxu0 %v2808_v36 }
 0x134   :  { %v663_v15 = vsel %vm641_vm15, %v3329_v0, %v3323_v28  ;;  %v660_v11 = vsel %vm641_vm15, %v3328_v53, %v3318_v5  ;;  %v4222_v28 = vld [vmem:[%s5745_s2 + $0x20] sm:$0xff] }
 0x135   :  { %v2810_v31 = vpack.c.bf16 %v663_v15, %v660_v11  ;;  %v4209_v12 = vpop.permute.xlu1 %3331  ;;  %v4211_v48 = vpop.permute.xlu0 %3336  ;;  %5819 = vst [vmem:[#allocation26_spill] sm:$0xff] %v4222_v28 }
 0x136   :  { %v5777_v36 = vunpack.i.h.bf16 %v4209_v12  ;;  %v3333_v41 = vunpack.i.l.bf16 %v4209_v12  ;;  %v5778_v50 = vunpack.i.h.bf16 %v4211_v48  ;;  %v3338_v54 = vunpack.i.l.bf16 %v4211_v48  ;;  %797 = vperm.xlu1 %3486, %v4222_v28  }
 0x137   :  { %2811 = vmatpush1.bf16.msra.mxu0 %v2810_v31 }
 0x138   :  { %v667_v5 = vsel %vm641_vm15, %v3333_v41, %v5777_v36  ;;  %v670_v0 = vsel %vm641_vm15, %v3338_v54, %v5778_v50 }
 0x139   :  { %v3342_v53 = vpop.permute.xlu1 %3341  ;;  %v2812_v15 = vpack.c.bf16 %v670_v0, %v667_v5 }
 0x13a   :  { %v3344_v11 = vunpack.i.h.bf16 %v3342_v53  ;;  %v3343_v52 = vunpack.i.l.bf16 %v3342_v53  ;;  %v5779_v53 = vmov 1  }
 0x13b   :  { %2813 = vmatprep.subr.bf16.mxu0 %v2812_v15  ;;  %3487 = vset.pattern.permute.xlu1 %v5779_v53 }
 0x13c   :  { %v666_v31 = vsel %vm641_vm15, %v3343_v52, %v3333_v41  ;;  %v669_v2 = vsel %vm641_vm15, %v3344_v11, %v3338_v54  ;;  %1342 = vperm.xlu1 %3487, %v4193_v27  }
 0x13d   :  { %v2814_v62 = vpack.c.bf16 %v669_v2, %v666_v31  ;;  %v4233_v38 = vpop.permute.xlu1 %3351  ;;  %v4235_v59 = vpop.permute.xlu0 %3346 }
 0x13e   :  { %v5785_v36 = vunpack.i.h.bf16 %v4233_v38  ;;  %v3353_v50 = vunpack.i.l.bf16 %v4233_v38  ;;  %v5783_v5 = vunpack.i.h.bf16 %v4235_v59  ;;  %v3348_v0 = vunpack.i.l.bf16 %v4235_v59 }
 0x13f   :  { %2815 = vmatpush1.bf16.msra.mxu0 %v2814_v62 }
 0x140   :  { %v673_v52 = vsel %vm641_vm15, %v3348_v0, %v5783_v5  ;;  %v676_v54 = vsel %vm641_vm15, %v3353_v50, %v5785_v36 }
 0x141   :  { %v3357_v41 = vpop.permute.xlu0 %3356  ;;  %v2816_v2 = vpack.c.bf16 %v676_v54, %v673_v52 }
 0x142   :  { %v3359_v15 = vunpack.i.h.bf16 %v3357_v41  ;;  %v3358_v11 = vunpack.i.l.bf16 %v3357_v41 }
 0x143   :  { %2817 = vmatprep.subr.bf16.mxu0 %v2816_v2 }
 0x144   :  { %v675_v31 = vsel %vm641_vm15, %v3359_v15, %v3353_v50  ;;  %v672_v53 = vsel %vm641_vm15, %v3358_v11, %v3348_v0 }
 0x145   :  { %v2818_v62 = vpack.c.bf16 %v675_v31, %v672_v53  ;;  %v4251_v28 = vpop.permute.xlu1 %3361  ;;  %v4253_v27 = vpop.permute.xlu0 %3366 }
 0x146   :  { %v5787_v5 = vunpack.i.h.bf16 %v4251_v28  ;;  %v3363_v47 = vunpack.i.l.bf16 %v4251_v28  ;;  %v5789_v36 = vunpack.i.h.bf16 %v4253_v27  ;;  %v3368_v52 = vunpack.i.l.bf16 %v4253_v27 }
 0x147   :  { %2819 = vmatpush1.bf16.msra.mxu0 %v2818_v62 }
 0x148   :  { %v679_v50 = vsel %vm641_vm15, %v3363_v47, %v5787_v5  ;;  %v682_v0 = vsel %vm641_vm15, %v3368_v52, %v5789_v36 }
 0x149   :  { %v3372_v53 = vpop.permute.xlu1 %3371  ;;  %v2820_v54 = vpack.c.bf16 %v682_v0, %v679_v50 }
 0x14a   :  { %v3374_v41 = vunpack.i.h.bf16 %v3372_v53  ;;  %v3373_v2 = vunpack.i.l.bf16 %v3372_v53 }
 0x14b   :  { %2821 = vmatprep.subr.bf16.mxu0 %v2820_v54 }
 0x14c   :  { %v678_v15 = vsel %vm641_vm15, %v3373_v2, %v3363_v47  ;;  %v681_v11 = vsel %vm641_vm15, %v3374_v41, %v3368_v52 }
 0x14d   :  { %v2822_v31 = vpack.c.bf16 %v681_v11, %v678_v15  ;;  %v4267_v10 = vpop.permute.xlu1 %3381  ;;  %v4269_v62 = vpop.permute.xlu0 %3376 }
 0x14e   :  { %v5793_v5 = vunpack.i.h.bf16 %v4267_v10  ;;  %v3383_v35 = vunpack.i.l.bf16 %v4267_v10  ;;  %v5791_v36 = vunpack.i.h.bf16 %v4269_v62  ;;  %v3378_v50 = vunpack.i.l.bf16 %v4269_v62 }
 0x14f   :  { %2823 = vmatpush1.bf16.msra.mxu0 %v2822_v31 }
 0x150   :  { %v685_v47 = vsel %vm641_vm15, %v3378_v50, %v5791_v36  ;;  %v688_v52 = vsel %vm641_vm15, %v3383_v35, %v5793_v5 }
 0x151   :  { %v3387_v0 = vpop.permute.xlu0 %3386  ;;  %v2824_v53 = vpack.c.bf16 %v688_v52, %v685_v47 }
 0x152   :  { %v3389_v54 = vunpack.i.h.bf16 %v3387_v0  ;;  %v3388_v41 = vunpack.i.l.bf16 %v3387_v0 }
 0x153   :  { %2825 = vmatprep.subr.bf16.mxu0 %v2824_v53 }
 0x154   :  { %v687_v2 = vsel %vm641_vm15, %v3389_v54, %v3383_v35  ;;  %v684_v15 = vsel %vm641_vm15, %v3388_v41, %v3378_v50 }
 0x155   :  { %v2826_v11 = vpack.c.bf16 %v687_v2, %v684_v15  ;;  %v4283_v49 = vpop.permute.xlu0 %3396 }
 0x156   :  { %5820 = vst [vmem:[#allocation27_spill] sm:$0xff] %v4283_v49  ;;  %v4285_v31 = vpop.permute.xlu1 %3391  ;;  %v5796_v36 = vunpack.i.h.bf16 %v4283_v49  ;;  %v3398_v21 = vunpack.i.l.bf16 %v4283_v49 }
 0x157   :  { %v5799_v5 = vunpack.i.h.bf16 %v4285_v31  ;;  %v3393_v47 = vunpack.i.l.bf16 %v4285_v31  ;;  %2827 = vmatpush1.bf16.msra.mxu0 %v2826_v11 }
 0x158   :  { %v694_v35 = vsel %vm641_vm15, %v3398_v21, %v5796_v36 }
 0x159   :  { %v3407_v52 = vpop.permute.xlu0 %3406  ;;  %v691_v50 = vsel %vm641_vm15, %v3393_v47, %v5799_v5 }
 0x15a   :  { %v3402_v0 = vpop.permute.xlu1 %3401  ;;  %v3409_v53 = vunpack.i.h.bf16 %v3407_v52  ;;  %v3408_v54 = vunpack.i.l.bf16 %v3407_v52  ;;  %v2828_v41 = vpack.c.bf16 %v694_v35, %v691_v50 }
 0x15b   :  { %v3404_v2 = vunpack.i.h.bf16 %v3402_v0  ;;  %v3403_v15 = vunpack.i.l.bf16 %v3402_v0 }
 0x15c   :  { %2829 = vmatprep.subr.bf16.mxu0 %v2828_v41  ;;  %v313_v11 = vsel %vm310_vm8, %v5821_v6, %v3408_v54  ;;  %v316_v36 = vsel %vm310_vm8, %v5822_v24, %v3409_v53  ;;  %v5824_v6 = vunpack.i.h.bf16 %v3959_v40 }
 0x15d   :  { %v690_v13 = vsel %vm641_vm15, %v3403_v15, %v3393_v47  ;;  %v693_v1 = vsel %vm641_vm15, %v3404_v2, %v3398_v21  ;;  %v3417_v5 = vpop.permute.xlu0 %3416  ;;  %v2836_v63 = vpack.c.bf16 %v316_v36, %v313_v11  ;;  %v4316_v36 = vld [vmem:[#allocation5 + $0x38] sm:$0xff]  ;;  %v5828_v15 = vpack.c.bf16 %v3821_v4, %v3818_v3  ;;  %v4344_v4 = vld [vmem:[#allocation5 + $0x50] sm:$0xff] }
 0x15e   :  { %v2830_v49 = vpack.c.bf16 %v693_v1, %v690_v13  ;;  %v3412_v52 = vpop.permute.xlu1 %3411  ;;  %v3419_v35 = vunpack.i.h.bf16 %v3417_v5  ;;  %v3418_v50 = vunpack.i.l.bf16 %v3417_v5  ;;  %v5825_v13 = vunpack.i.h.bf16 %v3967_v19 }
 0x15f   :  { %v3414_v0 = vunpack.i.h.bf16 %v3412_v52  ;;  %v3413_v41 = vunpack.i.l.bf16 %v3412_v52  ;;  %2837 = vmatprep.subr.bf16.mxu1 %v2836_v63  ;;  %v5826_v63 = vunpack.i.h.bf16 %v3980_v8  ;;  %v3635_v5 = vmov 0.0|0.0   ;;  %v4328_v8 = vld [vmem:[#allocation5 + $0x30] sm:$0xff]  ;;  %v4333_v52 = vld [vmem:[#allocation5 + $0x58] sm:$0xff] }
 0x160   :  { %2831 = vmatpush1.bf16.msra.mxu0 %v2830_v49  ;;  %2839 = vmatpush3.bf16.msra.mxu1 %v5823_v44  ;;  %v374_v43 = vsel %vm368_vm10, %v5827_v42, %v3419_v35  ;;  %v5829_v35 = vunpack.i.h.bf16 %v4000_v45  ;;  %v5831_v45 = vpack.c.bf16 %v3839_v29, %v3842_v30  ;;  %v4362_v30 = vld [vmem:[#allocation5 + $0x70] sm:$0xff] }
 0x161   :  { %v3427_v24 = vpop.permute.xlu0 %3426  ;;  %v342_v21 = vsel %vm339_vm9, %v5824_v6, %v3413_v41  ;;  %v345_v1 = vsel %vm339_vm9, %v5825_v13, %v3414_v0  ;;  %v371_v49 = vsel %vm368_vm10, %v5826_v63, %v3418_v50  ;;  %2923 = vmatprep.subr.bf16.mxu0 %v3635_v5  ;;  %v5830_v0 = vunpack.i.h.bf16 %v4010_v55  ;;  %v4351_v55 = vld [vmem:[#allocation5 + $0x78] sm:$0xff] }
 0x162   :  { %v3422_v40 = vpop.permute.xlu1 %3421  ;;  %v2840_v47 = vpack.c.bf16 %v345_v1, %v342_v21  ;;  %v2844_v19 = vpack.c.bf16 %v374_v43, %v371_v49  ;;  %v3429_v2 = vunpack.i.h.bf16 %v3427_v24  ;;  %v3428_v18 = vunpack.i.l.bf16 %v3427_v24 }
 0x163   :  { %v3424_v53 = vunpack.i.h.bf16 %v3422_v40  ;;  %v3423_v54 = vunpack.i.l.bf16 %v3422_v40  ;;  %976 = vmatmul.mubr.f32.vlgmr.msra.gmra.mrb[0].mxu0 %v4308_v56  ;;  %v5832_v13 = vunpack.i.h.bf16 %v4024_v7  ;;  %v5833_v63 = vunpack.i.h.bf16 %v4030_v39  ;;  %v4367_v39 = vld [vmem:[#allocation5 + $0x98] sm:$0xff] }
 0x164   :  { %2841 = vmatprep.subr.bf16.mxu1 %v2840_v47  ;;  %2475 = vmatprep.mubr.msk.f32.mxu0 %vm800_vm0, %v4316_v36  ;;  %v5834_v7 = vpack.c.bf16 %v3863_v58, %v3860_v57  ;;  %v5837_v57 = vunpack.i.h.bf16 %v4068_v32  ;;  %v5840_v32 = vunpack.i.h.bf16 %v4074_v17 }
 0x165   :  { %2843 = vmatpush3.bf16.msra.mxu1 %v5828_v15  ;;  %v3437_v11 = vpop.permute.xlu0 %3436  ;;  %v400_v50 = vsel %vm397_vm11, %v5829_v35, %v3423_v54  ;;  %v403_v41 = vsel %vm397_vm11, %v5830_v0, %v3424_v53  ;;  %v429_v1 = vsel %vm426_vm12, %v5832_v13, %v3428_v18  ;;  %v432_v49 = vsel %vm426_vm12, %v5833_v63, %v3429_v2 }
 0x166   :  { %v3432_v44 = vpop.permute.xlu1 %3431  ;;  %2845 = vmatprep.subr.bf16.mxu1 %v2844_v19  ;;  %v2848_v3 = vpack.c.bf16 %v403_v41, %v400_v50  ;;  %v3438_v43 = vunpack.i.l.bf16 %v3437_v11  ;;  %v3439_v40 = vunpack.i.h.bf16 %v3437_v11  ;;  %v2852_v29 = vpack.c.bf16 %v432_v49, %v429_v1  ;;  %v4393_v41 = vld [vmem:[#allocation5 + $0x90] sm:$0xff] }
 0x167   :  { %982 = vmatmul.mubr.f32.gmra.mrb[2].mxu0 %v4328_v8  ;;  %v3434_v24 = vunpack.i.h.bf16 %v3432_v44  ;;  %v3433_v6 = vunpack.i.l.bf16 %v3432_v44  ;;  %v5835_v53 = vunpack.i.h.bf16 %v4044_v14  ;;  %v5836_v19 = vunpack.i.h.bf16 %v4054_v23 }
 0x168   :  { %2476 = vmatprep.mubr.msk.f32.mxu0 %vm800_vm0, %v4333_v52  ;;  %v487_v58 = vsel %vm484_vm14, %v5837_v57, %v3438_v43  ;;  %v5838_v35 = vunpack.i.h.bf16 %v4171_v37  ;;  %v5839_v23 = vunpack.i.h.bf16 %v4173_v46  ;;  %v490_v44 = vsel %vm484_vm14, %v5840_v32, %v3439_v40 }
 0x169   :  { %2847 = vmatpush3.bf16.msra.mxu1 %v5831_v45  ;;  %v4349_v21 = vpop.permute.xlu0 %3446  ;;  %v458_v54 = vsel %vm455_vm13, %v5835_v53, %v3433_v6  ;;  %v461_v2 = vsel %vm455_vm13, %v5836_v19, %v3434_v24  ;;  %v2860_v63 = vpack.c.bf16 %v490_v44, %v487_v58  ;;  %v5842_v43 = vunpack.i.h.bf16 %v4233_v38 }
 0x16a   :  { %v3442_v42 = vpop.permute.xlu1 %3441  ;;  %2849 = vmatprep.subr.bf16.mxu1 %v2848_v3  ;;  %v2856_v0 = vpack.c.bf16 %v461_v2, %v458_v54  ;;  %v5841_v3 = vpack.c.bf16 %v3881_v25, %v3884_v26  ;;  %v5844_v26 = vunpack.i.h.bf16 %v4209_v12  ;;  %v3448_v12 = vunpack.i.l.bf16 %v4349_v21 }
 0x16b   :  { %988 = vmatmul.mubr.f32.gmra.mrb[4].mxu0 %v4344_v4  ;;  %v3444_v17 = vunpack.i.h.bf16 %v3442_v42  ;;  %v3443_v49 = vunpack.i.l.bf16 %v3442_v42  ;;  %v5846_v42 = vpack.c.bf16 %v3905_v61, %v3902_v60  ;;  %v5849_v61 = vunpack.i.h.bf16 %v4267_v10 }
 0x16c   :  { %2477 = vmatprep.mubr.msk.f32.mxu0 %vm800_vm0, %v4351_v55  ;;  %v5850_v32 = vunpack.i.h.bf16 %v4269_v62 }
 0x16d   :  { %2851 = vmatpush3.bf16.msra.mxu1 %v5834_v7  ;;  %v3457_v47 = vpop.permute.xlu0 %3456 }
 0x16e   :  { %v4375_v18 = vpop.permute.xlu1 %3451  ;;  %v3459_v15 = vunpack.i.h.bf16 %v3457_v47  ;;  %v3458_v11 = vunpack.i.l.bf16 %v3457_v47  ;;  %2853 = vmatprep.subr.bf16.mxu1 %v2852_v29  ;;  %v5843_v29 = vunpack.i.h.bf16 %v4235_v59  ;;  %v5845_v47 = vunpack.i.h.bf16 %v4211_v48 }
 0x16f   :  { %994 = vmatmul.mubr.f32.gmra.mrb[6].mxu0 %v4362_v30  ;;  %v5847_v48 = vunpack.i.h.bf16 %v4096_v9  ;;  %v5852_v9 = vunpack.i.h.bf16 %v4253_v27  ;;  %v5855_v27 = vunpack.i.h.bf16 %v4138_v22 }
 0x170   :  { %v4384_v14 = vsel %vm641_vm15, %v5838_v35, %v3459_v15  ;;  %v4389_v50 = vsel %vm641_vm15, %v5839_v23, %v3458_v11  ;;  %2478 = vmatprep.mubr.msk.f32.mxu0 %vm800_vm0, %v4367_v39  ;;  %v3449_v11 = vunpack.i.h.bf16 %v4349_v21  ;;  %v5848_v23 = vunpack.i.h.bf16 %v4088_v16 }
 0x171   :  { %v2874_v37 = vpack.c.bf16 %v4384_v14, %v4389_v50  ;;  %2855 = vmatpush3.bf16.msra.mxu1 %v5841_v3  ;;  %v3467_v46 = vpop.permute.xlu0 %3466  ;;  %v647_v35 = vsel %vm641_vm15, %v5847_v48, %v3444_v17  ;;  %v5851_v21 = vunpack.i.h.bf16 %v4251_v28  ;;  %v5853_v16 = vpack.c.bf16 %v3923_v33, %v3926_v34 }
 0x172   :  { %v3462_v24 = vpop.permute.xlu1 %3461  ;;  %v3469_v6 = vunpack.i.h.bf16 %v3467_v46  ;;  %v3468_v45 = vunpack.i.l.bf16 %v3467_v46  ;;  %2857 = vmatprep.subr.bf16.mxu1 %v2856_v0  ;;  %v644_v60 = vsel %vm641_vm15, %v5848_v23, %v3443_v49  ;;  %v5854_v28 = vunpack.i.h.bf16 %v4136_v51 }
 0x173   :  { %v3464_v13 = vunpack.i.h.bf16 %v3462_v24  ;;  %v3463_v1 = vunpack.i.l.bf16 %v3462_v24  ;;  %1000 = vmatmul.mubr.f32.gmra.mrb[8].mxu0 %v4393_v41  ;;  %v2865_v62 = vpack.c.bf16 %v647_v35, %v644_v60  ;;  %v3454_v17 = vunpack.i.h.bf16 %v4375_v18 }
 0x174   :  { %v677_v40 = vsel %vm641_vm15, %v5842_v43, %v3469_v6  ;;  %v674_v25 = vsel %vm641_vm15, %v5843_v29, %v3468_v45  ;;  %v3453_v33 = vunpack.i.l.bf16 %v4375_v18  ;;  %v5856_v34 = vunpack.i.h.bf16 %v4285_v31  ;;  %v5857_v43 = vld [vmem:[#allocation27_spill] sm:$0xff] }
 0x175   :  { %v668_v7 = vsel %vm641_vm15, %v5844_v26, %v3463_v1  ;;  %v671_v53 = vsel %vm641_vm15, %v5845_v47, %v3464_v13  ;;  %v2880_v54 = vpack.c.bf16 %v677_v40, %v674_v25  ;;  %2859 = vmatpush3.bf16.msra.mxu1 %v5846_v42  ;;  %v3477_v38 = vpop.permute.xlu0 %3476  ;;  %v653_v1 = vsel %vm641_vm15, %v5854_v28, %v3449_v11  ;;  %v5859_v29 = vld [vmem:[#allocation11_spill] sm:$0xff]  ;;  %v5860_v26 = vld [vmem:[#allocation20_spill] sm:$0xff]  ;;  %v5865_v42 = vld [vmem:[#allocation13_spill] sm:$0xff] }
 0x176   :  { %v2877_v19 = vpack.c.bf16 %v671_v53, %v668_v7  ;;  %v3472_v2 = vpop.permute.xlu1 %3471  ;;  %v3479_v15 = vunpack.i.h.bf16 %v3477_v38  ;;  %v3478_v59 = vunpack.i.l.bf16 %v3477_v38  ;;  %2861 = vmatprep.subr.bf16.mxu1 %v2860_v63  ;;  %v650_v63 = vsel %vm641_vm15, %v5855_v27, %v3448_v12  ;;  %v5864_v53 = vld [vmem:[#allocation12_spill] sm:$0xff]  ;;  %v5869_v11 = vld [vmem:[#allocation17_spill] sm:$0xff]  ;;  %v5870_v12 = vld [vmem:[#allocation18_spill] sm:$0xff] }
 0x177   :  { %v3474_v57 = vunpack.i.h.bf16 %v3472_v2  ;;  %v3473_v58 = vunpack.i.l.bf16 %v3472_v2  ;;  %v5858_v40 = vunpack.i.h.bf16 %v5857_v43  ;;  %v2868_v25 = vpack.c.bf16 %v653_v1, %v650_v63  ;;  %v5866_v2 = vld [vmem:[#allocation14_spill] sm:$0xff] }
 0x178   :  { %v689_v0 = vsel %vm641_vm15, %v5849_v61, %v3479_v15  ;;  %v686_v44 = vsel %vm641_vm15, %v5850_v32, %v3478_v59  ;;  %v5861_v7 = vunpack.i.h.bf16 %v5860_v26  ;;  %v5867_v15 = vld [vmem:[#allocation15_spill] sm:$0xff]  ;;  %v5868_v59 = vld [vmem:[#allocation16_spill] sm:$0xff] }
 0x179   :  { %v680_v3 = vsel %vm641_vm15, %v5851_v21, %v3473_v58  ;;  %v683_v46 = vsel %vm641_vm15, %v5852_v9, %v3474_v57  ;;  %v2886_v24 = vpack.c.bf16 %v689_v0, %v686_v44  ;;  %2863 = vmatpush3.bf16.msra.mxu1 %v5853_v16  ;;  %v5871_v57 = vld [vmem:[#allocation19_spill] sm:$0xff] }
 0x17a   :  { %v2883_v10 = vpack.c.bf16 %v683_v46, %v680_v3  ;;  %v3482_v6 = vpop.permute.xlu1 %3481  ;;  %2864 = vmatprep.subr.bf16.mxu1 %v3635_v5  ;;  %v656_v18 = vsel %vm641_vm15, %v5861_v7, %v3453_v33 }
 0x17b   :  { %v3484_v45 = vunpack.i.h.bf16 %v3482_v6  ;;  %v3483_v13 = vunpack.i.l.bf16 %v3482_v6 }
 0x17c   :  { %1071 = vmatmul.mubr.f32.vlgmr.msra.gmra.mrb[0].mxu1 %v4103_v20  ;;  %v5862_v20 = vld [vmem:[#allocation21_spill] sm:$0xff] }
 0x17d   :  { %v692_v49 = vsel %vm641_vm15, %v5856_v34, %v3483_v13  ;;  %v695_v51 = vsel %vm641_vm15, %v5858_v40, %v3484_v45  ;;  %2866 = vmatpush1.bf16.msra.mxu1 %v2865_v62  ;;  %1075 = vmatprep.mubr.f32.mxu1 %v5859_v29  ;;  %v5863_v47 = vunpack.i.h.bf16 %v5862_v20 }
 0x17e   :  { %v2889_v22 = vpack.c.bf16 %v695_v51, %v692_v49  ;;  %2867 = vmatprep.subr.bf16.mxu1 %v3635_v5 }
 0x17f   :  { %v659_v31 = vsel %vm641_vm15, %v5863_v47, %v3454_v17 }
 0x180   :  { %1076 = vmatmul.mubr.f32.gmra.mrb[2].mxu1 %v5864_v53  ;;  %v2871_v38 = vpack.c.bf16 %v659_v31, %v656_v18 }
 0x181   :  { %2869 = vmatpush1.bf16.msra.mxu1 %v2868_v25  ;;  %1080 = vmatprep.mubr.f32.mxu1 %v5865_v42 }
 0x182   :  { %2870 = vmatprep.subr.bf16.mxu1 %v3635_v5 }
 0x184   :  { %1081 = vmatmul.mubr.f32.gmra.mrb[4].mxu1 %v5866_v2 }
 0x185   :  { %2872 = vmatpush1.bf16.msra.mxu1 %v2871_v38  ;;  %1085 = vmatprep.mubr.f32.mxu1 %v5867_v15 }
 0x186   :  { %2873 = vmatprep.subr.bf16.mxu1 %v3635_v5 }
 0x188   :  { %1086 = vmatmul.mubr.f32.gmra.mrb[6].mxu1 %v5868_v59 }
 0x189   :  { %2875 = vmatpush1.bf16.msra.mxu1 %v2874_v37  ;;  %1090 = vmatprep.mubr.f32.mxu1 %v5869_v11 }
 0x18a   :  { %2876 = vmatprep.subr.bf16.mxu1 %v3635_v5 }
 0x18c   :  { %1091 = vmatmul.mubr.f32.gmra.mrb[8].mxu1 %v5870_v12 }
 0x18d   :  { %2878 = vmatpush1.bf16.msra.mxu1 %v2877_v19  ;;  %2479 = vmatprep.mubr.msk.f32.mxu1 %vm800_vm0, %v5871_v57 }
 0x18e   :  { %2879 = vmatprep.subr.bf16.mxu1 %v3635_v5 }
 0x191   :  { %2881 = vmatpush1.bf16.msra.mxu1 %v2880_v54 }
 0x192   :  { %2882 = vmatprep.subr.bf16.mxu1 %v3635_v5 }
 0x195   :  { %2884 = vmatpush1.bf16.msra.mxu1 %v2883_v10 }
 0x196   :  { %2885 = vmatprep.subr.bf16.mxu1 %v3635_v5 }
 0x199   :  { %2887 = vmatpush1.bf16.msra.mxu1 %v2886_v24 }
 0x19a   :  { %2888 = vmatprep.subr.bf16.mxu1 %v3635_v5 }
 0x19d   :  { %2890 = vmatpush1.bf16.msra.mxu1 %v2889_v22 }
 0x1a0   :  { %1161 = vmatmul.mubr.f32.vlgmr.msra.gmra.mrb[10].mxu1 %v4308_v56  ;;  %v3636_v56 = vmov 2  }
 0x1a1   :  { %2480 = vmatprep.mubr.msk.f32.mxu1 %vm800_vm0, %v4316_v36  ;;  %3488 = vset.pattern.permute.xlu0 %v3636_v56  ;;  %v1186_v36 = vlaneseq }
 0x1a3   :  { %v4579_v59 = vshrl.u32 %v1186_v36, 7 }
 0x1a4   :  { %1166 = vmatmul.mubr.f32.gmra.mrb[12].mxu1 %v4328_v8  ;;  %v4500_v8 = vand.u32 127, %v1186_v36 }
 0x1a5   :  { %2481 = vmatprep.mubr.msk.f32.mxu1 %vm800_vm0, %v4333_v52  ;;  %v1518_v14 = vadd.s32 128, %v4579_v59 }
 0x1a6   :  { %v1188_v52 = vadd.s32 128, %v4500_v8  ;;  %vm1193_vm3 = vcmp.lt.s32.totalorder %v4500_v8, 105  ;;  %v2547_v11 = vadd.s32 4294967293, %v4500_v8  ;;  %vm1891_vm5 = vcmp.ge.s32.totalorder %v4500_v8, 3 }
 0x1a7   :  { %v2515_v36 = vadd.s32 4294967167, %v1518_v14  ;;  %vm1892_vm6 = vcmp.lt.s32.totalorder %v4500_v8, 6  ;;  %vm1599_vm7 = vcmp.lt.s32.totalorder %v4500_v8, 3 }
 0x1a8   :  { %1171 = vmatmul.mubr.f32.gmra.mrb[14].mxu1 %v4344_v4  ;;  %vm1200_vm1 = vcmp.ge.s32.totalorder %v1188_v52, 129  ;;  %vm1203_vm2 = vcmp.lt.s32.totalorder %v1188_v52, 234  ;;  %v4583_v52 = vmul.u32 15, %v4500_v8  ;;  %vm4600_vm8 = vmand %vm1891_vm5, %vm1892_vm6 }
 0x1a9   :  { %2482 = vmatprep.mubr.msk.f32.mxu1 %vm800_vm0, %v4351_v55  ;;  %vm4509_vm4 = vmand %vm1200_vm1, %vm1203_vm2 }
 0x1ac   :  { %1176 = vmatmul.mubr.f32.gmra.mrb[16].mxu1 %v4362_v30 }
 0x1ad   :  { %2483 = vmatprep.mubr.msk.f32.mxu1 %vm800_vm0, %v4367_v39  ;;  %v4503_v4 = vpop.permute.xlu0 %777  ;;  %v4513_v50 = vpop.permute.xlu1 %782 }
 0x1b0   :  { %1181 = vmatmul.mubr.f32.gmra.mrb[18].mxu1 %v4393_v41 }
 0x1b1   :  { %v4533_v44 = vpop.permute.xlu1 %787  ;;  %v4547_v45 = vpop.permute.xlu0 %792 }
 0x1b5   :  { %v4561_v40 = vpop.permute.xlu1 %797 }
 0x236   :  { %v977_v55 = vpop.f32.mrb[0].mxu0 }
 0x237   :  { %v4507_v30 = vadd.f32 %v977_v55, %v4503_v4  ;;  %v979_v39 = vpop.f32.mrb[1].mxu0  ;;  %v4585_v55 = vmul.u32 15, %v2547_v11 }
 0x238   :  { %v4516_v41 = vadd.f32 %v979_v39, %v4503_v4 }
 0x239   :  { %v1211_v37 = vsel %vm1193_vm3, %v4507_v30, 0.0 }
 0x23a   :  { %v1251_v54 = vmul.f32 %v1211_v37, %v1211_v37  ;;  %v1212_v19 = vsel %vm4509_vm4, %v4516_v41, 0.0  ;;  %v983_v58 = vpop.f32.mrb[2].mxu0 }
 0x23b   :  { %v1226_v48 = vadd.f32 %v1212_v19, %v1211_v37  ;;  %v1252_v35 = vmul.f32 %v1212_v19, %v1212_v19  ;;  %v4525_v23 = vadd.f32 %v983_v58, %v4513_v50  ;;  %v985_v60 = vpop.f32.mrb[3].mxu0  ;;  %v1519_v37 = vadd.s32 136, %v4579_v59 }
 0x23c   :  { %v4528_v61 = vadd.f32 %v985_v60, %v4513_v50 }
 0x23d   :  { %v1214_v0 = vsel %vm1193_vm3, %v4525_v23, 0.0  ;;  %1228 = vadd.xlane.f32.xlu0 %v1226_v48  ;;  %v1266_v32 = vadd.f32 %v1252_v35, %v1251_v54  ;;  %v2516_v19 = vadd.s32 4294967167, %v1519_v37  ;;  %v1567_v35 = vsub.s32 %v1518_v14, %v4583_v52 }
 0x23e   :  { %v1215_v21 = vsel %vm4509_vm4, %v4528_v61, 0.0  ;;  %v989_v3 = vpop.f32.mrb[4].mxu0  ;;  %v1254_v9 = vmul.f32 %v1214_v0, %v1214_v0  ;;  %v1568_v60 = vsub.s32 %v1519_v37, %v4583_v52  ;;  %v5885_v37 = vmov 1  }
 0x23f   :  { %v1230_v46 = vadd.f32 %v1215_v21, %v1214_v0  ;;  %v1255_v24 = vmul.f32 %v1215_v21, %v1215_v21  ;;  %v4539_v16 = vadd.f32 %v989_v3, %v4533_v44  ;;  %v991_v10 = vpop.f32.mrb[5].mxu0  ;;  %1268 = vadd.xlane.f32.xlu1 %v1266_v32  ;;  %v1859_v0 = vsub.s32 %v2515_v36, %v4585_v55  ;;  %v5886_v36 = vld [vmem:[#allocation23_spill] sm:$0xff] }
 0x240   :  { %v4542_v6 = vadd.f32 %v991_v10, %v4533_v44  ;;  %v1860_v21 = vsub.s32 %v2516_v19, %v4585_v55  ;;  %vm1617_vm9 = vcmp.ge.s32.totalorder %v1567_v35, 0  ;;  %vm1618_vm10 = vcmp.ge.s32.totalorder %v1568_v60, 0  ;;  %v5887_v19 = vld [vmem:[#allocation24_spill] sm:$0xff] }
 0x241   :  { %v1217_v62 = vsel %vm1193_vm3, %v4539_v16, 0.0  ;;  %1232 = vadd.xlane.f32.xlu0 %v1230_v46  ;;  %v1270_v34 = vadd.f32 %v1255_v24, %v1254_v9  ;;  %v1534_v9 = vadd.s32 256, %v4579_v59  ;;  %vm1665_vm11 = vmand %vm1599_vm7, %vm1617_vm9  ;;  %vm1713_vm12 = vcmp.lt.s32.totalorder %v1567_v35, 75 }
 0x242   :  { %v1257_v13 = vmul.f32 %v1217_v62, %v1217_v62  ;;  %v1218_v28 = vsel %vm4509_vm4, %v4542_v6, 0.0  ;;  %v995_v1 = vpop.f32.mrb[6].mxu0  ;;  %vm1714_vm13 = vcmp.lt.s32.totalorder %v1568_v60, 75  ;;  %v1535_v24 = vadd.s32 264, %v4579_v59  ;;  %vm1666_vm14 = vmand %vm1599_vm7, %vm1618_vm10 }
 0x243   :  { %v1234_v27 = vadd.f32 %v1218_v28, %v1217_v62  ;;  %v1258_v63 = vmul.f32 %v1218_v28, %v1218_v28  ;;  %v4553_v17 = vadd.f32 %v995_v1, %v4547_v45  ;;  %v997_v33 = vpop.f32.mrb[7].mxu0  ;;  %vm1910_vm15 = vcmp.ge.s32.totalorder %v1859_v0, 0  ;;  %vm4612_vm0 = vmand %vm1665_vm11, %vm1713_vm12 }
 0x244   :  { %v4556_v49 = vadd.f32 %v997_v33, %v4547_v45  ;;  %vm1911_vm1 = vcmp.ge.s32.totalorder %v1860_v21, 0  ;;  %vm4616_vm2 = vmand %vm1666_vm14, %vm1714_vm13  ;;  %v1583_v1 = vsub.s32 %v1534_v9, %v4583_v52  ;;  %vm2007_vm5 = vcmp.lt.s32.totalorder %v1860_v21, 75 }
 0x245   :  { %v1220_v43 = vsel %vm1193_vm3, %v4553_v17, 0.0  ;;  %1236 = vadd.xlane.f32.xlu1 %v1234_v27  ;;  %1272 = vadd.xlane.f32.xlu0 %v1270_v34  ;;  %v1274_v22 = vadd.f32 %v1258_v63, %v1257_v13  ;;  %v2531_v27 = vadd.s32 4294967167, %v1534_v9  ;;  %v1584_v33 = vsub.s32 %v1535_v24, %v4583_v52  ;;  %vm1959_vm6 = vmand %vm4600_vm8, %vm1911_vm1 }
 0x246   :  { %v1221_v51 = vsel %vm4509_vm4, %v4556_v49, 0.0  ;;  %v1001_v29 = vpop.f32.mrb[8].mxu0  ;;  %v1260_v25 = vmul.f32 %v1220_v43, %v1220_v43  ;;  %v2532_v34 = vadd.s32 4294967167, %v1535_v24  ;;  %vm2055_vm10 = vmand %vm1959_vm6, %vm2007_vm5  ;;  %vm1633_vm11 = vcmp.ge.s32.totalorder %v1583_v1, 0 }
 0x247   :  { %v1238_v26 = vadd.f32 %v1221_v51, %v1220_v43  ;;  %v1261_v7 = vmul.f32 %v1221_v51, %v1221_v51  ;;  %v4567_v18 = vadd.f32 %v1001_v29, %v4561_v40  ;;  %v1003_v20 = vpop.f32.mrb[9].mxu0  ;;  %v5880_v29 = vld [vmem:[#allocation22_spill] sm:$0xff]  ;;  %vm1634_vm13 = vcmp.ge.s32.totalorder %v1584_v33, 0  ;;  %vm2103_vm14 = vmor %vm4616_vm2, %vm2055_vm10 }
 0x248   :  { %v4570_v47 = vadd.f32 %v1003_v20, %v4561_v40  ;;  %v3637_v20 = vmov 0.0   ;;  %vm1681_vm1 = vmand %vm1599_vm7, %vm1633_vm11  ;;  %v1520_v60 = vadd.s32 144, %v4579_v59  ;;  %v1521_v21 = vadd.s32 152, %v4579_v59 }
 0x249   :  { %v1223_v31 = vsel %vm1193_vm3, %v4567_v18, 0.0  ;;  %1240 = vadd.xlane.f32.xlu1 %v1238_v26  ;;  %1276 = vadd.xlane.f32.xlu0 %v1274_v22  ;;  %v1278_v15 = vadd.f32 %v1261_v7, %v1260_v25  ;;  %vm2006_vm3 = vcmp.lt.s32.totalorder %v1859_v0, 75  ;;  %v1875_v22 = vsub.s32 %v2531_v27, %v4585_v55  ;;  %v5892_v27 = vld [vmem:[#allocation25_spill] sm:$0xff] }
 0x24a   :  { %v1224_v53 = vsel %vm4509_vm4, %v4570_v47, 0.0  ;;  %v1263_v42 = vmul.f32 %v1223_v31, %v1223_v31  ;;  %vm1958_vm4 = vmand %vm4600_vm8, %vm1910_vm15  ;;  %v1876_v26 = vsub.s32 %v2532_v34, %v4585_v55  ;;  %vm1729_vm15 = vcmp.lt.s32.totalorder %v1583_v1, 75 }
 0x24b   :  { %v1242_v38 = vadd.f32 %v1224_v53, %v1223_v31  ;;  %v1264_v2 = vmul.f32 %v1224_v53, %v1224_v53  ;;  %vm2054_vm9 = vmand %vm1958_vm4, %vm2006_vm3  ;;  %vm1730_vm3 = vcmp.lt.s32.totalorder %v1584_v33, 75  ;;  %vm1926_vm2 = vcmp.ge.s32.totalorder %v1875_v22, 0 }
 0x24c   :  { %vm2102_vm12 = vmor %vm4612_vm0, %vm2054_vm9  ;;  %vm1927_vm5 = vcmp.ge.s32.totalorder %v1876_v26, 0  ;;  %vm2022_vm9 = vcmp.lt.s32.totalorder %v1875_v22, 75  ;;  %vm2023_vm11 = vcmp.lt.s32.totalorder %v1876_v26, 75  ;;  %v2517_v13 = vadd.s32 4294967167, %v1520_v60 }
 0x24d   :  { %1244 = vadd.xlane.f32.xlu1 %v1242_v38  ;;  %1280 = vadd.xlane.f32.xlu0 %v1278_v15  ;;  %v1282_v57 = vadd.f32 %v1264_v2, %v1263_v42  ;;  %v2150_v31 = vsel %vm2102_vm12, 0.013333334, %v3637_v20  ;;  %v2151_v42 = vsel %vm2103_vm14, 0.013333334, %v3637_v20  ;;  %v1503_v38 = vadd.s32 8, %v4579_v59  ;;  %vm1682_vm0 = vmand %vm1599_vm7, %vm1634_vm13 }
 0x24e   :  { %v2891_v2 = vpack.c.bf16 %v2151_v42, %v2150_v31  ;;  %vm4646_vm4 = vmand %vm1681_vm1, %vm1729_vm15  ;;  %v1570_v28 = vsub.s32 %v1521_v21, %v4583_v52  ;;  %v2518_v1 = vadd.s32 4294967167, %v1521_v21  ;;  %v1861_v33 = vsub.s32 %v2517_v13, %v4585_v55 }
 0x24f   :  { %v2582_v12 = vpop.f32.mrb[0].mxu1  ;;  %vm4650_vm6 = vmand %vm1682_vm0, %vm1730_vm3  ;;  %v2500_v14 = vadd.s32 4294967167, %v1503_v38  ;;  %v1537_v26 = vadd.s32 280, %v4579_v59  ;;  %v1505_v21 = vadd.s32 24, %v4579_v59 }
 0x250   :  { %v2583_v39 = vpop.f32.mrb[1].mxu1  ;;  %2892 = vmatprep.subr.bf16.mxu1 %v2891_v2  ;;  %vm1974_vm10 = vmand %vm4600_vm8, %vm1926_vm2 }
 0x251   :  { %v4589_v54 = vadd.f32 %v2583_v39, %v2582_v12  ;;  %1284 = vadd.xlane.f32.xlu0 %v1282_v57  ;;  %v1551_v12 = vsub.s32 %v4579_v59, %v4583_v52  ;;  %v2499_v57 = vadd.s32 4294967167, %v4579_v59  ;;  %v1552_v39 = vsub.s32 %v1503_v38, %v4583_v52  ;;  %vm1975_vm12 = vmand %vm4600_vm8, %vm1927_vm5 }
 0x252   :  { %vm2070_vm13 = vmand %vm1974_vm10, %vm2022_vm9 }
 0x253   :  { %v2585_v58 = vpop.f32.mrb[2].mxu1  ;;  %vm2071_vm14 = vmand %vm1975_vm12, %vm2023_vm11  ;;  %vm1601_vm15 = vcmp.ge.s32.totalorder %v1551_v12, 0  ;;  %vm1602_vm3 = vcmp.ge.s32.totalorder %v1552_v39, 0  ;;  %vm1697_vm2 = vcmp.lt.s32.totalorder %v1551_v12, 75  ;;  %vm1698_vm9 = vcmp.lt.s32.totalorder %v1552_v39, 75 }
 0x254   :  { %v2586_v48 = vpop.f32.mrb[3].mxu1  ;;  %vm2118_vm1 = vmor %vm4646_vm4, %vm2070_vm13  ;;  %v1586_v12 = vsub.s32 %v1537_v26, %v4583_v52 }
 0x255   :  { %v4597_v32 = vadd.f32 %v2586_v48, %v2585_v58  ;;  %v1843_v58 = vsub.s32 %v2499_v57, %v4585_v55  ;;  %v1844_v48 = vsub.s32 %v2500_v14, %v4585_v55  ;;  %vm2119_vm0 = vmor %vm4650_vm6, %vm2071_vm14  ;;  %v2166_v35 = vsel %vm2118_vm1, 0.013333334, %v3637_v20 }
 0x256   :  { %v2167_v0 = vsel %vm2119_vm0, 0.013333334, %v3637_v20  ;;  %vm1649_vm5 = vmand %vm1599_vm7, %vm1601_vm15  ;;  %v2534_v57 = vadd.s32 4294967167, %v1537_v26 }
 0x257   :  { %v2588_v46 = vpop.f32.mrb[4].mxu1  ;;  %v2924_v9 = vpack.c.bf16 %v2167_v0, %v2166_v35  ;;  %vm1650_vm4 = vmand %vm1599_vm7, %vm1602_vm3  ;;  %vm1894_vm6 = vcmp.ge.s32.totalorder %v1843_v58, 0  ;;  %vm1895_vm11 = vcmp.ge.s32.totalorder %v1844_v48, 0  ;;  %vm1990_vm13 = vcmp.lt.s32.totalorder %v1843_v58, 75 }
 0x258   :  { %v2589_v10 = vpop.f32.mrb[5].mxu1  ;;  %vm4681_vm10 = vmand %vm1649_vm5, %vm1697_vm2  ;;  %vm1991_vm15 = vcmp.lt.s32.totalorder %v1844_v48, 75  ;;  %v1504_v35 = vadd.s32 16, %v4579_v59 }
 0x259   :  { %v4610_v62 = vadd.f32 %v2589_v10, %v2588_v46  ;;  %2925 = vmatpush3.bf16.msra.mxu0 %v2924_v9  ;;  %vm4685_vm12 = vmand %vm1650_vm4, %vm1698_vm9  ;;  %v1569_v10 = vsub.s32 %v1520_v60, %v4583_v52  ;;  %vm1620_vm9 = vcmp.ge.s32.totalorder %v1570_v28, 0  ;;  %v3538_v46 = vld [vmem:[%s5745_s2 + $0x20] sm:$0xff] }
 0x25a   :  { %vm1942_vm14 = vmand %vm4600_vm8, %vm1894_vm6  ;;  %2926 = vmatprep.subr.bf16.mxu0 %v3635_v5  ;;  %v1553_v13 = vsub.s32 %v1504_v35, %v4583_v52 }
 0x25b   :  { %v2591_v63 = vpop.f32.mrb[6].mxu1  ;;  %vm1943_vm1 = vmand %vm4600_vm8, %vm1895_vm11  ;;  %vm1619_vm2 = vcmp.ge.s32.totalorder %v1569_v10, 0  ;;  %vm1715_vm6 = vcmp.lt.s32.totalorder %v1569_v10, 75  ;;  %v1083_v39 = vadd.f32 %v4610_v62, %v4533_v44  ;;  %v1878_v44 = vsub.s32 %v2534_v57, %v4585_v55 }
 0x25c   :  { %v2592_v43 = vpop.f32.mrb[7].mxu1  ;;  %vm2038_vm3 = vmand %vm1942_vm14, %vm1990_vm13  ;;  %vm1912_vm13 = vcmp.ge.s32.totalorder %v1861_v33, 0 }
 0x25d   :  { %v4626_v51 = vadd.f32 %v2592_v43, %v2591_v63  ;;  %v1073_v63 = vadd.f32 %v4589_v54, %v4503_v4  ;;  %vm2039_vm0 = vmand %vm1943_vm1, %vm1991_vm15  ;;  %v1862_v43 = vsub.s32 %v2518_v1, %v4585_v55  ;;  %v1536_v4 = vadd.s32 272, %v4579_v59 }
 0x25e   :  { %1346 = vperm.xlu1 %3487, %v5880_v29   ;;  %vm2086_vm5 = vmor %vm4681_vm10, %vm2038_vm3  ;;  %vm1716_vm10 = vcmp.lt.s32.totalorder %v1570_v28, 75  ;;  %vm2008_vm3 = vcmp.lt.s32.totalorder %v1861_v33, 75  ;;  %v2501_v28 = vadd.s32 4294967167, %v1504_v35 }
 0x25f   :  { %v2594_v25 = vpop.f32.mrb[8].mxu1  ;;  %vm2087_vm4 = vmor %vm4685_vm12, %vm2039_vm0  ;;  %vm1913_vm15 = vcmp.ge.s32.totalorder %v1862_v43, 0  ;;  %v2533_v11 = vadd.s32 4294967167, %v1536_v4  ;;  %v1088_v62 = vadd.f32 %v4626_v51, %v4547_v45 }
 0x260   :  { %v2595_v7 = vpop.f32.mrb[9].mxu1  ;;  %v2135_v54 = vsel %vm2087_vm4, 0.013333334, %v3637_v20  ;;  %vm1667_vm11 = vmand %vm1599_vm7, %vm1619_vm2  ;;  %vm2009_vm2 = vcmp.lt.s32.totalorder %v1862_v43, 75 }
 0x261   :  { %v4636_v53 = vadd.f32 %v2595_v7, %v2594_v25  ;;  %v2134_v25 = vsel %vm2086_vm5, 0.013333334, %v3637_v20  ;;  %v1078_v7 = vadd.f32 %v4597_v32, %v4513_v50  ;;  %vm1668_vm12 = vmand %vm1599_vm7, %vm1620_vm9  ;;  %v1585_v32 = vsub.s32 %v1536_v4, %v4583_v52 }
 0x262   :  { %3489 = vset.pattern.permute.xlu1 %v3636_v56  ;;  %v2893_v31 = vpack.c.bf16 %v2135_v54, %v2134_v25  ;;  %vm4721_vm14 = vmand %vm1667_vm11, %vm1715_vm6  ;;  %v1877_v48 = vsub.s32 %v2533_v11, %v4585_v55  ;;  %v1523_v4 = vadd.s32 168, %v4579_v59 }
 0x263   :  { %1381 = vperm.xlu1 %3489, %v5880_v29   ;;  %vm4727_vm1 = vmand %vm1668_vm12, %vm1716_vm10  ;;  %vm1635_vm6 = vcmp.ge.s32.totalorder %v1585_v32, 0  ;;  %vm1636_vm10 = vcmp.ge.s32.totalorder %v1586_v12, 0 }
 0x264   :  { %2894 = vmatpush3.bf16.msra.mxu1 %v2893_v31  ;;  %vm1960_vm0 = vmand %vm4600_vm8, %vm1912_vm13  ;;  %vm1731_vm13 = vcmp.lt.s32.totalorder %v1585_v32, 75  ;;  %v1572_v38 = vsub.s32 %v1523_v4, %v4583_v52 }
 0x265   :  { %vm1961_vm5 = vmand %vm4600_vm8, %vm1913_vm15  ;;  %vm1732_vm15 = vcmp.lt.s32.totalorder %v1586_v12, 75  ;;  %v1538_v12 = vadd.s32 288, %v4579_v59 }
 0x266   :  { %vm2056_vm9 = vmand %vm1960_vm0, %vm2008_vm3  ;;  %vm1928_vm3 = vcmp.ge.s32.totalorder %v1877_v48, 0 }
 0x267   :  { %3490 = vset.pattern.permute.xlu1 %v5885_v37  ;;  %1377 = vperm.xlu0 %3488, %v5886_v36   ;;  %vm2057_vm4 = vmand %vm1961_vm5, %vm2009_vm2  ;;  %vm1929_vm2 = vcmp.ge.s32.totalorder %v1878_v44, 0 }
 0x268   :  { %1350 = vperm.xlu1 %3490, %v5887_v19   ;;  %vm2104_vm11 = vmor %vm4721_vm14, %vm2056_vm9  ;;  %vm2024_vm9 = vcmp.lt.s32.totalorder %v1877_v48, 75  ;;  %v1587_v48 = vsub.s32 %v1538_v12, %v4583_v52 }
 0x269   :  { %vm2105_vm12 = vmor %vm4727_vm1, %vm2057_vm4 }
 0x26a   :  { %v2153_v0 = vsel %vm2105_vm12, 0.013333334, %v3637_v20  ;;  %vm1683_vm14 = vmand %vm1599_vm7, %vm1635_vm6  ;;  %vm2025_vm6 = vcmp.lt.s32.totalorder %v1878_v44, 75  ;;  %v2535_v44 = vadd.s32 4294967167, %v1538_v12 }
 0x26b   :  { %vm1684_vm1 = vmand %vm1599_vm7, %vm1636_vm10 }
 0x26c   :  { %3491 = vset.pattern.permute.xlu1 %v3636_v56  ;;  %vm4767_vm0 = vmand %vm1683_vm14, %vm1731_vm13  ;;  %vm1603_vm13 = vcmp.ge.s32.totalorder %v1553_v13, 0  ;;  %v1879_v35 = vsub.s32 %v2535_v44, %v4585_v55 }
 0x26d   :  { %1385 = vperm.xlu1 %3491, %v5887_v19   ;;  %v5897_v19 = vld [vmem:[#allocation26_spill] sm:$0xff]  ;;  %vm4773_vm5 = vmand %vm1684_vm1, %vm1732_vm15 }
 0x26e   :  { %vm1976_vm4 = vmand %vm4600_vm8, %vm1928_vm3  ;;  %vm1699_vm3 = vcmp.lt.s32.totalorder %v1553_v13, 75 }
 0x26f   :  { %vm2072_vm10 = vmand %vm1976_vm4, %vm2024_vm9 }
 0x270   :  { %vm2120_vm14 = vmor %vm4767_vm0, %vm2072_vm10 }
 0x271   :  { %3492 = vset.pattern.permute.xlu1 %v5885_v37  ;;  %v2168_v43 = vsel %vm2120_vm14, 0.013333334, %v3637_v20 }
 0x272   :  { %1354 = vperm.xlu1 %3492, %v5892_v27  }
 0x273   :  { %v1162_v34 = vpop.f32.mrb[10].mxu1 }
 0x274   :  { %v4704_v29 = vadd.f32 %v1162_v34, %v1073_v63  ;;  %v1164_v22 = vpop.f32.mrb[11].mxu1  ;;  %v2502_v63 = vadd.s32 4294967167, %v1505_v21 }
 0x275   :  { %v1522_v22 = vadd.s32 160, %v4579_v59 }
 0x276   :  { %3493 = vset.pattern.permute.xlu1 %v3636_v56  ;;  %v1846_v34 = vsub.s32 %v2502_v63, %v4585_v55 }
 0x277   :  { %v1167_v42 = vpop.f32.mrb[12].mxu1  ;;  %1389 = vperm.xlu1 %3493, %v5892_v27   ;;  %v1554_v27 = vsub.s32 %v1505_v21, %v4583_v52  ;;  %v1571_v31 = vsub.s32 %v1522_v22, %v4583_v52  ;;  %v1506_v21 = vadd.s32 32, %v4579_v59 }
 0x278   :  { %v4725_v2 = vadd.f32 %v1167_v42, %v1078_v7  ;;  %v1169_v15 = vpop.f32.mrb[13].mxu1  ;;  %v2519_v42 = vadd.s32 4294967167, %v1522_v22 }
 0x279   :  { %vm1604_vm15 = vcmp.ge.s32.totalorder %v1554_v27, 0  ;;  %vm1700_vm9 = vcmp.lt.s32.totalorder %v1554_v27, 75  ;;  %v2520_v15 = vadd.s32 4294967167, %v1523_v4  ;;  %v1555_v10 = vsub.s32 %v1506_v21, %v4583_v52 }
 0x27a   :  { %vm1652_vm0 = vmand %vm1599_vm7, %vm1604_vm15  ;;  %v1863_v50 = vsub.s32 %v2519_v42, %v4585_v55  ;;  %v2503_v13 = vadd.s32 4294967167, %v1506_v21 }
 0x27b   :  { %v1172_v14 = vpop.f32.mrb[14].mxu1  ;;  %3494 = vset.pattern.permute.xlu1 %v5885_v37  ;;  %v2152_v37 = vsel %vm2104_vm11, 0.013333334, %v3637_v20  ;;  %vm1977_vm11 = vmand %vm4600_vm8, %vm1929_vm2  ;;  %v1864_v32 = vsub.s32 %v2520_v15, %v4585_v55 }
 0x27c   :  { %v4740_v36 = vadd.f32 %v1172_v14, %v1083_v39  ;;  %1358 = vperm.xlu1 %3494, %v5897_v19   ;;  %v1174_v58 = vpop.f32.mrb[15].mxu1  ;;  %v2895_v51 = vpack.c.bf16 %v2153_v0, %v2152_v37  ;;  %vm2073_vm12 = vmand %vm1977_vm11, %vm2025_vm6  ;;  %v1539_v39 = vadd.s32 296, %v4579_v59  ;;  %v1847_v27 = vsub.s32 %v2503_v13, %v4585_v55 }
 0x27d   :  { %vm2121_vm1 = vmor %vm4773_vm5, %vm2073_vm12  ;;  %vm1897_vm5 = vcmp.ge.s32.totalorder %v1846_v34, 0 }
 0x27e   :  { %2896 = vmatprep.subr.bf16.mxu1 %v2895_v51  ;;  %v2169_v25 = vsel %vm2121_vm1, 0.013333334, %v3637_v20  ;;  %vm1651_vm2 = vmand %vm1599_vm7, %vm1603_vm13  ;;  %vm1993_vm13 = vcmp.lt.s32.totalorder %v1846_v34, 75  ;;  %v2536_v37 = vadd.s32 4294967167, %v1539_v39  ;;  %v1507_v51 = vadd.s32 40, %v4579_v59 }
 0x27f   :  { %v1177_v60 = vpop.f32.mrb[16].mxu1  ;;  %v2927_v54 = vpack.c.bf16 %v2169_v25, %v2168_v43  ;;  %vm4799_vm6 = vmand %vm1651_vm2, %vm1699_vm3  ;;  %vm1621_vm3 = vcmp.ge.s32.totalorder %v1571_v31, 0  ;;  %v1525_v43 = vadd.s32 184, %v4579_v59 }
 0x280   :  { %v4757_v9 = vadd.f32 %v1177_v60, %v1088_v62  ;;  %3495 = vset.pattern.permute.xlu1 %v3636_v56  ;;  %v1179_v45 = vpop.f32.mrb[17].mxu1  ;;  %v1093_v56 = vadd.f32 %v4636_v53, %v4561_v40  ;;  %v1845_v53 = vsub.s32 %v2501_v28, %v4585_v55  ;;  %vm4803_vm11 = vmand %vm1652_vm0, %vm1700_vm9  ;;  %vm1622_vm9 = vcmp.ge.s32.totalorder %v1572_v38, 0 }
 0x281   :  { %1393 = vperm.xlu1 %3495, %v3538_v46   ;;  %2928 = vmatpush3.bf16.msra.mxu0 %v2927_v54  ;;  %vm1945_vm14 = vmand %vm4600_vm8, %vm1897_vm5  ;;  %v1588_v62 = vsub.s32 %v1539_v39, %v4583_v52  ;;  %v1880_v60 = vsub.s32 %v2536_v37, %v4585_v55  ;;  %v1556_v28 = vsub.s32 %v1507_v51, %v4583_v52 }
 0x282   :  { %vm1896_vm4 = vcmp.ge.s32.totalorder %v1845_v53, 0  ;;  %vm1992_vm10 = vcmp.lt.s32.totalorder %v1845_v53, 75  ;;  %2929 = vmatprep.subr.bf16.mxu0 %v3635_v5  ;;  %vm2041_vm1 = vmand %vm1945_vm14, %vm1993_vm13  ;;  %v1524_v53 = vadd.s32 176, %v4579_v59  ;;  %v1574_v7 = vsub.s32 %v1525_v43, %v4583_v52 }
 0x283   :  { %v1182_v1 = vpop.f32.mrb[18].mxu1  ;;  %vm1944_vm12 = vmand %vm4600_vm8, %vm1896_vm4  ;;  %vm1717_vm4 = vcmp.lt.s32.totalorder %v1571_v31, 75  ;;  %v2522_v31 = vadd.s32 4294967167, %v1525_v43  ;;  %v4973_v43 = vpop.permute.xlu1 %1342 }
 0x284   :  { %v4781_v33 = vadd.f32 %v1182_v1, %v1093_v56  ;;  %v1184_v40 = vpop.f32.mrb[19].mxu1  ;;  %vm2040_vm15 = vmand %vm1944_vm12, %vm1992_vm10  ;;  %vm1718_vm10 = vcmp.lt.s32.totalorder %v1572_v38, 75  ;;  %vm1914_vm12 = vcmp.ge.s32.totalorder %v1863_v50, 0  ;;  %v2504_v1 = vadd.s32 4294967167, %v1507_v51 }
 0x285   :  { %vm2088_vm2 = vmor %vm4799_vm6, %vm2040_vm15  ;;  %vm2010_vm15 = vcmp.lt.s32.totalorder %v1863_v50, 75  ;;  %v1573_v54 = vsub.s32 %v1524_v53, %v4583_v52  ;;  %v2521_v26 = vadd.s32 4294967167, %v1524_v53  ;;  %v1866_v38 = vsub.s32 %v2522_v31, %v4585_v55 }
 0x286   :  { %vm2089_vm0 = vmor %vm4803_vm11, %vm2041_vm1  ;;  %v2136_v11 = vsel %vm2088_vm2, 0.013333334, %v3637_v20  ;;  %vm1915_vm11 = vcmp.ge.s32.totalorder %v1864_v32, 0  ;;  %v1848_v63 = vsub.s32 %v2504_v1, %v4585_v55  ;;  %v1540_v50 = vadd.s32 304, %v4579_v59 }
 0x287   :  { %v2137_v57 = vsel %vm2089_vm0, 0.013333334, %v3637_v20  ;;  %vm1669_vm5 = vmand %vm1599_vm7, %vm1621_vm3  ;;  %vm2011_vm3 = vcmp.lt.s32.totalorder %v1864_v32, 75  ;;  %v1865_v42 = vsub.s32 %v2521_v26, %v4585_v55 }
 0x288   :  { %v2897_v14 = vpack.c.bf16 %v2137_v57, %v2136_v11  ;;  %vm1670_vm6 = vmand %vm1599_vm7, %vm1622_vm9  ;;  %v1541_v11 = vadd.s32 312, %v4579_v59  ;;  %v2537_v19 = vadd.s32 4294967167, %v1540_v50 }
 0x289   :  { %vm4828_vm13 = vmand %vm1669_vm5, %vm1717_vm4  ;;  %vm1637_vm4 = vcmp.ge.s32.totalorder %v1587_v48, 0 }
 0x28a   :  { %2898 = vmatpush3.bf16.msra.mxu1 %v2897_v14  ;;  %vm4832_vm14 = vmand %vm1670_vm6, %vm1718_vm10  ;;  %vm1638_vm10 = vcmp.ge.s32.totalorder %v1588_v62, 0  ;;  %v1589_v14 = vsub.s32 %v1540_v50, %v4583_v52  ;;  %v1590_v58 = vsub.s32 %v1541_v11, %v4583_v52  ;;  %v1881_v44 = vsub.s32 %v2537_v19, %v4585_v55 }
 0x28b   :  { %vm1962_vm1 = vmand %vm4600_vm8, %vm1914_vm12  ;;  %vm1733_vm12 = vcmp.lt.s32.totalorder %v1587_v48, 75  ;;  %v2538_v48 = vadd.s32 4294967167, %v1541_v11 }
 0x28c   :  { %vm1963_vm2 = vmand %vm4600_vm8, %vm1915_vm11 }
 0x28d   :  { %vm2058_vm9 = vmand %vm1962_vm1, %vm2010_vm15  ;;  %vm1734_vm15 = vcmp.lt.s32.totalorder %v1588_v62, 75  ;;  %vm1930_vm1 = vcmp.ge.s32.totalorder %v1879_v35, 0  ;;  %v1882_v62 = vsub.s32 %v2538_v48, %v4585_v55 }
 0x28e   :  { %vm2059_vm0 = vmand %vm1963_vm2, %vm2011_vm3 }
 0x28f   :  { %vm2106_vm5 = vmor %vm4828_vm13, %vm2058_vm9  ;;  %vm2026_vm9 = vcmp.lt.s32.totalorder %v1879_v35, 75  ;;  %v1508_v35 = vadd.s32 48, %v4579_v59 }
 0x290   :  { %vm2107_vm6 = vmor %vm4832_vm14, %vm2059_vm0  ;;  %v2154_v0 = vsel %vm2106_vm5, 0.013333334, %v3637_v20  ;;  %vm1931_vm14 = vcmp.ge.s32.totalorder %v1880_v60, 0 }
 0x291   :  { %v2155_v45 = vsel %vm2107_vm6, 0.013333334, %v3637_v20  ;;  %vm1685_vm11 = vmand %vm1599_vm7, %vm1637_vm4  ;;  %vm2027_vm4 = vcmp.lt.s32.totalorder %v1880_v60, 75  ;;  %v2505_v24 = vadd.s32 4294967167, %v1508_v35 }
 0x292   :  { %v2899_v46 = vpack.c.bf16 %v2155_v45, %v2154_v0  ;;  %vm1686_vm13 = vmand %vm1599_vm7, %vm1638_vm10  ;;  %v1509_v0 = vadd.s32 56, %v4579_v59 }
 0x293   :  { %vm4856_vm3 = vmand %vm1685_vm11, %vm1733_vm12  ;;  %vm1605_vm12 = vcmp.ge.s32.totalorder %v1555_v10, 0  ;;  %v1849_v13 = vsub.s32 %v2505_v24, %v4585_v55 }
 0x294   :  { %2900 = vmatprep.subr.bf16.mxu1 %v2899_v46  ;;  %vm4860_vm2 = vmand %vm1686_vm13, %vm1734_vm15  ;;  %vm1606_vm15 = vcmp.ge.s32.totalorder %v1556_v28, 0  ;;  %v1557_v46 = vsub.s32 %v1508_v35, %v4583_v52  ;;  %v1558_v56 = vsub.s32 %v1509_v0, %v4583_v52 }
 0x295   :  { %vm1978_vm0 = vmand %vm4600_vm8, %vm1930_vm1  ;;  %vm1701_vm1 = vcmp.lt.s32.totalorder %v1555_v10, 75  ;;  %v2506_v10 = vadd.s32 4294967167, %v1509_v0 }
 0x296   :  { %vm1979_vm5 = vmand %vm4600_vm8, %vm1931_vm14 }
 0x297   :  { %vm2074_vm10 = vmand %vm1978_vm0, %vm2026_vm9  ;;  %vm1702_vm9 = vcmp.lt.s32.totalorder %v1556_v28, 75  ;;  %vm1898_vm0 = vcmp.ge.s32.totalorder %v1847_v27, 0  ;;  %v1850_v28 = vsub.s32 %v2506_v10, %v4585_v55 }
 0x298   :  { %vm2075_vm6 = vmand %vm1979_vm5, %vm2027_vm4 }
 0x299   :  { %vm2122_vm11 = vmor %vm4856_vm3, %vm2074_vm10  ;;  %vm1994_vm10 = vcmp.lt.s32.totalorder %v1847_v27, 75  ;;  %v1526_v27 = vadd.s32 192, %v4579_v59 }
 0x29a   :  { %vm2123_vm13 = vmor %vm4860_vm2, %vm2075_vm6  ;;  %v2170_v40 = vsel %vm2122_vm11, 0.013333334, %v3637_v20  ;;  %vm1899_vm2 = vcmp.ge.s32.totalorder %v1848_v63, 0 }
 0x29b   :  { %v2171_v34 = vsel %vm2123_vm13, 0.013333334, %v3637_v20  ;;  %vm1653_vm14 = vmand %vm1599_vm7, %vm1605_vm12  ;;  %vm1995_vm12 = vcmp.lt.s32.totalorder %v1848_v63, 75  ;;  %v1575_v25 = vsub.s32 %v1526_v27, %v4583_v52  ;;  %v2523_v4 = vadd.s32 4294967167, %v1526_v27 }
 0x29c   :  { %v2930_v22 = vpack.c.bf16 %v2171_v34, %v2170_v40  ;;  %vm1654_vm3 = vmand %vm1599_vm7, %vm1606_vm15  ;;  %v1527_v40 = vadd.s32 200, %v4579_v59 }
 0x29d   :  { %vm4884_vm4 = vmand %vm1653_vm14, %vm1701_vm1  ;;  %vm1623_vm1 = vcmp.ge.s32.totalorder %v1573_v54, 0  ;;  %v1867_v50 = vsub.s32 %v2523_v4, %v4585_v55 }
 0x29e   :  { %2931 = vmatpush3.bf16.msra.mxu0 %v2930_v22  ;;  %vm4888_vm5 = vmand %vm1654_vm3, %vm1702_vm9  ;;  %vm1624_vm9 = vcmp.ge.s32.totalorder %v1574_v7, 0  ;;  %v2524_v26 = vadd.s32 4294967167, %v1527_v40 }
 0x29f   :  { %vm1946_vm6 = vmand %vm4600_vm8, %vm1898_vm0  ;;  %2932 = vmatprep.subr.bf16.mxu0 %v3635_v5  ;;  %vm1719_vm0 = vcmp.lt.s32.totalorder %v1573_v54, 75  ;;  %v1576_v54 = vsub.s32 %v1527_v40, %v4583_v52  ;;  %v1510_v40 = vadd.s32 64, %v4579_v59 }
 0x2a0   :  { %vm1947_vm11 = vmand %vm4600_vm8, %vm1899_vm2  ;;  %v1868_v57 = vsub.s32 %v2524_v26, %v4585_v55 }
 0x2a1   :  { %vm2042_vm15 = vmand %vm1946_vm6, %vm1994_vm10  ;;  %vm1720_vm10 = vcmp.lt.s32.totalorder %v1574_v7, 75  ;;  %vm1916_vm6 = vcmp.ge.s32.totalorder %v1865_v42, 0 }
 0x2a2   :  { %vm2043_vm13 = vmand %vm1947_vm11, %vm1995_vm12 }
 0x2a3   :  { %vm2090_vm14 = vmor %vm4884_vm4, %vm2042_vm15  ;;  %vm2012_vm15 = vcmp.lt.s32.totalorder %v1865_v42, 75 }
 0x2a4   :  { %vm2091_vm3 = vmor %vm4888_vm5, %vm2043_vm13  ;;  %v2138_v15 = vsel %vm2090_vm14, 0.013333334, %v3637_v20  ;;  %vm1917_vm5 = vcmp.ge.s32.totalorder %v1866_v38, 0 }
 0x2a5   :  { %v2139_v32 = vsel %vm2091_vm3, 0.013333334, %v3637_v20  ;;  %vm1671_vm2 = vmand %vm1599_vm7, %vm1623_vm1  ;;  %vm2013_vm1 = vcmp.lt.s32.totalorder %v1866_v38, 75 }
 0x2a6   :  { %v2901_v12 = vpack.c.bf16 %v2139_v32, %v2138_v15  ;;  %vm1672_vm4 = vmand %vm1599_vm7, %vm1624_vm9  ;;  %v1542_v32 = vadd.s32 320, %v4579_v59  ;;  %v1511_v15 = vadd.s32 72, %v4579_v59 }
 0x2a7   :  { %vm4913_vm12 = vmand %vm1671_vm2, %vm1719_vm0  ;;  %vm1639_vm0 = vcmp.ge.s32.totalorder %v1589_v14, 0 }
 0x2a8   :  { %2902 = vmatpush3.bf16.msra.mxu1 %v2901_v12  ;;  %vm4917_vm11 = vmand %vm1672_vm4, %vm1720_vm10  ;;  %vm1640_vm10 = vcmp.ge.s32.totalorder %v1590_v58, 0  ;;  %v1591_v0 = vsub.s32 %v1542_v32, %v4583_v52 }
 0x2a9   :  { %vm1964_vm13 = vmand %vm4600_vm8, %vm1916_vm6  ;;  %vm1735_vm6 = vcmp.lt.s32.totalorder %v1589_v14, 75 }
 0x2aa   :  { %vm1965_vm14 = vmand %vm4600_vm8, %vm1917_vm5 }
 0x2ab   :  { %vm2060_vm9 = vmand %vm1964_vm13, %vm2012_vm15  ;;  %vm1736_vm15 = vcmp.lt.s32.totalorder %v1590_v58, 75  ;;  %vm1932_vm13 = vcmp.ge.s32.totalorder %v1881_v44, 0  ;;  %v1543_v58 = vadd.s32 328, %v4579_v59 }
 0x2ac   :  { %vm2061_vm3 = vmand %vm1965_vm14, %vm2013_vm1 }
 0x2ad   :  { %vm2108_vm2 = vmor %vm4913_vm12, %vm2060_vm9  ;;  %vm2028_vm9 = vcmp.lt.s32.totalorder %v1881_v44, 75  ;;  %v2540_v10 = vadd.s32 4294967167, %v1543_v58 }
 0x2ae   :  { %vm2109_vm4 = vmor %vm4917_vm11, %vm2061_vm3  ;;  %v2156_v37 = vsel %vm2108_vm2, 0.013333334, %v3637_v20  ;;  %vm1933_vm11 = vcmp.ge.s32.totalorder %v1882_v62, 0 }
 0x2af   :  { %v2157_v60 = vsel %vm2109_vm4, 0.013333334, %v3637_v20  ;;  %vm1687_vm5 = vmand %vm1599_vm7, %vm1639_vm0  ;;  %vm2029_vm0 = vcmp.lt.s32.totalorder %v1882_v62, 75  ;;  %v1884_v4 = vsub.s32 %v2540_v10, %v4585_v55 }
 0x2b0   :  { %v2903_v21 = vpack.c.bf16 %v2157_v60, %v2156_v37  ;;  %vm1688_vm12 = vmand %vm1599_vm7, %vm1640_vm10 }
 0x2b1   :  { %vm4941_vm1 = vmand %vm1687_vm5, %vm1735_vm6  ;;  %vm1607_vm6 = vcmp.ge.s32.totalorder %v1557_v46, 0 }
 0x2b2   :  { %2904 = vmatprep.subr.bf16.mxu1 %v2903_v21  ;;  %vm4945_vm14 = vmand %vm1688_vm12, %vm1736_vm15  ;;  %vm1608_vm15 = vcmp.ge.s32.totalorder %v1558_v56, 0  ;;  %v2539_v21 = vadd.s32 4294967167, %v1542_v32 }
 0x2b3   :  { %vm1980_vm3 = vmand %vm4600_vm8, %vm1932_vm13  ;;  %vm1703_vm13 = vcmp.lt.s32.totalorder %v1557_v46, 75 }
 0x2b4   :  { %vm1981_vm2 = vmand %vm4600_vm8, %vm1933_vm11 }
 0x2b5   :  { %vm2076_vm10 = vmand %vm1980_vm3, %vm2028_vm9  ;;  %vm1704_vm9 = vcmp.lt.s32.totalorder %v1558_v56, 75  ;;  %vm1900_vm3 = vcmp.ge.s32.totalorder %v1849_v13, 0  ;;  %v1592_v56 = vsub.s32 %v1543_v58, %v4583_v52 }
 0x2b6   :  { %vm2077_vm4 = vmand %vm1981_vm2, %vm2029_vm0 }
 0x2b7   :  { %vm2124_vm5 = vmor %vm4941_vm1, %vm2076_vm10  ;;  %vm1996_vm10 = vcmp.lt.s32.totalorder %v1849_v13, 75 }
 0x2b8   :  { %vm2125_vm12 = vmor %vm4945_vm14, %vm2077_vm4  ;;  %v2172_v1 = vsel %vm2124_vm5, 0.013333334, %v3637_v20  ;;  %vm1901_vm14 = vcmp.ge.s32.totalorder %v1850_v28, 0 }
 0x2b9   :  { %v2173_v63 = vsel %vm2125_vm12, 0.013333334, %v3637_v20  ;;  %vm1655_vm11 = vmand %vm1599_vm7, %vm1607_vm6  ;;  %vm1997_vm6 = vcmp.lt.s32.totalorder %v1850_v28, 75  ;;  %vm5802_vm12 = vmmov 0  }
 0x2ba   :  { %v2933_v53 = vpack.c.bf16 %v2173_v63, %v2172_v1  ;;  %vm1656_vm1 = vmand %vm1599_vm7, %vm1608_vm15  ;;  %2704 = vmatprep.mubr.msk.f32.mxu0 %vm5802_vm12, %v3637_v20 }
 0x2bb   :  { %vm4969_vm0 = vmand %vm1655_vm11, %vm1703_vm13  ;;  %vm1625_vm11 = vcmp.ge.s32.totalorder %v1575_v25, 0 }
 0x2bc   :  { %2934 = vmatpush3.bf16.msra.mxu0 %v2933_v53  ;;  %vm4975_vm2 = vmand %vm1656_vm1, %vm1704_vm9  ;;  %vm1626_vm1 = vcmp.ge.s32.totalorder %v1576_v54, 0 }
 0x2bd   :  { %vm1948_vm4 = vmand %vm4600_vm8, %vm1900_vm3  ;;  %2935 = vmatprep.subr.bf16.mxu0 %v3635_v5 }
 0x2be   :  { %vm1949_vm5 = vmand %vm4600_vm8, %vm1901_vm14  ;;  %vm1721_vm14 = vcmp.lt.s32.totalorder %v1575_v25, 75  ;;  %v1883_v25 = vsub.s32 %v2539_v21, %v4585_v55 }
 0x2bf   :  { %vm4988_vm15 = vmand %vm1948_vm4, %vm1996_vm10  ;;  %vm1722_vm10 = vcmp.lt.s32.totalorder %v1576_v54, 75 }
 0x2c0   :  { %vm4994_vm13 = vmand %vm1949_vm5, %vm1997_vm6  ;;  %vm1919_vm5 = vcmp.ge.s32.totalorder %v1868_v57, 0 }
 0x2c1   :  { %vm2092_vm9 = vmor %vm4969_vm0, %vm4988_vm15 }
 0x2c2   :  { %vm2093_vm3 = vmor %vm4975_vm2, %vm4994_vm13  ;;  %v2140_v19 = vsel %vm2092_vm9, 0.013333334, %v3637_v20  ;;  %vm1918_vm2 = vcmp.ge.s32.totalorder %v1867_v50, 0  ;;  %vm2014_vm13 = vcmp.lt.s32.totalorder %v1867_v50, 75  ;;  %vm2015_vm9 = vcmp.lt.s32.totalorder %v1868_v57, 75 }
 0x2c3   :  { %v2141_v44 = vsel %vm2093_vm3, 0.013333334, %v3637_v20  ;;  %vm1673_vm0 = vmand %vm1599_vm7, %vm1625_vm11 }
 0x2c4   :  { %v2905_v37 = vpack.c.bf16 %v2141_v44, %v2140_v19  ;;  %vm1674_vm4 = vmand %vm1599_vm7, %vm1626_vm1  ;;  %v2507_v19 = vadd.s32 4294967167, %v1510_v40 }
 0x2c5   :  { %vm5025_vm6 = vmand %vm1673_vm0, %vm1721_vm14  ;;  %vm1641_vm0 = vcmp.ge.s32.totalorder %v1591_v0, 0 }
 0x2c6   :  { %2906 = vmatpush3.bf16.msra.mxu1 %v2905_v37  ;;  %vm5030_vm15 = vmand %vm1674_vm4, %vm1722_vm10  ;;  %vm1642_vm10 = vcmp.ge.s32.totalorder %v1592_v56, 0 }
 0x2c7   :  { %vm1966_vm11 = vmand %vm4600_vm8, %vm1918_vm2 }
 0x2c8   :  { %vm1967_vm1 = vmand %vm4600_vm8, %vm1919_vm5  ;;  %vm1737_vm5 = vcmp.lt.s32.totalorder %v1591_v0, 75 }
 0x2c9   :  { %vm5045_vm3 = vmand %vm1966_vm11, %vm2014_vm13  ;;  %vm1738_vm13 = vcmp.lt.s32.totalorder %v1592_v56, 75 }
 0x2ca   :  { %v1229_v7 = vpop.xlane.xlu0 %1228  ;;  %vm5050_vm14 = vmand %vm1967_vm1, %vm2015_vm9  ;;  %vm1935_vm9 = vcmp.ge.s32.totalorder %v1884_v4, 0 }
 0x2cb   :  { %v4986_v31 = vmul.f32 0.004761905, %v1229_v7  ;;  %vm2110_vm4 = vmor %vm5025_vm6, %vm5045_vm3 }
 0x2cc   :  { %v1269_v38 = vpop.xlane.xlu1 %1268  ;;  %vm2111_vm2 = vmor %vm5030_vm15, %vm5050_vm14  ;;  %vm1934_vm15 = vcmp.ge.s32.totalorder %v1883_v25, 0  ;;  %vm2030_vm14 = vcmp.lt.s32.totalorder %v1883_v25, 75 }
 0x2cd   :  { %v1303_v11 = vsub.f32 %v4704_v29, %v4986_v31  ;;  %v1286_v12 = vmul.f32 0.004761905, %v1269_v38  ;;  %v1291_v39 = vmul.f32 %v4986_v31, %v4986_v31  ;;  %v2158_v38 = vsel %vm2110_vm4, 0.013333334, %v3637_v20  ;;  %vm1689_vm11 = vmand %vm1599_vm7, %vm1641_vm0 }
 0x2ce   :  { %v1233_v14 = vpop.xlane.xlu0 %1232  ;;  %v2159_v32 = vsel %vm2111_vm2, 0.013333334, %v3637_v20  ;;  %vm1690_vm6 = vmand %vm1599_vm7, %vm1642_vm10  ;;  %v1301_v24 = vsub.f32 %v4507_v30, %v4986_v31  ;;  %vm2031_vm10 = vcmp.lt.s32.totalorder %v1884_v4, 75  ;;  %v1302_v10 = vsub.f32 %v4516_v41, %v4986_v31 }
 0x2cf   :  { %v5015_v48 = vmul.f32 0.004761905, %v1233_v14  ;;  %v1296_v62 = vsub.f32 %v1286_v12, %v1291_v39  ;;  %v5075_v12 = vsub.s32 %v1510_v40, %v4583_v52  ;;  %v2907_v14 = vpack.c.bf16 %v2159_v32, %v2158_v38  ;;  %vm5085_vm1 = vmand %vm1689_vm11, %vm1737_vm5 }
 0x2d0   :  { %vm5090_vm3 = vmand %vm1690_vm6, %vm1738_vm13  ;;  %v1851_v30 = vsub.s32 %v2507_v19, %v4585_v55  ;;  %v1529_v29 = vadd.s32 216, %v4579_v59 }
 0x2d1   :  { %v1306_v35 = vsub.f32 %v4725_v2, %v5015_v48  ;;  %v1316_v45 = vadd.f32 1e-05, %v1296_v62  ;;  %v1292_v28 = vmul.f32 %v5015_v48, %v5015_v48  ;;  %2908 = vmatprep.subr.bf16.mxu1 %v2907_v14  ;;  %vm1982_vm0 = vmand %vm4600_vm8, %vm1934_vm15  ;;  %vm1609_vm2 = vcmp.ge.s32.totalorder %v5075_v12, 0 }
 0x2d2   :  { %v1237_v51 = vpop.xlane.xlu1 %1236  ;;  %v1273_v46 = vpop.xlane.xlu0 %1272  ;;  %vm1983_vm4 = vmand %vm4600_vm8, %vm1935_vm9  ;;  %vm1705_vm5 = vcmp.lt.s32.totalorder %v5075_v12, 75  ;;  %v1304_v31 = vsub.f32 %v4525_v23, %v5015_v48 }
 0x2d3   :  { %v5035_v13 = vmul.f32 0.004761905, %v1237_v51  ;;  %v1287_v1 = vmul.f32 0.004761905, %v1273_v46  ;;  %3498 = vrsqrt.f32 %v1316_v45  ;;  %v1560_v45 = vsub.s32 %v1511_v15, %v4583_v52  ;;  %vm5112_vm13 = vmand %vm1982_vm0, %vm2030_vm14 }
 0x2d4   :  { %v2508_v51 = vadd.s32 4294967167, %v1511_v15  ;;  %v1528_v46 = vadd.s32 208, %v4579_v59  ;;  %vm5119_vm11 = vmand %vm1983_vm4, %vm2031_vm10  ;;  %vm1902_vm0 = vcmp.ge.s32.totalorder %v1851_v30, 0 }
 0x2d5   :  { %v1297_v27 = vsub.f32 %v1287_v1, %v1292_v28  ;;  %v1293_v7 = vmul.f32 %v5035_v13, %v5035_v13  ;;  %vm1610_vm6 = vcmp.ge.s32.totalorder %v1560_v45, 0  ;;  %vm1706_vm15 = vcmp.lt.s32.totalorder %v1560_v45, 75  ;;  %vm2126_vm9 = vmor %vm5085_vm1, %vm5112_vm13 }
 0x2d6   :  { %v1241_v53 = vpop.xlane.xlu1 %1240  ;;  %v1277_v34 = vpop.xlane.xlu0 %1276  ;;  %v1852_v22 = vsub.s32 %v2508_v51, %v4585_v55  ;;  %vm2127_vm14 = vmor %vm5090_vm3, %vm5119_vm11  ;;  %vm1998_vm13 = vcmp.lt.s32.totalorder %v1851_v30, 75 }
 0x2d7   :  { %v1317_v54 = vadd.f32 1e-05, %v1297_v27  ;;  %v5056_v26 = vmul.f32 0.004761905, %v1241_v53  ;;  %v1288_v42 = vmul.f32 0.004761905, %v1277_v34  ;;  %vm1657_vm1 = vmand %vm1599_vm7, %vm1609_vm2 }
 0x2d8   :  { %vm1658_vm3 = vmand %vm1599_vm7, %vm1610_vm6  ;;  %vm1903_vm4 = vcmp.ge.s32.totalorder %v1852_v22, 0  ;;  %vm1999_vm11 = vcmp.lt.s32.totalorder %v1852_v22, 75 }
 0x2d9   :  { %3500 = vrsqrt.f32 %v1317_v54  ;;  %v1298_v50 = vsub.f32 %v1288_v42, %v1293_v7  ;;  %v1294_v62 = vmul.f32 %v5056_v26, %v5056_v26  ;;  %v2174_v42 = vsel %vm2126_vm9, 0.013333334, %v3637_v20  ;;  %vm5164_vm10 = vmand %vm1657_vm1, %vm1705_vm5 }
 0x2da   :  { %v1245_v57 = vpop.xlane.xlu1 %1244  ;;  %v1281_v39 = vpop.xlane.xlu0 %1280  ;;  %vm5171_vm2 = vmand %vm1658_vm3, %vm1706_vm15 }
 0x2db   :  { %v1318_v58 = vadd.f32 1e-05, %v1298_v50  ;;  %v5080_v44 = vmul.f32 0.004761905, %v1245_v57  ;;  %v1289_v37 = vmul.f32 0.004761905, %v1281_v39  ;;  %vm1950_vm5 = vmand %vm4600_vm8, %vm1902_vm0 }
 0x2dc   :  { %v2175_v50 = vsel %vm2127_vm14, 0.013333334, %v3637_v20  ;;  %vm1951_vm6 = vmand %vm4600_vm8, %vm1903_vm4 }
 0x2dd   :  { %3502 = vrsqrt.f32 %v1318_v58  ;;  %v1299_v0 = vsub.f32 %v1289_v37, %v1294_v62  ;;  %v3499_v56 = vpop.eup %3498  ;;  %v1295_v27 = vmul.f32 %v5080_v44, %v5080_v44  ;;  %v2936_v57 = vpack.c.bf16 %v2175_v50, %v2174_v42  ;;  %vm2046_vm15 = vmand %vm1950_vm5, %vm1998_vm13 }
 0x2de   :  { %v1285_v28 = vpop.xlane.xlu0 %1284  ;;  %v1326_v40 = vmul.f32 %v3499_v56, %v1301_v24  ;;  %v1328_v53 = vmul.f32 %v3499_v56, %v1303_v11  ;;  %v1327_v54 = vmul.f32 %v3499_v56, %v1302_v10  ;;  %v1305_v11 = vsub.f32 %v4528_v61, %v5015_v48  ;;  %vm5194_vm9 = vmand %vm1951_vm6, %vm1999_vm11 }
 0x2df   :  { %v1319_v1 = vadd.f32 1e-05, %v1299_v0  ;;  %v1290_v63 = vmul.f32 0.004761905, %v1285_v28  ;;  %2937 = vmatpush3.bf16.msra.mxu0 %v2936_v57  ;;  %v1577_v48 = vsub.s32 %v1528_v46, %v4583_v52  ;;  %v1578_v58 = vsub.s32 %v1529_v29, %v4583_v52  ;;  %vm2094_vm1 = vmor %vm5164_vm10, %vm2046_vm15 }
 0x2e0   :  { %v5125_v25 = vmul.f32 %v4973_v43, %v1326_v40  ;;  %v5137_v7 = vmul.f32 %v4973_v43, %v1328_v53  ;;  %v1362_v39 = vmul.f32 %v4973_v43, %v1327_v54  ;;  %2938 = vmatprep.subr.bf16.mxu0 %v3635_v5  ;;  %v2526_v62 = vadd.s32 4294967167, %v1529_v29  ;;  %vm2095_vm3 = vmor %vm5171_vm2, %vm5194_vm9 }
 0x2e1   :  { %v1300_v4 = vsub.f32 %v1290_v63, %v1295_v27  ;;  %3504 = vrsqrt.f32 %v1319_v1  ;;  %v1309_v37 = vsub.f32 %v4740_v36, %v5035_v13  ;;  %vm1627_vm14 = vcmp.ge.s32.totalorder %v1577_v48, 0  ;;  %v5300_v63 = vpop.permute.xlu1 %1346 }
 0x2e2   :  { %vm1628_vm0 = vcmp.ge.s32.totalorder %v1578_v58, 0  ;;  %v1870_v36 = vsub.s32 %v2526_v62, %v4585_v55  ;;  %vm1723_vm4 = vcmp.lt.s32.totalorder %v1577_v48, 75  ;;  %v2142_v0 = vsel %vm2094_vm1, 0.013333334, %v3637_v20  ;;  %vm1675_vm13 = vmand %vm1599_vm7, %vm1627_vm14 }
 0x2e3   :  { %v3501_v38 = vpop.eup %3500  ;;  %v1320_v15 = vadd.f32 1e-05, %v1300_v4  ;;  %vm1724_vm5 = vcmp.lt.s32.totalorder %v1578_v58, 75  ;;  %v1545_v56 = vadd.s32 344, %v4579_v59  ;;  %v2143_v10 = vsel %vm2095_vm3, 0.013333334, %v3637_v20  ;;  %vm1676_vm10 = vmand %vm1599_vm7, %vm1628_vm0 }
 0x2e4   :  { %v5149_v23 = vmul.f32 %v3501_v38, %v1304_v31  ;;  %v5151_v61 = vmul.f32 %v3501_v38, %v1305_v11  ;;  %v5156_v32 = vmul.f32 %v3501_v38, %v1306_v35  ;;  %v2525_v35 = vadd.s32 4294967167, %v1528_v46  ;;  %vm5221_vm2 = vmand %vm1675_vm13, %vm1723_vm4 }
 0x2e5   :  { %3506 = vrsqrt.f32 %v1320_v15  ;;  %v1544_v46 = vadd.s32 336, %v4579_v59  ;;  %v1312_v28 = vsub.f32 %v4757_v9, %v5056_v26  ;;  %v2909_v27 = vpack.c.bf16 %v2143_v10, %v2142_v0  ;;  %vm5227_vm15 = vmand %vm1676_vm10, %vm1724_vm5 }
 0x2e6   :  { %v5168_v19 = vpop.permute.xlu0 %1377  ;;  %v1869_v45 = vsub.s32 %v2525_v35, %v4585_v55  ;;  %vm1921_vm6 = vcmp.ge.s32.totalorder %v1870_v36, 0  ;;  %v1315_v40 = vsub.f32 %v4781_v33, %v5080_v44  ;;  %vm2017_vm1 = vcmp.lt.s32.totalorder %v1870_v36, 75 }
 0x2e7   :  { %v5176_v43 = vpop.eup %3502  ;;  %v5179_v12 = vadd.f32 %v5168_v19, %v1362_v39  ;;  %v1593_v53 = vsub.s32 %v1544_v46, %v4583_v52  ;;  %v2541_v9 = vadd.s32 4294967167, %v1544_v46  ;;  %2910 = vmatpush3.bf16.msra.mxu1 %v2909_v27  ;;  %v1594_v22 = vsub.s32 %v1545_v56, %v4583_v52  ;;  %vm1969_vm0 = vmand %vm4600_vm8, %vm1921_vm6 }
 0x2e8   :  { %v5192_v60 = vmul.f32 %v5176_v43, %v1309_v37  ;;  %vm1920_vm11 = vcmp.ge.s32.totalorder %v1869_v45, 0  ;;  %vm2016_vm9 = vcmp.lt.s32.totalorder %v1869_v45, 75  ;;  %v2542_v4 = vadd.s32 4294967167, %v1545_v56  ;;  %vm2065_vm4 = vmand %vm1969_vm0, %vm2017_vm1 }
 0x2e9   :  { %v1427_v51 = vmin.f32 %v5179_v12, 0.0  ;;  %vm1968_vm14 = vmand %vm4600_vm8, %vm1920_vm11  ;;  %vm1643_vm13 = vcmp.ge.s32.totalorder %v1593_v53, 0  ;;  %v1885_v54 = vsub.s32 %v2541_v9, %v4585_v55  ;;  %vm1644_vm10 = vcmp.ge.s32.totalorder %v1594_v22, 0 }
 0x2ea   :  { %vm2064_vm3 = vmand %vm1968_vm14, %vm2016_vm9  ;;  %v1886_v29 = vsub.s32 %v2542_v4, %v4585_v55  ;;  %vm1739_vm12 = vcmp.lt.s32.totalorder %v1593_v53, 75  ;;  %v1512_v11 = vadd.s32 80, %v4579_v59  ;;  %vm1740_vm9 = vcmp.lt.s32.totalorder %v1594_v22, 75 }
 0x2eb   :  { %v5208_v24 = vpop.eup %3504  ;;  %v1443_v1 = vmul.f32 1.442695, %v1427_v51  ;;  %vm2112_vm5 = vmor %vm5221_vm2, %vm2064_vm3  ;;  %v1513_v38 = vadd.s32 88, %v4579_v59  ;;  %vm1936_vm14 = vcmp.ge.s32.totalorder %v1885_v54, 0  ;;  %vm2032_vm3 = vcmp.lt.s32.totalorder %v1885_v54, 75  ;;  %v5316_v54 = vpop.permute.xlu1 %1381 }
 0x2ec   :  { %v5233_v34 = vmul.f32 %v5208_v24, %v1312_v28  ;;  %vm2113_vm11 = vmor %vm5227_vm15, %vm2065_vm4  ;;  %v2160_v31 = vsel %vm2112_vm5, 0.013333334, %v3637_v20  ;;  %vm1937_vm15 = vcmp.ge.s32.totalorder %v1886_v29, 0  ;;  %v1561_v39 = vsub.s32 %v1512_v11, %v4583_v52 }
 0x2ed   :  { %3508 = vpow2.f32 %v1443_v1  ;;  %v2161_v42 = vsel %vm2113_vm11, 0.013333334, %v3637_v20  ;;  %vm1691_vm6 = vmand %vm1599_vm7, %vm1643_vm13  ;;  %v2509_v14 = vadd.s32 4294967167, %v1512_v11  ;;  %vm2033_vm13 = vcmp.lt.s32.totalorder %v1886_v29, 75 }
 0x2ee   :  { %v2911_v15 = vpack.c.bf16 %v2161_v42, %v2160_v31  ;;  %vm1692_vm2 = vmand %vm1599_vm7, %vm1644_vm10  ;;  %v1562_v2 = vsub.s32 %v1513_v38, %v4583_v52  ;;  %v2510_v48 = vadd.s32 4294967167, %v1513_v38  ;;  %vm1611_vm11 = vcmp.ge.s32.totalorder %v1561_v39, 0 }
 0x2ef   :  { %v5219_v30 = vpop.eup %3506  ;;  %vm5257_vm1 = vmand %vm1691_vm6, %vm1739_vm12  ;;  %v1853_v58 = vsub.s32 %v2509_v14, %v4585_v55  ;;  %v1530_v45 = vadd.s32 224, %v4579_v59  ;;  %v1531_v46 = vadd.s32 232, %v4579_v59  ;;  %v1546_v9 = vadd.s32 352, %v4579_v59  ;;  %v5334_v57 = vpop.permute.xlu1 %1350 }
 0x2f0   :  { %v5239_v33 = vmul.f32 %v5219_v30, %v1315_v40  ;;  %2912 = vmatprep.subr.bf16.mxu1 %v2911_v15  ;;  %vm5261_vm0 = vmand %vm1692_vm2, %vm1740_vm9  ;;  %vm1612_vm9 = vcmp.ge.s32.totalorder %v1562_v2, 0  ;;  %v1854_v37 = vsub.s32 %v2510_v48, %v4585_v55  ;;  %vm1412_vm2 = vcmp.gt.f32.partialorder %v5179_v12, 0.0 }
 0x2f1   :  { %vm1984_vm4 = vmand %vm4600_vm8, %vm1936_vm14  ;;  %v1579_v10 = vsub.s32 %v1530_v45, %v4583_v52  ;;  %v2527_v28 = vadd.s32 4294967167, %v1530_v45  ;;  %v1580_v1 = vsub.s32 %v1531_v46, %v4583_v52  ;;  %v2528_v27 = vadd.s32 4294967167, %v1531_v46 }
 0x2f2   :  { %vm1985_vm12 = vmand %vm4600_vm8, %vm1937_vm15  ;;  %vm1707_vm15 = vcmp.lt.s32.totalorder %v1561_v39, 75  ;;  %v1547_v4 = vadd.s32 360, %v4579_v59  ;;  %v1595_v42 = vsub.s32 %v1546_v9, %v4583_v52  ;;  %v2543_v38 = vadd.s32 4294967167, %v1546_v9 }
 0x2f3   :  { %vm2080_vm5 = vmand %vm1984_vm4, %vm2032_vm3  ;;  %vm1708_vm3 = vcmp.lt.s32.totalorder %v1562_v2, 75  ;;  %vm1904_vm4 = vcmp.ge.s32.totalorder %v1853_v58, 0  ;;  %v1871_v40 = vsub.s32 %v2527_v28, %v4585_v55  ;;  %v1872_v41 = vsub.s32 %v2528_v27, %v4585_v55 }
 0x2f4   :  { %vm2081_vm10 = vmand %vm1985_vm12, %vm2033_vm13  ;;  %vm1905_vm12 = vcmp.ge.s32.totalorder %v1854_v37, 0  ;;  %v1596_v15 = vsub.s32 %v1547_v4, %v4583_v52  ;;  %v2544_v50 = vadd.s32 4294967167, %v1547_v4  ;;  %v1887_v39 = vsub.s32 %v2543_v38, %v4585_v55 }
 0x2f5   :  { %vm2128_vm6 = vmor %vm5257_vm1, %vm2080_vm5  ;;  %v1514_v48 = vadd.s32 96, %v4579_v59  ;;  %v1532_v56 = vadd.s32 240, %v4579_v59  ;;  %v1549_v11 = vadd.s32 376, %v4579_v59  ;;  %v1308_v45 = vsub.f32 %v4542_v6, %v5035_v13 }
 0x2f6   :  { %vm2129_vm14 = vmor %vm5261_vm0, %vm2081_vm10  ;;  %v2176_v21 = vsel %vm2128_vm6, 0.013333334, %v3637_v20  ;;  %vm2000_vm10 = vcmp.lt.s32.totalorder %v1853_v58, 75  ;;  %vm2001_vm6 = vcmp.lt.s32.totalorder %v1854_v37, 75  ;;  %v1888_v14 = vsub.s32 %v2544_v50, %v4585_v55 }
 0x2f7   :  { %v3509_v35 = vpop.eup %3508  ;;  %v2177_v36 = vsel %vm2129_vm14, 0.013333334, %v3637_v20  ;;  %vm1659_vm1 = vmand %vm1599_vm7, %vm1611_vm11  ;;  %v1515_v58 = vadd.s32 104, %v4579_v59  ;;  %v1581_v9 = vsub.s32 %v1532_v56, %v4583_v52  ;;  %v5402_v50 = vadd.f32 %v5168_v19, %v5137_v7 }
 0x2f8   :  { %v2485_v62 = vadd.f32 -1.0, %v3509_v35  ;;  %v2939_v0 = vpack.c.bf16 %v2177_v36, %v2176_v21  ;;  %vm1660_vm0 = vmand %vm1599_vm7, %vm1612_vm9  ;;  %v5354_v21 = vpop.permute.xlu1 %1385  ;;  %v2511_v36 = vadd.s32 4294967167, %v1514_v48  ;;  %v1366_v7 = vmul.f32 %v5300_v63, %v5156_v32 }
 0x2f9   :  { %vm5287_vm13 = vmand %vm1659_vm1, %vm1707_vm15  ;;  %vm1629_vm15 = vcmp.ge.s32.totalorder %v1579_v10, 0  ;;  %v1564_v46 = vsub.s32 %v1515_v58, %v4583_v52  ;;  %v1428_v32 = vmin.f32 %v5402_v50, 0.0  ;;  %v1517_v37 = vadd.s32 120, %v4579_v59 }
 0x2fa   :  { %v1487_v51 = vsel %vm1412_vm2, %v5179_v12, %v2485_v62  ;;  %2940 = vmatpush3.bf16.msra.mxu0 %v2939_v0  ;;  %vm5291_vm5 = vmand %vm1660_vm0, %vm1708_vm3  ;;  %vm1630_vm3 = vcmp.ge.s32.totalorder %v1580_v1, 0  ;;  %v2512_v0 = vadd.s32 4294967167, %v1515_v58  ;;  %v1533_v12 = vadd.s32 248, %v4579_v59 }
 0x2fb   :  { %2246 = vmatprep.mubr.f32.mxu1 %v1487_v51  ;;  %vm1952_vm11 = vmand %vm4600_vm8, %vm1904_vm4  ;;  %2941 = vmatprep.subr.bf16.mxu0 %v3635_v5  ;;  %vm1725_vm4 = vcmp.lt.s32.totalorder %v1579_v10, 75  ;;  %v1563_v51 = vsub.s32 %v1514_v48, %v4583_v52  ;;  %v1855_v10 = vsub.s32 %v2511_v36, %v4585_v55 }
 0x2fc   :  { %vm1953_vm9 = vmand %vm4600_vm8, %vm1905_vm12  ;;  %v1856_v28 = vsub.s32 %v2512_v0, %v4585_v55  ;;  %v1582_v4 = vsub.s32 %v1533_v12, %v4583_v52 }
 0x2fd   :  { %vm2048_vm2 = vmand %vm1952_vm11, %vm2000_vm10  ;;  %vm1726_vm10 = vcmp.lt.s32.totalorder %v1580_v1, 75  ;;  %v5372_v1 = vpop.permute.xlu1 %1354 }
 0x2fe   :  { %vm2049_vm14 = vmand %vm1953_vm9, %vm2001_vm6  ;;  %vm1923_vm6 = vcmp.ge.s32.totalorder %v1872_v41, 0 }
 0x2ff   :  { %vm2096_vm1 = vmor %vm5287_vm13, %vm2048_vm2  ;;  %vm2018_vm2 = vcmp.lt.s32.totalorder %v1871_v40, 75 }
 0x300   :  { %vm2097_vm0 = vmor %vm5291_vm5, %vm2049_vm14  ;;  %v2144_v53 = vsel %vm2096_vm1, 0.013333334, %v3637_v20  ;;  %vm1922_vm5 = vcmp.ge.s32.totalorder %v1871_v40, 0  ;;  %v2529_v40 = vadd.s32 4294967167, %v1532_v56  ;;  %v1365_v56 = vmul.f32 %v5300_v63, %v5151_v61 }
 0x301   :  { %v2145_v22 = vsel %vm2097_vm0, 0.013333334, %v3637_v20  ;;  %vm1677_vm12 = vmand %vm1599_vm7, %vm1629_vm15  ;;  %vm2019_vm15 = vcmp.lt.s32.totalorder %v1872_v41, 75  ;;  %v2530_v41 = vadd.s32 4294967167, %v1533_v12  ;;  %v1333_v12 = vmul.f32 %v5176_v43, %v1308_v45 }
 0x302   :  { %v2913_v29 = vpack.c.bf16 %v2145_v22, %v2144_v53  ;;  %vm1678_vm13 = vmand %vm1599_vm7, %vm1630_vm3  ;;  %v5395_v38 = vsub.s32 %v2529_v40, %v4585_v55 }
 0x303   :  { %vm5320_vm11 = vmand %vm1677_vm12, %vm1725_vm4  ;;  %vm1645_vm4 = vcmp.ge.s32.totalorder %v1595_v42, 0 }
 0x304   :  { %2914 = vmatpush3.bf16.msra.mxu1 %v2913_v29  ;;  %vm5324_vm9 = vmand %vm1678_vm13, %vm1726_vm10  ;;  %vm1646_vm10 = vcmp.ge.s32.totalorder %v1596_v15, 0  ;;  %v1548_v29 = vadd.s32 368, %v4579_v59 }
 0x305   :  { %vm1970_vm14 = vmand %vm4600_vm8, %vm1922_vm5  ;;  %vm1741_vm5 = vcmp.lt.s32.totalorder %v1595_v42, 75  ;;  %v1310_v42 = vsub.f32 %v4553_v17, %v5056_v26 }
 0x306   :  { %vm1971_vm1 = vmand %vm4600_vm8, %vm1923_vm6 }
 0x307   :  { %vm2066_vm3 = vmand %vm1970_vm14, %vm2018_vm2  ;;  %vm1742_vm2 = vcmp.lt.s32.totalorder %v1596_v15, 75  ;;  %vm1938_vm14 = vcmp.ge.s32.totalorder %v1887_v39, 0  ;;  %v5398_v15 = vsub.s32 %v2530_v41, %v4585_v55  ;;  %v5482_v41 = vadd.f32 %v5168_v19, %v5125_v25 }
 0x308   :  { %vm2067_vm0 = vmand %vm1971_vm1, %vm2019_vm15 }
 0x309   :  { %vm2114_vm12 = vmor %vm5320_vm11, %vm2066_vm3  ;;  %vm2034_vm3 = vcmp.lt.s32.totalorder %v1887_v39, 75  ;;  %v5409_v39 = vpop.permute.xlu1 %1389 }
 0x30a   :  { %vm2115_vm13 = vmor %vm5324_vm9, %vm2067_vm0  ;;  %v2162_v2 = vsel %vm2114_vm12, 0.013333334, %v3637_v20  ;;  %vm1939_vm9 = vcmp.ge.s32.totalorder %v1888_v14, 0 }
 0x30b   :  { %v2163_v35 = vsel %vm2115_vm13, 0.013333334, %v3637_v20  ;;  %vm1693_vm6 = vmand %vm1599_vm7, %vm1645_vm4  ;;  %vm2035_vm4 = vcmp.lt.s32.totalorder %v1888_v14, 75  ;;  %v5412_v14 = vsub.s32 %v1548_v29, %v4583_v52 }
 0x30c   :  { %v2915_v62 = vpack.c.bf16 %v2163_v35, %v2162_v2  ;;  %vm1694_vm11 = vmand %vm1599_vm7, %vm1646_vm10  ;;  %v2545_v2 = vadd.s32 4294967167, %v1548_v29  ;;  %v2546_v35 = vadd.s32 4294967167, %v1549_v11  ;;  %v1364_v29 = vmul.f32 %v5300_v63, %v5149_v23 }
 0x30d   :  { %vm5350_vm15 = vmand %vm1693_vm6, %vm1741_vm5  ;;  %vm1613_vm5 = vcmp.ge.s32.totalorder %v1563_v51, 0  ;;  %v2514_v23 = vadd.s32 4294967167, %v1517_v37 }
 0x30e   :  { %2916 = vmatprep.subr.bf16.mxu1 %v2915_v62  ;;  %vm5356_vm1 = vmand %vm1694_vm11, %vm1742_vm2  ;;  %vm1614_vm2 = vcmp.ge.s32.totalorder %v1564_v46, 0  ;;  %v1516_v62 = vadd.s32 112, %v4579_v59  ;;  %v5447_v36 = vsub.s32 %v2545_v2, %v4585_v55  ;;  %v1369_v59 = vmul.f32 %v5334_v57, %v5192_v60  ;;  %v5469_v60 = vpop.permute.xlu1 %1358 }
 0x30f   :  { %vm1986_vm0 = vmand %vm4600_vm8, %vm1938_vm14  ;;  %vm1709_vm14 = vcmp.lt.s32.totalorder %v1563_v51, 75  ;;  %v5460_v0 = vsub.s32 %v2546_v35, %v4585_v55  ;;  %v1313_v2 = vsub.f32 %v4567_v18, %v5080_v44  ;;  %v5547_v48 = vadd.f32 %v5316_v54, %v1364_v29 }
 0x310   :  { %vm1987_vm12 = vmand %vm4600_vm8, %vm1939_vm9  ;;  %v5478_v61 = vsub.s32 %v1516_v62, %v4583_v52  ;;  %v2513_v40 = vadd.s32 4294967167, %v1516_v62  ;;  %v5499_v19 = vadd.f32 %v5354_v21, %v1369_v59 }
 0x311   :  { %vm2082_vm10 = vmand %vm1986_vm0, %vm2034_vm3  ;;  %vm1710_vm3 = vcmp.lt.s32.totalorder %v1564_v46, 75  ;;  %vm1906_vm0 = vcmp.ge.s32.totalorder %v1855_v10, 0  ;;  %v5450_v46 = vadd.f32 %v5316_v54, %v1366_v7  ;;  %v1429_v59 = vmin.f32 %v5547_v48, 0.0 }
 0x312   :  { %vm2083_vm13 = vmand %vm1987_vm12, %vm2035_vm4  ;;  %vm1907_vm4 = vcmp.ge.s32.totalorder %v1856_v28, 0  ;;  %v5529_v31 = vsub.s32 %v2513_v40, %v4585_v55  ;;  %v5544_v7 = vpop.permute.xlu1 %1393  ;;  %v1434_v17 = vmin.f32 %v5499_v19, 0.0 }
 0x313   :  { %vm2130_vm6 = vmor %vm5350_vm15, %vm2082_vm10  ;;  %vm2002_vm10 = vcmp.lt.s32.totalorder %v1855_v10, 75  ;;  %v1431_v25 = vmin.f32 %v5450_v46, 0.0 }
 0x314   :  { %vm2131_vm11 = vmor %vm5356_vm1, %vm2083_vm13  ;;  %v2178_v27 = vsel %vm2130_vm6, 0.013333334, %v3637_v20 }
 0x315   :  { %v2179_v53 = vsel %vm2131_vm11, 0.013333334, %v3637_v20  ;;  %vm1661_vm9 = vmand %vm1599_vm7, %vm1613_vm5  ;;  %vm2003_vm5 = vcmp.lt.s32.totalorder %v1856_v28, 75  ;;  %vm2020_vm11 = vcmp.lt.s32.totalorder %v5395_v38, 75  ;;  %v1445_v28 = vmul.f32 1.442695, %v1428_v32 }
 0x316   :  { %v2942_v22 = vpack.c.bf16 %v2179_v53, %v2178_v27  ;;  %vm1662_vm15 = vmand %vm1599_vm7, %vm1614_vm2  ;;  %vm1631_vm2 = vcmp.ge.s32.totalorder %v1581_v9, 0  ;;  %v1307_v53 = vsub.f32 %v4539_v16, %v5035_v13  ;;  %v1372_v16 = vmul.f32 %v5372_v1, %v5233_v34 }
 0x317   :  { %vm5385_vm1 = vmand %vm1661_vm9, %vm1709_vm14  ;;  %vm1727_vm9 = vcmp.lt.s32.totalorder %v1581_v9, 75  ;;  %v1368_v13 = vmul.f32 %v5334_v57, %v1333_v12  ;;  %3510 = vpow2.f32 %v1445_v28  ;;  %v1451_v35 = vmul.f32 1.442695, %v1431_v25 }
 0x318   :  { %2943 = vmatpush3.bf16.msra.mxu0 %v2942_v22  ;;  %vm5390_vm12 = vmand %vm1662_vm15, %vm1710_vm3  ;;  %vm1728_vm15 = vcmp.lt.s32.totalorder %v1582_v4, 75  ;;  %v5493_v22 = vsub.s32 %v1517_v37, %v4583_v52  ;;  %v1332_v34 = vmul.f32 %v5176_v43, %v1307_v53  ;;  %v5519_v63 = vadd.f32 %v5409_v39, %v1372_v16 }
 0x319   :  { %vm1954_vm13 = vmand %vm4600_vm8, %vm1906_vm0  ;;  %2944 = vmatprep.subr.bf16.mxu0 %v3635_v5  ;;  %v5421_v5 = vsub.s32 %v1549_v11, %v4583_v52  ;;  %vm1924_vm0 = vcmp.ge.s32.totalorder %v5395_v38, 0  ;;  %v5509_v52 = vadd.f32 %v5316_v54, %v1365_v56  ;;  %v1426_v11 = vmin.f32 %v5482_v41, 0.0 }
 0x31a   :  { %vm1955_vm6 = vmand %vm4600_vm8, %vm1907_vm4  ;;  %vm1925_vm4 = vcmp.ge.s32.totalorder %v5398_v15, 0  ;;  %v1311_v43 = vsub.f32 %v4556_v49, %v5056_v26  ;;  %v1375_v49 = vmul.f32 %v5469_v60, %v5239_v33  ;;  %v5558_v18 = vadd.f32 %v5354_v21, %v1368_v13 }
 0x31b   :  { %vm5416_vm14 = vmand %vm1954_vm13, %vm2002_vm10  ;;  %vm2021_vm13 = vcmp.lt.s32.totalorder %v5398_v15, 75  ;;  %v1430_v26 = vmin.f32 %v5509_v52, 0.0  ;;  %v1367_v58 = vmul.f32 %v5334_v57, %v1332_v34  ;;  %v1437_v33 = vmin.f32 %v5519_v63, 0.0 }
 0x31c   :  { %vm5423_vm3 = vmand %vm1955_vm6, %vm2003_vm5  ;;  %vm1647_vm6 = vcmp.ge.s32.totalorder %v5412_v14, 0  ;;  %v1336_v15 = vmul.f32 %v5208_v24, %v1311_v43  ;;  %v5576_v62 = vadd.f32 %v5544_v7, %v1375_v49  ;;  %v1441_v37 = vmul.f32 1.442695, %v1426_v11 }
 0x31d   :  { %vm2098_vm10 = vmor %vm5385_vm1, %vm5416_vm14  ;;  %vm5984_vm14 = vcmp.ge.s32.totalorder %v1582_v4, 0  ;;  %v1314_v57 = vsub.f32 %v4570_v47, %v5080_v44  ;;  %v1335_v56 = vmul.f32 %v5208_v24, %v1310_v42  ;;  %3512 = vpow2.f32 %v1451_v35 }
 0x31e   :  { %vm2099_vm5 = vmor %vm5390_vm12, %vm5423_vm3  ;;  %v2146_v51 = vsel %vm2098_vm10, 0.013333334, %v3637_v20  ;;  %vm1648_vm12 = vcmp.ge.s32.totalorder %v5421_v5, 0  ;;  %vm1743_vm10 = vcmp.lt.s32.totalorder %v5412_v14, 75  ;;  %v1371_v45 = vmul.f32 %v5372_v1, %v1336_v15 }
 0x31f   :  { %v2147_v6 = vsel %vm2099_vm5, 0.013333334, %v3637_v20  ;;  %vm1679_vm1 = vmand %vm1599_vm7, %vm1631_vm2  ;;  %vm1744_vm5 = vcmp.lt.s32.totalorder %v5421_v5, 75  ;;  %v1433_v28 = vmin.f32 %v5558_v18, 0.0  ;;  %v1339_v44 = vmul.f32 %v5219_v30, %v1314_v57 }
 0x320   :  { %v2917_v10 = vpack.c.bf16 %v2147_v6, %v2146_v51  ;;  %vm1680_vm3 = vmand %vm1599_vm7, %vm5984_vm14  ;;  %v1457_v6 = vmul.f32 1.442695, %v1434_v17  ;;  %v5595_v27 = vadd.f32 %v5409_v39, %v1371_v45  ;;  %v5605_v24 = vadd.f32 %v5354_v21, %v1367_v58 }
 0x321   :  { %vm5472_vm2 = vmand %vm1679_vm1, %vm1727_vm9  ;;  %vm2036_vm9 = vcmp.lt.s32.totalorder %v5447_v36, 75  ;;  %vm2037_vm1 = vcmp.lt.s32.totalorder %v5460_v0, 75  ;;  %v1370_v14 = vmul.f32 %v5372_v1, %v1335_v56  ;;  %v1463_v40 = vmul.f32 1.442695, %v1437_v33  ;;  %v3511_v5 = vpop.eup %3510 }
 0x322   :  { %2918 = vmatpush3.bf16.msra.mxu1 %v2917_v10  ;;  %vm5487_vm14 = vmand %vm1680_vm3, %vm1728_vm15  ;;  %v1449_v10 = vmul.f32 1.442695, %v1430_v26  ;;  %v1440_v53 = vmin.f32 %v5576_v62, 0.0  ;;  %3514 = vpow2.f32 %v1441_v37  ;;  %v1858_v21 = vsub.s32 %v2514_v23, %v4585_v55 }
 0x323   :  { %vm1972_vm15 = vmand %vm4600_vm8, %vm1924_vm0  ;;  %v1374_v1 = vmul.f32 %v5469_v60, %v1339_v44  ;;  %v1447_v9 = vmul.f32 1.442695, %v1429_v59  ;;  %v5621_v29 = vadd.f32 %v5409_v39, %v1370_v14  ;;  %v1338_v25 = vmul.f32 %v5219_v30, %v1313_v2 }
 0x324   :  { %vm1973_vm3 = vmand %vm4600_vm8, %vm1925_vm4  ;;  %3516 = vpow2.f32 %v1457_v6  ;;  %v1455_v16 = vmul.f32 1.442695, %v1433_v28  ;;  %v1436_v13 = vmin.f32 %v5595_v27, 0.0  ;;  %v1432_v23 = vmin.f32 %v5605_v24, 0.0 }
 0x325   :  { %vm5523_vm0 = vmand %vm1972_vm15, %vm2020_vm11  ;;  %vm1615_vm15 = vcmp.ge.s32.totalorder %v5478_v61, 0  ;;  %3518 = vpow2.f32 %v1449_v10  ;;  %v5630_v55 = vadd.f32 %v5544_v7, %v1374_v1  ;;  %v1373_v39 = vmul.f32 %v5469_v60, %v1338_v25 }
 0x326   :  { %vm5538_vm4 = vmand %vm1973_vm3, %vm2021_vm13  ;;  %vm1616_vm3 = vcmp.ge.s32.totalorder %v5493_v22, 0  ;;  %3520 = vpow2.f32 %v1463_v40  ;;  %v1435_v34 = vmin.f32 %v5621_v29, 0.0  ;;  %v1461_v11 = vmul.f32 1.442695, %v1436_v13 }
 0x327   :  { %vm2116_vm11 = vmor %vm5472_vm2, %vm5523_vm0  ;;  %v5648_v60 = vadd.f32 %v5544_v7, %v1373_v39  ;;  %3522 = vpow2.f32 %v1447_v9  ;;  %v1439_v43 = vmin.f32 %v5630_v55, 0.0  ;;  %v3513_v38 = vpop.eup %3512  ;;  %v1453_v2 = vmul.f32 1.442695, %v1432_v23  ;;  %v3540_v23 = vld [vmem:[%s5745_s2] sm:$0xff] }
 0x328   :  { %vm2117_vm13 = vmor %vm5487_vm14, %vm5538_vm4  ;;  %v2164_v54 = vsel %vm2116_vm11, 0.013333334, %v3637_v20  ;;  %vm1711_vm11 = vcmp.lt.s32.totalorder %v5478_v61, 75  ;;  %3524 = vpow2.f32 %v1455_v16  ;;  %v1459_v61 = vmul.f32 1.442695, %v1435_v34 }
 0x329   :  { %v2165_v32 = vsel %vm2117_vm13, 0.013333334, %v3637_v20  ;;  %vm1695_vm2 = vmand %vm1599_vm7, %vm1647_vm6  ;;  %v1438_v17 = vmin.f32 %v5648_v60, 0.0  ;;  %v1467_v26 = vmul.f32 1.442695, %v1439_v43 }
 0x32a   :  { %v2919_v51 = vpack.c.bf16 %v2165_v32, %v2164_v54  ;;  %vm1696_vm14 = vmand %vm1599_vm7, %vm1648_vm12 }
 0x32b   :  { %vm5589_vm6 = vmand %vm1695_vm2, %vm1743_vm10  ;;  %vm5997_vm10 = vcmp.ge.s32.totalorder %v5447_v36, 0  ;;  %v1469_v36 = vmul.f32 1.442695, %v1440_v53  ;;  %v1465_v3 = vmul.f32 1.442695, %v1438_v17 }
 0x32c   :  { %2920 = vmatprep.subr.bf16.mxu1 %v2919_v51  ;;  %vm5599_vm12 = vmand %vm1696_vm14, %vm1744_vm5  ;;  %vm5998_vm5 = vcmp.ge.s32.totalorder %v5460_v0, 0  ;;  %v2486_v0 = vadd.f32 -1.0, %v3511_v5  ;;  %v3515_v49 = vpop.eup %3514 }
 0x32d   :  { %vm1988_vm0 = vmand %vm4600_vm8, %vm5997_vm10  ;;  %vm1908_vm10 = vcmp.ge.s32.totalorder %v5529_v31, 0  ;;  %3526 = vpow2.f32 %v1469_v36  ;;  %v2484_v54 = vadd.f32 -1.0, %v3515_v49 }
 0x32e   :  { %vm1989_vm4 = vmand %vm4600_vm8, %vm5998_vm5  ;;  %vm1413_vm5 = vcmp.gt.f32.partialorder %v5402_v50, 0.0  ;;  %3528 = vpow2.f32 %v1461_v11  ;;  %v3517_v15 = vpop.eup %3516 }
 0x32f   :  { %vm2084_vm13 = vmand %vm1988_vm0, %vm2036_vm9  ;;  %v1488_v7 = vsel %vm1413_vm5, %v5402_v50, %v2486_v0  ;;  %3530 = vpow2.f32 %v1453_v2  ;;  %v3519_v50 = vpop.eup %3518  ;;  %v2492_v32 = vadd.f32 -1.0, %v3517_v15  ;;  %vm1418_vm5 = vcmp.gt.f32.partialorder %v5558_v18, 0.0 }
 0x330   :  { %vm2085_vm2 = vmand %vm1989_vm4, %vm2037_vm1  ;;  %vm1712_vm1 = vcmp.lt.s32.totalorder %v5493_v22, 75  ;;  %v2489_v22 = vadd.f32 -1.0, %v3513_v38  ;;  %3532 = vpow2.f32 %v1459_v61  ;;  %v2488_v51 = vadd.f32 -1.0, %v3519_v50 }
 0x331   :  { %vm2132_vm14 = vmor %vm5589_vm6, %vm2084_vm13  ;;  %3534 = vpow2.f32 %v1467_v26 }
 0x332   :  { %vm2133_vm9 = vmor %vm5599_vm12, %vm2085_vm2  ;;  %v2180_v30 = vsel %vm2132_vm14, 0.013333334, %v3637_v20  ;;  %3536 = vpow2.f32 %v1465_v3 }
 0x333   :  { %v2181_v4 = vsel %vm2133_vm9, 0.013333334, %v3637_v20  ;;  %vm1663_vm6 = vmand %vm1599_vm7, %vm1615_vm15  ;;  %vm1909_vm15 = vcmp.ge.s32.totalorder %v1858_v21, 0  ;;  %vm6003_vm9 = vmmov 0  }
 0x334   :  { %v2945_v42 = vpack.c.bf16 %v2181_v4, %v2180_v30  ;;  %vm1664_vm12 = vmand %vm1599_vm7, %vm1616_vm3  ;;  %vm2004_vm7 = vcmp.lt.s32.totalorder %v5529_v31, 75  ;;  %v3521_v31 = vpop.eup %3520 }
 0x335   :  { %vm5657_vm0 = vmand %vm1663_vm6, %vm1711_vm11  ;;  %vm2005_vm11 = vcmp.lt.s32.totalorder %v1858_v21, 75  ;;  %v3523_v37 = vpop.eup %3522  ;;  %v2495_v6 = vadd.f32 -1.0, %v3521_v31  ;;  %vm1411_vm6 = vcmp.gt.f32.partialorder %v5482_v41, 0.0 }
 0x336   :  { %2946 = vmatpush3.bf16.msra.mxu0 %v2945_v42  ;;  %vm5664_vm4 = vmand %vm1664_vm12, %vm1712_vm1  ;;  %v3525_v57 = vpop.eup %3524  ;;  %vm1419_vm12 = vcmp.gt.f32.partialorder %v5499_v19, 0.0  ;;  %v2487_v44 = vadd.f32 -1.0, %v3523_v37 }
 0x337   :  { %vm1956_vm3 = vmand %vm4600_vm8, %vm1908_vm10  ;;  %vm1416_vm10 = vcmp.gt.f32.partialorder %v5450_v46, 0.0  ;;  %v3527_v56 = vpop.eup %3526  ;;  %v1494_v12 = vsel %vm1419_vm12, %v5499_v19, %v2492_v32  ;;  %v2491_v28 = vadd.f32 -1.0, %v3525_v57 }
 0x338   :  { %vm1957_vm13 = vmand %vm4600_vm8, %vm1909_vm15  ;;  %v1491_v33 = vsel %vm1416_vm10, %v5450_v46, %v2489_v22  ;;  %v1486_v46 = vsel %vm1411_vm6, %v5482_v41, %v2484_v54  ;;  %vm1422_vm15 = vcmp.gt.f32.partialorder %v5519_v63, 0.0  ;;  %v3529_v47 = vpop.eup %3528  ;;  %v2498_v40 = vadd.f32 -1.0, %v3527_v56 }
 0x339   :  { %vm2052_vm2 = vmand %vm1956_vm3, %vm2004_vm7  ;;  %2705 = vmatmul.mubr.f32.vlgmr.msra.gmra.mrb[10].mxu0 %v1488_v7  ;;  %v1497_v14 = vsel %vm1422_vm15, %v5519_v63, %v2495_v6  ;;  %v3531_v53 = vpop.eup %3530  ;;  %v1493_v19 = vsel %vm1418_vm5, %v5558_v18, %v2491_v28  ;;  %vm1425_vm7 = vcmp.gt.f32.partialorder %v5576_v62, 0.0  ;;  %vm1421_vm3 = vcmp.gt.f32.partialorder %v5595_v27, 0.0 }
 0x33a   :  { %vm2053_vm14 = vmand %vm1957_vm13, %vm2005_vm11  ;;  %2707 = vmatprep.mubr.msk.f32.mxu0 %vm6003_vm9, %v3637_v20  ;;  %v3533_v41 = vpop.eup %3532  ;;  %v2490_v5 = vadd.f32 -1.0, %v3531_v53  ;;  %v1500_v63 = vsel %vm1425_vm7, %v5576_v62, %v2498_v40  ;;  %vm1417_vm11 = vcmp.gt.f32.partialorder %v5605_v24, 0.0  ;;  %vm1420_vm13 = vcmp.gt.f32.partialorder %v5621_v29, 0.0 }
 0x33b   :  { %vm2100_vm1 = vmor %vm5657_vm0, %vm2052_vm2  ;;  %vm1415_vm0 = vcmp.gt.f32.partialorder %v5509_v52, 0.0  ;;  %v3535_v21 = vpop.eup %3534  ;;  %v2493_v9 = vadd.f32 -1.0, %v3533_v41  ;;  %vm1424_vm2 = vcmp.gt.f32.partialorder %v5630_v55, 0.0 }
 0x33c   :  { %vm2101_vm8 = vmor %vm5664_vm4, %vm2053_vm14  ;;  %v2148_v58 = vsel %vm2100_vm1, 0.013333334, %v3637_v20  ;;  %v1490_v10 = vsel %vm1415_vm0, %v5509_v52, %v2488_v51  ;;  %vm1414_vm4 = vcmp.gt.f32.partialorder %v5547_v48, 0.0  ;;  %v2494_v52 = vadd.f32 -1.0, %v3529_v47  ;;  %v3537_v25 = vpop.eup %3536 }
 0x33d   :  { %v2149_v45 = vsel %vm2101_vm8, 0.013333334, %v3637_v20  ;;  %2708 = vmatmul.mubr.f32.gmra.mrb[12].mxu0 %v1491_v33  ;;  %v1489_v1 = vsel %vm1414_vm4, %v5547_v48, %v2487_v44  ;;  %v2497_v16 = vadd.f32 -1.0, %v3535_v21  ;;  %v1492_v48 = vsel %vm1417_vm11, %v5605_v24, %v2490_v5  ;;  %v2362_v24 = vld [vmem:[%s5746_s3] sm:$0xff] }
 0x33e   :  { %v2921_v59 = vpack.c.bf16 %v2149_v45, %v2148_v58  ;;  %2710 = vmatprep.mubr.msk.f32.mxu0 %vm6003_vm9, %v3637_v20  ;;  %v1496_v18 = vsel %vm1421_vm3, %v5595_v27, %v2494_v52  ;;  %v2496_v62 = vadd.f32 -1.0, %v3537_v25  ;;  %vm1423_vm14 = vcmp.gt.f32.partialorder %v5648_v60, 0.0 }
 0x33f   :  { %v1499_v13 = vsel %vm1424_vm2, %v5630_v55, %v2497_v16  ;;  %v3539_v55 = vld [vmem:[%s5745_s2 + $0x8] sm:$0xff] }
 0x340   :  { %2922 = vmatpush3.bf16.msra.mxu1 %v2921_v59  ;;  %v1498_v27 = vsel %vm1423_vm14, %v5648_v60, %v2496_v62  ;;  %v2363_v59 = vld [vmem:[%s5746_s3 + $0x8] sm:$0xff] }
 0x341   :  { %2711 = vmatmul.mubr.f32.gmra.mrb[14].mxu0 %v1494_v12 }
 0x342   :  { %2713 = vmatprep.mubr.msk.f32.mxu0 %vm6003_vm9, %v3637_v20 }
 0x343   :  { %2247 = vmatmul.mubr.f32.vlgmr.msra.gmra.mrb[20].mxu1 %v1486_v46 }
 0x344   :  { %2251 = vmatprep.mubr.f32.mxu1 %v1490_v10 }
 0x345   :  { %2714 = vmatmul.mubr.f32.gmra.mrb[16].mxu0 %v1497_v14 }
 0x346   :  { %2716 = vmatprep.mubr.msk.f32.mxu0 %vm6003_vm9, %v3637_v20  ;;  %v1495_v20 = vsel %vm1420_vm13, %v5621_v29, %v2493_v9  ;;  %vm2372_vm9 = vcmask 326656   ;;  %v3639_v29 = vmov 3  }
 0x347   :  { %2252 = vmatmul.mubr.f32.gmra.mrb[22].mxu1 %v1489_v1  ;;  %3497 = vset.pattern.permute.xlu1 %v3639_v29 }
 0x348   :  { %2256 = vmatprep.mubr.f32.mxu1 %v1493_v19  ;;  %3496 = vset.pattern.permute.xlu0 %v3639_v29 }
 0x349   :  { %2717 = vmatmul.mubr.f32.gmra.mrb[18].mxu0 %v1500_v63  ;;  %2369 = vperm.xlu1 %3497, %v3539_v55  }
 0x34a   :  { %2365 = vperm.xlu0 %3496, %v3540_v23  }
 0x34b   :  { %2257 = vmatmul.mubr.f32.gmra.mrb[24].mxu1 %v1492_v48 }
 0x34c   :  { %2261 = vmatprep.mubr.f32.mxu1 %v1496_v18 }
 0x34f   :  { %2262 = vmatmul.mubr.f32.gmra.mrb[26].mxu1 %v1495_v20 }
 0x350   :  { %2266 = vmatprep.mubr.f32.mxu1 %v1499_v13 }
 0x353   :  { %2267 = vmatmul.mubr.f32.gmra.mrb[28].mxu1 %v1498_v27 }
 0x354   :  { %2729 = vmatprep.mubr.msk.f32.mxu1 %vm2372_vm9, %v2362_v24 }
 0x3c8   :  { %v2370_v6 = vpop.permute.xlu1 %2369 }
 0x3c9   :  { %v2366_v56 = vpop.permute.xlu0 %2365 }
 0x40c   :  { %v2338_v39 = vpop.f32.mrb[10].mxu0 }
 0x40d   :  { %v2706_v36 = vpop.f32.mrb[11].mxu0 }
 0x410   :  { %v2343_v30 = vpop.f32.mrb[12].mxu0 }
 0x411   :  { %v2709_v0 = vpop.f32.mrb[13].mxu0 }
 0x414   :  { %v2348_v34 = vpop.f32.mrb[14].mxu0 }
 0x415   :  { %v2712_v4 = vpop.f32.mrb[15].mxu0 }
 0x416   :  { %v2629_v60 = vpop.f32.mrb[20].mxu1 }
 0x417   :  { %v2630_v11 = vpop.f32.mrb[21].mxu1 }
 0x418   :  { %v2631_v42 = vadd.f32 %v2630_v11, %v2629_v60  ;;  %v2353_v43 = vpop.f32.mrb[16].mxu0 }
 0x419   :  { %v2715_v38 = vpop.f32.mrb[17].mxu0 }
 0x41a   :  { %v2339_v2 = vadd.f32 %v2631_v42, %v2338_v39  ;;  %v2632_v35 = vpop.f32.mrb[22].mxu1 }
 0x41b   :  { %v2633_v8 = vpop.f32.mrb[23].mxu1 }
 0x41c   :  { %v2634_v7 = vadd.f32 %v2633_v8, %v2632_v35  ;;  %v2358_v61 = vpop.f32.mrb[18].mxu0 }
 0x41d   :  { %v2718_v17 = vpop.f32.mrb[19].mxu0 }
 0x41e   :  { %v2344_v49 = vadd.f32 %v2634_v7, %v2343_v30  ;;  %v2635_v22 = vpop.f32.mrb[24].mxu1 }
 0x41f   :  { %v2636_v26 = vpop.f32.mrb[25].mxu1 }
 0x420   :  { %v2637_v15 = vadd.f32 %v2636_v26, %v2635_v22  ;;  %v2947_v50 = vpack.c.bf16 %v2344_v49, %v2339_v2 }
 0x422   :  { %v2349_v31 = vadd.f32 %v2637_v15, %v2348_v34  ;;  %2948 = vmatprep.subr.bf16.mxu1 %v2947_v50  ;;  %v2638_v54 = vpop.f32.mrb[26].mxu1 }
 0x423   :  { %2950 = vmatpush3.bf16.msra.mxu1 %v2947_v50  ;;  %v2639_v3 = vpop.f32.mrb[27].mxu1 }
 0x424   :  { %v2640_v58 = vadd.f32 %v2639_v3, %v2638_v54 }
 0x426   :  { %v2354_v33 = vadd.f32 %v2640_v58, %v2353_v43  ;;  %v2641_v32 = vpop.f32.mrb[28].mxu1 }
 0x427   :  { %v2642_v37 = vpop.f32.mrb[29].mxu1 }
 0x428   :  { %v2951_v45 = vpack.c.bf16 %v2354_v33, %v2349_v31  ;;  %v2643_v51 = vadd.f32 %v2642_v37, %v2641_v32 }
 0x42a   :  { %2952 = vmatprep.subr.bf16.mxu1 %v2951_v45  ;;  %v2359_v57 = vadd.f32 %v2643_v51, %v2358_v61 }
 0x42b   :  { %2954 = vmatpush3.bf16.msra.mxu1 %v2951_v45 }
 0x42c   :  { %2727 = vmatprep.subr.mxu1 %v2359_v57 }
 0x42f   :  { %2728 = vmatpush3.msra.mxu1 %v2359_v57 }
 0x430   :  { %2730 = vmatmul.mubr.msk.f32.vlgmr.msra.gmra.mrb[30].mxu1 %vm2372_vm9, %v2363_v59 }
 0x503   :  { %v2731_v46 = vpop.f32.mrb[30].mxu1 }
 0x504   :  { %v2451_v12 = vadd.f32 %v2731_v46, %v2370_v6  ;;  %v2445_v10 = vpop.f32.mrb[31].mxu1 }
 0x505   :  { %v2446_v28 = vadd.f32 %v2445_v10, %v2366_v56 }
 0x506   :  { %2455 = vst [vmem:[#allocation7 + $0x8] sm:$0xff] %v2451_v12 }
 0x507   :  { %2454 = vst [vmem:[#allocation7] sm:$0xff] %v2446_v28 }
 0x508   :  { %3596 = shalt.err (!%p3593_p6)
}
 0x509   :  { %s3597_s24 = scalar_lea.hbm %s5747_s4, 256 }
 0x50a   :  { %p3598_p7 = scmp.ne.s32.totalorder %s5747_s4, %s3597_s24  ;;  %p3601_p8 = scmp.lt.u32.totalorder %s3597_s24, %s5747_s4 }
 0x50c   :  { %p3603_p9 = pnand %p3601_p8, %p3598_p7 }
 0x50e   :  { %3606 = shalt.err (!%p3603_p9)
}
 0x50f   :  { %s3641_s29 = smov 128   ;;  %s3642_s30 = smov 8  }
 0x510   :  { %2467 = dma.vmem_to_hbm [thread:$0]  %s2462_s21, 256, %s5747_s4, [#allocation4], %s3641_s29, %s3641_s29, %s3642_s30  }
 0x511   :  { %3611 = dma.done.wait [#allocation4], 256  }
 0x512   :  { %3612 = vsyncadd [#allocation4], 4294967040 }
 0x513   :  { %2471 = vsyncpa [#allocation3], 1 }
 0x514   :  { %2472 = vsyncpa [#allocation6], 1 }
 0x515   :  { %2473 = vsyncpa [#allocation4], 1 }

</bundles_post_ra>
